<compile_context>
chip_gen: v7x
topology: tpu7x:2x2x1
jax: 0.10.0
libtpu: 0.0.40
codegen_flags: <defaults>
</compile_context>

<pallas_src>
import math

import jax
import jax.numpy as jnp
from jax.experimental import pallas as pl
from jax.experimental.pallas import tpu as pltpu


def make_mha_kernel(b_tile, tq, seq_len, hid_dim, nhead, return_attention):
    head_dim = hid_dim // nhead
    Mq = b_tile * tq          # query rows fed to the per-head projections / fc_o
    Mkv = b_tile * seq_len    # key/value rows

    def mha_kernel(q_ref, k_ref, v_ref,
                   wq_ref, bq_ref, wk_ref, bk_ref, wv_ref, bv_ref,
                   wo_ref, bo_ref,
                   *out_refs):
        if return_attention:
            out_ref, attn_ref = out_refs
        else:
            (out_ref,) = out_refs

        # Leading-dim merges only (cheap); cast activations to bf16 for the MXU.
        xq = q_ref[...].reshape(Mq, hid_dim).astype(jnp.bfloat16)
        xk = k_ref[...].reshape(Mkv, hid_dim).astype(jnp.bfloat16)
        xv = v_ref[...].reshape(Mkv, hid_dim).astype(jnp.bfloat16)

        # fc_o accumulator, summed over heads (replaces concat + scratch stores).
        acc = jnp.zeros((Mq, hid_dim), jnp.float32)

        for h in range(nhead):  # static unroll; nhead is small, LLO sees it all
            # Per-head projections straight from per-head weight slabs: K dim is
            # the full hid_dim, no lane-splitting slices, no stack/concat.
            # (Attention scale is pre-folded into wq/bq on the host.)
            qh = jnp.dot(xq, wq_ref[h], preferred_element_type=jnp.float32) + bq_ref[h]
            kh = jnp.dot(xk, wk_ref[h], preferred_element_type=jnp.float32) + bk_ref[h]
            vh = jnp.dot(xv, wv_ref[h], preferred_element_type=jnp.float32) + bv_ref[h]

            qh = qh.reshape(b_tile, tq, head_dim).astype(jnp.bfloat16)
            kh = kh.reshape(b_tile, seq_len, head_dim).astype(jnp.bfloat16)
            vh = vh.reshape(b_tile, seq_len, head_dim).astype(jnp.bfloat16)

            # Batched (over batch) scaled dot-product attention for this head.
            energy = jnp.einsum('bqd,bkd->bqk', qh, kh,
                                preferred_element_type=jnp.float32)  # (b, tq, S) f32
            m = jnp.max(energy, axis=-1, keepdims=True)
            e = jnp.exp(energy - m)
            denom = jnp.sum(e, axis=-1, keepdims=True)

            if return_attention:
                # Exact reciprocal for the stored attention -> rows sum to 1,
                # matching F.softmax.
                attn = e * (1.0 / denom)
                attn_ref[:, h, :, :] = attn                 # lane dim = S (dense)
                ctx = jnp.einsum('bqk,bkd->bqd', attn.astype(jnp.bfloat16), vh,
                                 preferred_element_type=jnp.float32)
            else:
                # Normalize AFTER the PV matmul: multiply over (b, tq, head_dim)
                # instead of (b, tq, S); approx reciprocal on the EUP slot.
                ctx = jnp.einsum('bqk,bkd->bqd', e.astype(jnp.bfloat16), vh,
                                 preferred_element_type=jnp.float32)
                ctx = ctx * pl.reciprocal(denom, approx=True)

            # fc_o contribution of head h: ctx_h @ Wo_h, accumulated in f32.
            acc = acc + jnp.dot(ctx.reshape(Mq, head_dim).astype(jnp.bfloat16),
                                wo_ref[h], preferred_element_type=jnp.float32)

        out_ref[...] = (acc + bo_ref[...]).reshape(b_tile, tq, hid_dim)

    return mha_kernel


def _choose_tiles(N, S, H, nhead, vmem_budget_bytes):
    """VMEM-aware (batch_tile, q_tile) selection."""
    # q-block: full S for modest sequences; otherwise a <=512 divisor so the
    # (b, nhead, tq, S) softmax intermediates don't blow up O(S^2).
    tq = S
    if S > 512:
        for cand in range(512, 7, -8):
            if S % cand == 0:
                tq = cand
                break

    head_dim = H // nhead

    def vmem_bytes(b):
        bf16, f32 = 2, 4
        w = 4 * H * H * bf16 + 4 * H * f32                 # weights (1-buffered) + biases
        q = 2 * b * tq * H * f32                           # double-buffered q tile
        kv = 2 * 2 * b * S * H * f32                       # double-buffered k, v tiles
        o = 2 * b * tq * H * f32                           # double-buffered out tile
        attn = 2 * b * nhead * tq * S * f32                # double-buffered attn tile
        live = (3 * b * S * head_dim + 3 * b * tq * S + 2 * b * tq * H) * f32
        return w + q + kv + o + attn + live

    n_q_blocks = S // tq
    feasible = []
    for cand in range(1, N + 1):
        if N % cand:
            continue
        grid_len = (N // cand) * n_q_blocks
        if grid_len < 2 and N * n_q_blocks >= 2:
            continue       # keep >= 2 grid steps so both v7x TensorCores get work
        if vmem_bytes(cand) > vmem_budget_bytes:
            continue
        feasible.append(cand)
    if not feasible:
        feasible = [1]
    # Prefer M = b*tq aligned to 256 (v6e MXU) then 128 (v5e), then largest b
    # (amortizes the ~0.35us per-grid-step overhead).
    best = max(feasible, key=lambda b: ((b * tq) % 256 == 0, (b * tq) % 128 == 0, b))
    return best, tq, vmem_bytes(best)


def multi_head_attention(query, key, value, params, nhead, *,
                         batch_tile=None, q_tile=None, return_attention=True):
    """query/key/value: [N, S, H] float32.

    Returns (out [N, S, H] f32, attn [N, nhead, S, S] f32 or None).
    """
    N, S, H = query.shape
    assert key.shape == (N, S, H) and value.shape == (N, S, H)
    assert H % nhead == 0
    assert S % 8 == 0, "pad sequence length to a multiple of 8 (sublane alignment)"
    head_dim = H // nhead

    vmem_budget = 48 << 20                       # stay under v7x's 64 MiB physical VMEM
    auto_b, auto_tq, est = _choose_tiles(N, S, H, nhead, vmem_budget)
    b_tile = batch_tile if batch_tile is not None else auto_b
    tq = q_tile if q_tile is not None else auto_tq
    assert N % b_tile == 0 and S % tq == 0
    assert tq == S or tq % 8 == 0
    vmem_limit = int(min(max(2 * est, 32 << 20), 64 << 20))

    inv_scale = 1.0 / math.sqrt(float(H))        # module divides energy by sqrt(hid_dim)

    # Host-side (free, once): per-head, pre-transposed bf16 weights.
    #   wX_heads[h] = W_X.T[:, h*hd:(h+1)*hd]   -> (hid_dim, head_dim)
    #   wo_heads[h] = W_O.T[h*hd:(h+1)*hd, :]   -> (head_dim, hid_dim)
    # The attention scale is folded into fc_q's weight and bias.
    def per_head_in(w, scale=1.0):
        return ((w * scale).T.reshape(H, nhead, head_dim)
                .transpose(1, 0, 2).astype(jnp.bfloat16))

    wq_h = per_head_in(params["wq"], inv_scale)
    wk_h = per_head_in(params["wk"])
    wv_h = per_head_in(params["wv"])
    wo_h = params["wo"].T.reshape(nhead, head_dim, H).astype(jnp.bfloat16)
    bq_h = (params["bq"] * inv_scale).reshape(nhead, 1, head_dim).astype(jnp.float32)
    bk_h = params["bk"].reshape(nhead, 1, head_dim).astype(jnp.float32)
    bv_h = params["bv"].reshape(nhead, 1, head_dim).astype(jnp.float32)
    bo = params["bo"].reshape(1, H).astype(jnp.float32)

    kernel = make_mha_kernel(b_tile, tq, S, H, nhead, return_attention)

    q_spec = pl.BlockSpec((b_tile, tq, H), lambda n, qi: (n, qi, 0))
    kv_spec = pl.BlockSpec((b_tile, S, H), lambda n, qi: (n, 0, 0))

    out_shapes = [jax.ShapeDtypeStruct((N, S, H), jnp.float32)]
    out_specs = [pl.BlockSpec((b_tile, tq, H), lambda n, qi: (n, qi, 0))]
    if return_attention:
        out_shapes.append(jax.ShapeDtypeStruct((N, nhead, S, S), jnp.float32))
        out_specs.append(pl.BlockSpec((b_tile, nhead, tq, S),
                                      lambda n, qi: (n, 0, qi, 0)))

    def const_spec(block_shape, single_buffered):
        nd = len(block_shape)
        kwargs = {"pipeline_mode": pl.Buffered(1)} if single_buffered else {}
        return pl.BlockSpec(block_shape, lambda n, qi: (0,) * nd, **kwargs)

    def run(single_buffered_weights):
        grid_spec = pltpu.PrefetchScalarGridSpec(
            num_scalar_prefetch=0,
            grid=(N // b_tile, S // tq),      # q-block innermost: K/V blocks stay resident
            in_specs=[
                q_spec, kv_spec, kv_spec,
                const_spec((nhead, H, head_dim), single_buffered_weights),   # fc_q W
                const_spec((nhead, 1, head_dim), single_buffered_weights),   # fc_q b
                const_spec((nhead, H, head_dim), single_buffered_weights),   # fc_k W
                const_spec((nhead, 1, head_dim), single_buffered_weights),   # fc_k b
                const_spec((nhead, H, head_dim), single_buffered_weights),   # fc_v W
                const_spec((nhead, 1, head_dim), single_buffered_weights),   # fc_v b
                const_spec((nhead, head_dim, H), single_buffered_weights),   # fc_o W
                const_spec((1, H), single_buffered_weights),                 # fc_o b
            ],
            out_specs=out_specs,
        )
        res = pl.pallas_call(
            kernel,
            out_shape=tuple(out_shapes),
            grid_spec=grid_spec,
            compiler_params=pltpu.CompilerParams(
                dimension_semantics=("parallel", "parallel"),
                vmem_limit_bytes=vmem_limit),
        )(query, key, value, wq_h, bq_h, wk_h, bk_h, wv_h, bv_h, wo_h, bo)
        return jax.block_until_ready(res)

    try:
        results = run(True)       # single-buffered constant-index weights
    except Exception:
        # Fallback for jax builds where pipeline_mode on pallas_call inputs is
        # unsupported: identical semantics, weights just double-buffered.
        results = run(False)

    if return_attention:
        out, attn = results
        return out, attn
    (out,) = results
    return out, None


def init_params(key, hid_dim):
    """Deterministic nn.Linear-style init: W, b ~ U(-1/sqrt(H), 1/sqrt(H))."""
    ks = jax.random.split(key, 8)
    bound = 1.0 / math.sqrt(hid_dim)

    def u(k, shape):
        return jax.random.uniform(k, shape, jnp.float32, -bound, bound)

    return {
        "wq": u(ks[0], (hid_dim, hid_dim)), "bq": u(ks[1], (hid_dim,)),
        "wk": u(ks[2], (hid_dim, hid_dim)), "bk": u(ks[3], (hid_dim,)),
        "wv": u(ks[4], (hid_dim, hid_dim)), "bv": u(ks[5], (hid_dim,)),
        "wo": u(ks[6], (hid_dim, hid_dim)), "bo": u(ks[7], (hid_dim,)),
    }


def reference_mha(query, key, value, params, nhead):
    """Pure-JAX (f32) reference matching the PyTorch forward (inputs_mask=None)."""
    N, S, H = query.shape
    hd = H // nhead
    scale = math.sqrt(float(H))

    def lin(x, w, b):
        return x @ w.T + b

    Q = lin(query, params["wq"], params["bq"]).reshape(N, S, nhead, hd).transpose(0, 2, 1, 3)
    K = lin(key,   params["wk"], params["bk"]).reshape(N, S, nhead, hd).transpose(0, 2, 1, 3)
    V = lin(value, params["wv"], params["bv"]).reshape(N, S, nhead, hd).transpose(0, 2, 1, 3)

    energy = jnp.einsum("nhqd,nhkd->nhqk", Q, K) / scale
    attn = jax.nn.softmax(energy, axis=-1)
    ctx = jnp.einsum("nhqk,nhkd->nhqd", attn, V)
    ctx = ctx.transpose(0, 2, 1, 3).reshape(N, S, H)
    out = lin(ctx, params["wo"], params["bo"])
    return out, attn


if __name__ == "__main__":
    N, S, H, NHEAD = 2, 8, 32, 4

    key = jax.random.PRNGKey(0)
    kq, kk, kv, kp = jax.random.split(key, 4)

    query = jax.random.normal(kq, (N, S, H), jnp.float32)
    key_in = jax.random.normal(kk, (N, S, H), jnp.float32)
    value = jax.random.normal(kv, (N, S, H), jnp.float32)

    params = init_params(kp, H)

    out, attn = multi_head_attention(query, key_in, value, params, NHEAD)
    out = jax.block_until_ready(out)
    attn = jax.block_until_ready(attn)

    # Numerical check against a pure-JAX f32 reference of the PyTorch forward.
    # Matmul operands are bf16 (f32 accumulation, f32 softmax statistics), so
    # tolerances are bf16-level; the returned attention uses an exact
    # reciprocal so its rows sum to 1 like F.softmax.
    out_ref, attn_ref = reference_mha(query, key_in, value, params, NHEAD)
    assert out.shape == (N, S, H) and attn.shape == (N, NHEAD, S, S)
    assert jnp.allclose(attn, attn_ref, atol=1e-2, rtol=1e-2), \
        float(jnp.max(jnp.abs(attn - attn_ref)))
    assert jnp.allclose(out, out_ref, atol=3e-2, rtol=3e-2), \
        float(jnp.max(jnp.abs(out - out_ref)))
    assert jnp.allclose(jnp.sum(attn, axis=-1), 1.0, atol=1e-3)

    print("KERNEL_OK")
</pallas_src>

<mosaic_0001>
module attributes {stable_mosaic.version = 11 : i64} {
  func.func @mha_kernel(%arg0: i32, %arg1: i32, %arg2: memref<1x8x32xf32, #tpu.memory_space<vmem>>, %arg3: memref<1x8x32xf32, #tpu.memory_space<vmem>>, %arg4: memref<1x8x32xf32, #tpu.memory_space<vmem>>, %arg5: memref<4x32x8xbf16, #tpu.memory_space<vmem>>, %arg6: memref<4x1x8xf32, #tpu.memory_space<vmem>>, %arg7: memref<4x32x8xbf16, #tpu.memory_space<vmem>>, %arg8: memref<4x1x8xf32, #tpu.memory_space<vmem>>, %arg9: memref<4x32x8xbf16, #tpu.memory_space<vmem>>, %arg10: memref<4x1x8xf32, #tpu.memory_space<vmem>>, %arg11: memref<4x8x32xbf16, #tpu.memory_space<vmem>>, %arg12: memref<1x32xf32, #tpu.memory_space<vmem>>, %arg13: memref<1x8x32xf32, #tpu.memory_space<vmem>>, %arg14: memref<1x4x8x8xf32, #tpu.memory_space<vmem>>) attributes {dimension_semantics = [#tpu.dimension_semantics<parallel>, #tpu.dimension_semantics<parallel>], iteration_bounds = array<i64: 2, 1>, scalar_prefetch = 0 : i64, scratch_operands = 0 : i64, tpu.core_type = #tpu.core_type<tc>, window_params = [{transform_indices = @transform_0, window_bounds = array<i64: 1, 8, 32>}, {transform_indices = @transform_1, window_bounds = array<i64: 1, 8, 32>}, {transform_indices = @transform_2, window_bounds = array<i64: 1, 8, 32>}, {pipeline_mode = #tpu.pipeline_mode<synchronous>, transform_indices = @transform_3, window_bounds = array<i64: 4, 32, 8>}, {pipeline_mode = #tpu.pipeline_mode<synchronous>, transform_indices = @transform_4, window_bounds = array<i64: 4, 1, 8>}, {pipeline_mode = #tpu.pipeline_mode<synchronous>, transform_indices = @transform_5, window_bounds = array<i64: 4, 32, 8>}, {pipeline_mode = #tpu.pipeline_mode<synchronous>, transform_indices = @transform_6, window_bounds = array<i64: 4, 1, 8>}, {pipeline_mode = #tpu.pipeline_mode<synchronous>, transform_indices = @transform_7, window_bounds = array<i64: 4, 32, 8>}, {pipeline_mode = #tpu.pipeline_mode<synchronous>, transform_indices = @transform_8, window_bounds = array<i64: 4, 1, 8>}, {pipeline_mode = #tpu.pipeline_mode<synchronous>, transform_indices = @transform_9, window_bounds = array<i64: 4, 8, 32>}, {pipeline_mode = #tpu.pipeline_mode<synchronous>, transform_indices = @transform_10, window_bounds = array<i64: 1, 32>}, {transform_indices = @transform_11, window_bounds = array<i64: 1, 8, 32>}, {transform_indices = @transform_12, window_bounds = array<i64: 1, 4, 8, 8>}]} {
    %c0 = arith.constant 0 : index
    %c0_0 = arith.constant 0 : index
    %c0_1 = arith.constant 0 : index
    %0 = vector.load %arg2[%c0, %c0_0, %c0_1] : memref<1x8x32xf32, #tpu.memory_space<vmem>>, vector<1x8x32xf32>
    %1 = vector.shape_cast %0 : vector<1x8x32xf32> to vector<8x32xf32>
    %2 = arith.truncf %1 : vector<8x32xf32> to vector<8x32xbf16>
    %c0_2 = arith.constant 0 : index
    %c0_3 = arith.constant 0 : index
    %c0_4 = arith.constant 0 : index
    %3 = vector.load %arg3[%c0_2, %c0_3, %c0_4] : memref<1x8x32xf32, #tpu.memory_space<vmem>>, vector<1x8x32xf32>
    %4 = vector.shape_cast %3 : vector<1x8x32xf32> to vector<8x32xf32>
    %5 = arith.truncf %4 : vector<8x32xf32> to vector<8x32xbf16>
    %c0_5 = arith.constant 0 : index
    %c0_6 = arith.constant 0 : index
    %c0_7 = arith.constant 0 : index
    %6 = vector.load %arg4[%c0_5, %c0_6, %c0_7] : memref<1x8x32xf32, #tpu.memory_space<vmem>>, vector<1x8x32xf32>
    %7 = vector.shape_cast %6 : vector<1x8x32xf32> to vector<8x32xf32>
    %8 = arith.truncf %7 : vector<8x32xf32> to vector<8x32xbf16>
    %cst = arith.constant 0.000000e+00 : f32
    %9 = vector.broadcast %cst : f32 to vector<8x32xf32>
    %c0_8 = arith.constant 0 : index
    %c0_9 = arith.constant 0 : index
    %c0_10 = arith.constant 0 : index
    %10 = vector.load %arg5[%c0_8, %c0_9, %c0_10] : memref<4x32x8xbf16, #tpu.memory_space<vmem>>, vector<1x32x8xbf16>
    %11 = vector.shape_cast %10 : vector<1x32x8xbf16> to vector<32x8xbf16>
    %cst_11 = arith.constant dense<0.000000e+00> : vector<8x8xf32>
    %12 = tpu.matmul %2, %11, %cst_11 {dimension_numbers = #tpu.dot_dimension_numbers<[1], [0], [0], [1], [0, 0, 1, 1], [], []>} : vector<8x32xbf16>, vector<32x8xbf16>, vector<8x8xf32> -> vector<8x8xf32>
    %c0_12 = arith.constant 0 : index
    %c0_13 = arith.constant 0 : index
    %c0_14 = arith.constant 0 : index
    %13 = vector.load %arg6[%c0_12, %c0_13, %c0_14] : memref<4x1x8xf32, #tpu.memory_space<vmem>>, vector<1x1x8xf32>
    %14 = vector.shape_cast %13 : vector<1x1x8xf32> to vector<1x8xf32>
    %15 = vector.broadcast %14 : vector<1x8xf32> to vector<8x8xf32>
    %16 = arith.addf %12, %15 : vector<8x8xf32>
    %c0_15 = arith.constant 0 : index
    %c0_16 = arith.constant 0 : index
    %c0_17 = arith.constant 0 : index
    %17 = vector.load %arg7[%c0_15, %c0_16, %c0_17] : memref<4x32x8xbf16, #tpu.memory_space<vmem>>, vector<1x32x8xbf16>
    %18 = vector.shape_cast %17 : vector<1x32x8xbf16> to vector<32x8xbf16>
    %cst_18 = arith.constant dense<0.000000e+00> : vector<8x8xf32>
    %19 = tpu.matmul %5, %18, %cst_18 {dimension_numbers = #tpu.dot_dimension_numbers<[1], [0], [0], [1], [0, 0, 1, 1], [], []>} : vector<8x32xbf16>, vector<32x8xbf16>, vector<8x8xf32> -> vector<8x8xf32>
    %c0_19 = arith.constant 0 : index
    %c0_20 = arith.constant 0 : index
    %c0_21 = arith.constant 0 : index
    %20 = vector.load %arg8[%c0_19, %c0_20, %c0_21] : memref<4x1x8xf32, #tpu.memory_space<vmem>>, vector<1x1x8xf32>
    %21 = vector.shape_cast %20 : vector<1x1x8xf32> to vector<1x8xf32>
    %22 = vector.broadcast %21 : vector<1x8xf32> to vector<8x8xf32>
    %23 = arith.addf %19, %22 : vector<8x8xf32>
    %c0_22 = arith.constant 0 : index
    %c0_23 = arith.constant 0 : index
    %c0_24 = arith.constant 0 : index
    %24 = vector.load %arg9[%c0_22, %c0_23, %c0_24] : memref<4x32x8xbf16, #tpu.memory_space<vmem>>, vector<1x32x8xbf16>
    %25 = vector.shape_cast %24 : vector<1x32x8xbf16> to vector<32x8xbf16>
    %cst_25 = arith.constant dense<0.000000e+00> : vector<8x8xf32>
    %26 = tpu.matmul %8, %25, %cst_25 {dimension_numbers = #tpu.dot_dimension_numbers<[1], [0], [0], [1], [0, 0, 1, 1], [], []>} : vector<8x32xbf16>, vector<32x8xbf16>, vector<8x8xf32> -> vector<8x8xf32>
    %c0_26 = arith.constant 0 : index
    %c0_27 = arith.constant 0 : index
    %c0_28 = arith.constant 0 : index
    %27 = vector.load %arg10[%c0_26, %c0_27, %c0_28] : memref<4x1x8xf32, #tpu.memory_space<vmem>>, vector<1x1x8xf32>
    %28 = vector.shape_cast %27 : vector<1x1x8xf32> to vector<1x8xf32>
    %29 = vector.broadcast %28 : vector<1x8xf32> to vector<8x8xf32>
    %30 = arith.addf %26, %29 : vector<8x8xf32>
    %31 = vector.shape_cast %16 : vector<8x8xf32> to vector<1x8x8xf32>
    %32 = arith.truncf %31 : vector<1x8x8xf32> to vector<1x8x8xbf16>
    %33 = vector.shape_cast %23 : vector<8x8xf32> to vector<1x8x8xf32>
    %34 = arith.truncf %33 : vector<1x8x8xf32> to vector<1x8x8xbf16>
    %35 = vector.shape_cast %30 : vector<8x8xf32> to vector<1x8x8xf32>
    %36 = arith.truncf %35 : vector<1x8x8xf32> to vector<1x8x8xbf16>
    "tpu.trace_start"() <{level = 10 : i32, message = "bqd,bkd->bqk"}> : () -> ()
    %cst_29 = arith.constant dense<0.000000e+00> : vector<1x8x8xf32>
    %37 = tpu.matmul %32, %34, %cst_29 {dimension_numbers = #tpu.dot_dimension_numbers<[2], [2], [1], [1], [0, 0, 0, 1, 1, 1], [0], [0]>} : vector<1x8x8xbf16>, vector<1x8x8xbf16>, vector<1x8x8xf32> -> vector<1x8x8xf32>
    "tpu.trace_stop"() : () -> ()
    %cst_30 = arith.constant dense<0xFF800000> : vector<1x8xf32>
    %38 = vector.multi_reduction <maximumf>, %37, %cst_30 [2] : vector<1x8x8xf32> to vector<1x8xf32>
    %39 = vector.shape_cast %38 : vector<1x8xf32> to vector<1x8x1xf32>
    %40 = vector.broadcast %39 : vector<1x8x1xf32> to vector<1x8x8xf32>
    %41 = arith.subf %37, %40 : vector<1x8x8xf32>
    %42 = math.exp %41 : vector<1x8x8xf32>
    %cst_31 = arith.constant dense<0.000000e+00> : vector<1x8xf32>
    %43 = vector.multi_reduction <add>, %42, %cst_31 [2] : vector<1x8x8xf32> to vector<1x8xf32>
    %44 = vector.shape_cast %43 : vector<1x8xf32> to vector<1x8x1xf32>
    %cst_32 = arith.constant 1.000000e+00 : f32
    %45 = vector.broadcast %cst_32 : f32 to vector<1x8x1xf32>
    %46 = arith.divf %45, %44 : vector<1x8x1xf32>
    %47 = vector.broadcast %46 : vector<1x8x1xf32> to vector<1x8x8xf32>
    %48 = arith.mulf %42, %47 : vector<1x8x8xf32>
    %c0_33 = arith.constant 0 : index
    %c0_34 = arith.constant 0 : index
    %c0_35 = arith.constant 0 : index
    %c0_36 = arith.constant 0 : index
    %49 = vector.load %arg14[%c0_33, %c0_34, %c0_35, %c0_36] : memref<1x4x8x8xf32, #tpu.memory_space<vmem>>, vector<1x1x8x8xf32>
    %50 = vector.shape_cast %49 : vector<1x1x8x8xf32> to vector<1x8x8xf32>
    %51 = vector.shape_cast %48 : vector<1x8x8xf32> to vector<1x1x8x8xf32>
    tpu.vector_store %arg14[%c0_33, %c0_34, %c0_35, %c0_36], %51 {strides = array<i32>} : memref<1x4x8x8xf32, #tpu.memory_space<vmem>>, vector<1x1x8x8xf32>,
    %52 = arith.truncf %48 : vector<1x8x8xf32> to vector<1x8x8xbf16>
    "tpu.trace_start"() <{level = 10 : i32, message = "bqk,bkd->bqd"}> : () -> ()
    %cst_37 = arith.constant dense<0.000000e+00> : vector<1x8x8xf32>
    %53 = tpu.matmul %52, %36, %cst_37 {dimension_numbers = #tpu.dot_dimension_numbers<[2], [1], [1], [2], [0, 0, 0, 1, 1, 2], [0], [0]>} : vector<1x8x8xbf16>, vector<1x8x8xbf16>, vector<1x8x8xf32> -> vector<1x8x8xf32>
    "tpu.trace_stop"() : () -> ()
    %54 = vector.shape_cast %53 : vector<1x8x8xf32> to vector<8x8xf32>
    %55 = arith.truncf %54 : vector<8x8xf32> to vector<8x8xbf16>
    %c0_38 = arith.constant 0 : index
    %c0_39 = arith.constant 0 : index
    %c0_40 = arith.constant 0 : index
    %56 = vector.load %arg11[%c0_38, %c0_39, %c0_40] : memref<4x8x32xbf16, #tpu.memory_space<vmem>>, vector<1x8x32xbf16>
    %57 = vector.shape_cast %56 : vector<1x8x32xbf16> to vector<8x32xbf16>
    %cst_41 = arith.constant dense<0.000000e+00> : vector<8x32xf32>
    %58 = tpu.matmul %55, %57, %cst_41 {dimension_numbers = #tpu.dot_dimension_numbers<[1], [0], [0], [1], [0, 0, 1, 1], [], []>} : vector<8x8xbf16>, vector<8x32xbf16>, vector<8x32xf32> -> vector<8x32xf32>
    %59 = arith.addf %9, %58 : vector<8x32xf32>
    %c1 = arith.constant 1 : index
    %c0_42 = arith.constant 0 : index
    %c0_43 = arith.constant 0 : index
    %60 = vector.load %arg5[%c1, %c0_42, %c0_43] : memref<4x32x8xbf16, #tpu.memory_space<vmem>>, vector<1x32x8xbf16>
    %61 = vector.shape_cast %60 : vector<1x32x8xbf16> to vector<32x8xbf16>
    %cst_44 = arith.constant dense<0.000000e+00> : vector<8x8xf32>
    %62 = tpu.matmul %2, %61, %cst_44 {dimension_numbers = #tpu.dot_dimension_numbers<[1], [0], [0], [1], [0, 0, 1, 1], [], []>} : vector<8x32xbf16>, vector<32x8xbf16>, vector<8x8xf32> -> vector<8x8xf32>
    %c1_45 = arith.constant 1 : index
    %c0_46 = arith.constant 0 : index
    %c0_47 = arith.constant 0 : index
    %63 = vector.load %arg6[%c1_45, %c0_46, %c0_47] : memref<4x1x8xf32, #tpu.memory_space<vmem>>, vector<1x1x8xf32>
    %64 = vector.shape_cast %63 : vector<1x1x8xf32> to vector<1x8xf32>
    %65 = vector.broadcast %64 : vector<1x8xf32> to vector<8x8xf32>
    %66 = arith.addf %62, %65 : vector<8x8xf32>
    %c1_48 = arith.constant 1 : index
    %c0_49 = arith.constant 0 : index
    %c0_50 = arith.constant 0 : index
    %67 = vector.load %arg7[%c1_48, %c0_49, %c0_50] : memref<4x32x8xbf16, #tpu.memory_space<vmem>>, vector<1x32x8xbf16>
    %68 = vector.shape_cast %67 : vector<1x32x8xbf16> to vector<32x8xbf16>
    %cst_51 = arith.constant dense<0.000000e+00> : vector<8x8xf32>
    %69 = tpu.matmul %5, %68, %cst_51 {dimension_numbers = #tpu.dot_dimension_numbers<[1], [0], [0], [1], [0, 0, 1, 1], [], []>} : vector<8x32xbf16>, vector<32x8xbf16>, vector<8x8xf32> -> vector<8x8xf32>
    %c1_52 = arith.constant 1 : index
    %c0_53 = arith.constant 0 : index
    %c0_54 = arith.constant 0 : index
    %70 = vector.load %arg8[%c1_52, %c0_53, %c0_54] : memref<4x1x8xf32, #tpu.memory_space<vmem>>, vector<1x1x8xf32>
    %71 = vector.shape_cast %70 : vector<1x1x8xf32> to vector<1x8xf32>
    %72 = vector.broadcast %71 : vector<1x8xf32> to vector<8x8xf32>
    %73 = arith.addf %69, %72 : vector<8x8xf32>
    %c1_55 = arith.constant 1 : index
    %c0_56 = arith.constant 0 : index
    %c0_57 = arith.constant 0 : index
    %74 = vector.load %arg9[%c1_55, %c0_56, %c0_57] : memref<4x32x8xbf16, #tpu.memory_space<vmem>>, vector<1x32x8xbf16>
    %75 = vector.shape_cast %74 : vector<1x32x8xbf16> to vector<32x8xbf16>
    %cst_58 = arith.constant dense<0.000000e+00> : vector<8x8xf32>
    %76 = tpu.matmul %8, %75, %cst_58 {dimension_numbers = #tpu.dot_dimension_numbers<[1], [0], [0], [1], [0, 0, 1, 1], [], []>} : vector<8x32xbf16>, vector<32x8xbf16>, vector<8x8xf32> -> vector<8x8xf32>
    %c1_59 = arith.constant 1 : index
    %c0_60 = arith.constant 0 : index
    %c0_61 = arith.constant 0 : index
    %77 = vector.load %arg10[%c1_59, %c0_60, %c0_61] : memref<4x1x8xf32, #tpu.memory_space<vmem>>, vector<1x1x8xf32>
    %78 = vector.shape_cast %77 : vector<1x1x8xf32> to vector<1x8xf32>
    %79 = vector.broadcast %78 : vector<1x8xf32> to vector<8x8xf32>
    %80 = arith.addf %76, %79 : vector<8x8xf32>
    %81 = vector.shape_cast %66 : vector<8x8xf32> to vector<1x8x8xf32>
    %82 = arith.truncf %81 : vector<1x8x8xf32> to vector<1x8x8xbf16>
    %83 = vector.shape_cast %73 : vector<8x8xf32> to vector<1x8x8xf32>
    %84 = arith.truncf %83 : vector<1x8x8xf32> to vector<1x8x8xbf16>
    %85 = vector.shape_cast %80 : vector<8x8xf32> to vector<1x8x8xf32>
    %86 = arith.truncf %85 : vector<1x8x8xf32> to vector<1x8x8xbf16>
    "tpu.trace_start"() <{level = 10 : i32, message = "bqd,bkd->bqk"}> : () -> ()
    %cst_62 = arith.constant dense<0.000000e+00> : vector<1x8x8xf32>
    %87 = tpu.matmul %82, %84, %cst_62 {dimension_numbers = #tpu.dot_dimension_numbers<[2], [2], [1], [1], [0, 0, 0, 1, 1, 1], [0], [0]>} : vector<1x8x8xbf16>, vector<1x8x8xbf16>, vector<1x8x8xf32> -> vector<1x8x8xf32>
    "tpu.trace_stop"() : () -> ()
    %cst_63 = arith.constant dense<0xFF800000> : vector<1x8xf32>
    %88 = vector.multi_reduction <maximumf>, %87, %cst_63 [2] : vector<1x8x8xf32> to vector<1x8xf32>
    %89 = vector.shape_cast %88 : vector<1x8xf32> to vector<1x8x1xf32>
    %90 = vector.broadcast %89 : vector<1x8x1xf32> to vector<1x8x8xf32>
    %91 = arith.subf %87, %90 : vector<1x8x8xf32>
    %92 = math.exp %91 : vector<1x8x8xf32>
    %cst_64 = arith.constant dense<0.000000e+00> : vector<1x8xf32>
    %93 = vector.multi_reduction <add>, %92, %cst_64 [2] : vector<1x8x8xf32> to vector<1x8xf32>
    %94 = vector.shape_cast %93 : vector<1x8xf32> to vector<1x8x1xf32>
    %cst_65 = arith.constant 1.000000e+00 : f32
    %95 = vector.broadcast %cst_65 : f32 to vector<1x8x1xf32>
    %96 = arith.divf %95, %94 : vector<1x8x1xf32>
    %97 = vector.broadcast %96 : vector<1x8x1xf32> to vector<1x8x8xf32>
    %98 = arith.mulf %92, %97 : vector<1x8x8xf32>
    %c0_66 = arith.constant 0 : index
    %c1_67 = arith.constant 1 : index
    %c0_68 = arith.constant 0 : index
    %c0_69 = arith.constant 0 : index
    %99 = vector.load %arg14[%c0_66, %c1_67, %c0_68, %c0_69] : memref<1x4x8x8xf32, #tpu.memory_space<vmem>>, vector<1x1x8x8xf32>
    %100 = vector.shape_cast %99 : vector<1x1x8x8xf32> to vector<1x8x8xf32>
    %101 = vector.shape_cast %98 : vector<1x8x8xf32> to vector<1x1x8x8xf32>
    tpu.vector_store %arg14[%c0_66, %c1_67, %c0_68, %c0_69], %101 {strides = array<i32>} : memref<1x4x8x8xf32, #tpu.memory_space<vmem>>, vector<1x1x8x8xf32>,
    %102 = arith.truncf %98 : vector<1x8x8xf32> to vector<1x8x8xbf16>
    "tpu.trace_start"() <{level = 10 : i32, message = "bqk,bkd->bqd"}> : () -> ()
    %cst_70 = arith.constant dense<0.000000e+00> : vector<1x8x8xf32>
    %103 = tpu.matmul %102, %86, %cst_70 {dimension_numbers = #tpu.dot_dimension_numbers<[2], [1], [1], [2], [0, 0, 0, 1, 1, 2], [0], [0]>} : vector<1x8x8xbf16>, vector<1x8x8xbf16>, vector<1x8x8xf32> -> vector<1x8x8xf32>
    "tpu.trace_stop"() : () -> ()
    %104 = vector.shape_cast %103 : vector<1x8x8xf32> to vector<8x8xf32>
    %105 = arith.truncf %104 : vector<8x8xf32> to vector<8x8xbf16>
    %c1_71 = arith.constant 1 : index
    %c0_72 = arith.constant 0 : index
    %c0_73 = arith.constant 0 : index
    %106 = vector.load %arg11[%c1_71, %c0_72, %c0_73] : memref<4x8x32xbf16, #tpu.memory_space<vmem>>, vector<1x8x32xbf16>
    %107 = vector.shape_cast %106 : vector<1x8x32xbf16> to vector<8x32xbf16>
    %cst_74 = arith.constant dense<0.000000e+00> : vector<8x32xf32>
    %108 = tpu.matmul %105, %107, %cst_74 {dimension_numbers = #tpu.dot_dimension_numbers<[1], [0], [0], [1], [0, 0, 1, 1], [], []>} : vector<8x8xbf16>, vector<8x32xbf16>, vector<8x32xf32> -> vector<8x32xf32>
    %109 = arith.addf %59, %108 : vector<8x32xf32>
    %c2 = arith.constant 2 : index
    %c0_75 = arith.constant 0 : index
    %c0_76 = arith.constant 0 : index
    %110 = vector.load %arg5[%c2, %c0_75, %c0_76] : memref<4x32x8xbf16, #tpu.memory_space<vmem>>, vector<1x32x8xbf16>
    %111 = vector.shape_cast %110 : vector<1x32x8xbf16> to vector<32x8xbf16>
    %cst_77 = arith.constant dense<0.000000e+00> : vector<8x8xf32>
    %112 = tpu.matmul %2, %111, %cst_77 {dimension_numbers = #tpu.dot_dimension_numbers<[1], [0], [0], [1], [0, 0, 1, 1], [], []>} : vector<8x32xbf16>, vector<32x8xbf16>, vector<8x8xf32> -> vector<8x8xf32>
    %c2_78 = arith.constant 2 : index
    %c0_79 = arith.constant 0 : index
    %c0_80 = arith.constant 0 : index
    %113 = vector.load %arg6[%c2_78, %c0_79, %c0_80] : memref<4x1x8xf32, #tpu.memory_space<vmem>>, vector<1x1x8xf32>
    %114 = vector.shape_cast %113 : vector<1x1x8xf32> to vector<1x8xf32>
    %115 = vector.broadcast %114 : vector<1x8xf32> to vector<8x8xf32>
    %116 = arith.addf %112, %115 : vector<8x8xf32>
    %c2_81 = arith.constant 2 : index
    %c0_82 = arith.constant 0 : index
    %c0_83 = arith.constant 0 : index
    %117 = vector.load %arg7[%c2_81, %c0_82, %c0_83] : memref<4x32x8xbf16, #tpu.memory_space<vmem>>, vector<1x32x8xbf16>
    %118 = vector.shape_cast %117 : vector<1x32x8xbf16> to vector<32x8xbf16>
    %cst_84 = arith.constant dense<0.000000e+00> : vector<8x8xf32>
    %119 = tpu.matmul %5, %118, %cst_84 {dimension_numbers = #tpu.dot_dimension_numbers<[1], [0], [0], [1], [0, 0, 1, 1], [], []>} : vector<8x32xbf16>, vector<32x8xbf16>, vector<8x8xf32> -> vector<8x8xf32>
    %c2_85 = arith.constant 2 : index
    %c0_86 = arith.constant 0 : index
    %c0_87 = arith.constant 0 : index
    %120 = vector.load %arg8[%c2_85, %c0_86, %c0_87] : memref<4x1x8xf32, #tpu.memory_space<vmem>>, vector<1x1x8xf32>
    %121 = vector.shape_cast %120 : vector<1x1x8xf32> to vector<1x8xf32>
    %122 = vector.broadcast %121 : vector<1x8xf32> to vector<8x8xf32>
    %123 = arith.addf %119, %122 : vector<8x8xf32>
    %c2_88 = arith.constant 2 : index
    %c0_89 = arith.constant 0 : index
    %c0_90 = arith.constant 0 : index
    %124 = vector.load %arg9[%c2_88, %c0_89, %c0_90] : memref<4x32x8xbf16, #tpu.memory_space<vmem>>, vector<1x32x8xbf16>
    %125 = vector.shape_cast %124 : vector<1x32x8xbf16> to vector<32x8xbf16>
    %cst_91 = arith.constant dense<0.000000e+00> : vector<8x8xf32>
    %126 = tpu.matmul %8, %125, %cst_91 {dimension_numbers = #tpu.dot_dimension_numbers<[1], [0], [0], [1], [0, 0, 1, 1], [], []>} : vector<8x32xbf16>, vector<32x8xbf16>, vector<8x8xf32> -> vector<8x8xf32>
    %c2_92 = arith.constant 2 : index
    %c0_93 = arith.constant 0 : index
    %c0_94 = arith.constant 0 : index
    %127 = vector.load %arg10[%c2_92, %c0_93, %c0_94] : memref<4x1x8xf32, #tpu.memory_space<vmem>>, vector<1x1x8xf32>
    %128 = vector.shape_cast %127 : vector<1x1x8xf32> to vector<1x8xf32>
    %129 = vector.broadcast %128 : vector<1x8xf32> to vector<8x8xf32>
    %130 = arith.addf %126, %129 : vector<8x8xf32>
    %131 = vector.shape_cast %116 : vector<8x8xf32> to vector<1x8x8xf32>
    %132 = arith.truncf %131 : vector<1x8x8xf32> to vector<1x8x8xbf16>
    %133 = vector.shape_cast %123 : vector<8x8xf32> to vector<1x8x8xf32>
    %134 = arith.truncf %133 : vector<1x8x8xf32> to vector<1x8x8xbf16>
    %135 = vector.shape_cast %130 : vector<8x8xf32> to vector<1x8x8xf32>
    %136 = arith.truncf %135 : vector<1x8x8xf32> to vector<1x8x8xbf16>
    "tpu.trace_start"() <{level = 10 : i32, message = "bqd,bkd->bqk"}> : () -> ()
    %cst_95 = arith.constant dense<0.000000e+00> : vector<1x8x8xf32>
    %137 = tpu.matmul %132, %134, %cst_95 {dimension_numbers = #tpu.dot_dimension_numbers<[2], [2], [1], [1], [0, 0, 0, 1, 1, 1], [0], [0]>} : vector<1x8x8xbf16>, vector<1x8x8xbf16>, vector<1x8x8xf32> -> vector<1x8x8xf32>
    "tpu.trace_stop"() : () -> ()
    %cst_96 = arith.constant dense<0xFF800000> : vector<1x8xf32>
    %138 = vector.multi_reduction <maximumf>, %137, %cst_96 [2] : vector<1x8x8xf32> to vector<1x8xf32>
    %139 = vector.shape_cast %138 : vector<1x8xf32> to vector<1x8x1xf32>
    %140 = vector.broadcast %139 : vector<1x8x1xf32> to vector<1x8x8xf32>
    %141 = arith.subf %137, %140 : vector<1x8x8xf32>
    %142 = math.exp %141 : vector<1x8x8xf32>
    %cst_97 = arith.constant dense<0.000000e+00> : vector<1x8xf32>
    %143 = vector.multi_reduction <add>, %142, %cst_97 [2] : vector<1x8x8xf32> to vector<1x8xf32>
    %144 = vector.shape_cast %143 : vector<1x8xf32> to vector<1x8x1xf32>
    %cst_98 = arith.constant 1.000000e+00 : f32
    %145 = vector.broadcast %cst_98 : f32 to vector<1x8x1xf32>
    %146 = arith.divf %145, %144 : vector<1x8x1xf32>
    %147 = vector.broadcast %146 : vector<1x8x1xf32> to vector<1x8x8xf32>
    %148 = arith.mulf %142, %147 : vector<1x8x8xf32>
    %c0_99 = arith.constant 0 : index
    %c2_100 = arith.constant 2 : index
    %c0_101 = arith.constant 0 : index
    %c0_102 = arith.constant 0 : index
    %149 = vector.load %arg14[%c0_99, %c2_100, %c0_101, %c0_102] : memref<1x4x8x8xf32, #tpu.memory_space<vmem>>, vector<1x1x8x8xf32>
    %150 = vector.shape_cast %149 : vector<1x1x8x8xf32> to vector<1x8x8xf32>
    %151 = vector.shape_cast %148 : vector<1x8x8xf32> to vector<1x1x8x8xf32>
    tpu.vector_store %arg14[%c0_99, %c2_100, %c0_101, %c0_102], %151 {strides = array<i32>} : memref<1x4x8x8xf32, #tpu.memory_space<vmem>>, vector<1x1x8x8xf32>,
    %152 = arith.truncf %148 : vector<1x8x8xf32> to vector<1x8x8xbf16>
    "tpu.trace_start"() <{level = 10 : i32, message = "bqk,bkd->bqd"}> : () -> ()
    %cst_103 = arith.constant dense<0.000000e+00> : vector<1x8x8xf32>
    %153 = tpu.matmul %152, %136, %cst_103 {dimension_numbers = #tpu.dot_dimension_numbers<[2], [1], [1], [2], [0, 0, 0, 1, 1, 2], [0], [0]>} : vector<1x8x8xbf16>, vector<1x8x8xbf16>, vector<1x8x8xf32> -> vector<1x8x8xf32>
    "tpu.trace_stop"() : () -> ()
    %154 = vector.shape_cast %153 : vector<1x8x8xf32> to vector<8x8xf32>
    %155 = arith.truncf %154 : vector<8x8xf32> to vector<8x8xbf16>
    %c2_104 = arith.constant 2 : index
    %c0_105 = arith.constant 0 : index
    %c0_106 = arith.constant 0 : index
    %156 = vector.load %arg11[%c2_104, %c0_105, %c0_106] : memref<4x8x32xbf16, #tpu.memory_space<vmem>>, vector<1x8x32xbf16>
    %157 = vector.shape_cast %156 : vector<1x8x32xbf16> to vector<8x32xbf16>
    %cst_107 = arith.constant dense<0.000000e+00> : vector<8x32xf32>
    %158 = tpu.matmul %155, %157, %cst_107 {dimension_numbers = #tpu.dot_dimension_numbers<[1], [0], [0], [1], [0, 0, 1, 1], [], []>} : vector<8x8xbf16>, vector<8x32xbf16>, vector<8x32xf32> -> vector<8x32xf32>
    %159 = arith.addf %109, %158 : vector<8x32xf32>
    %c3 = arith.constant 3 : index
    %c0_108 = arith.constant 0 : index
    %c0_109 = arith.constant 0 : index
    %160 = vector.load %arg5[%c3, %c0_108, %c0_109] : memref<4x32x8xbf16, #tpu.memory_space<vmem>>, vector<1x32x8xbf16>
    %161 = vector.shape_cast %160 : vector<1x32x8xbf16> to vector<32x8xbf16>
    %cst_110 = arith.constant dense<0.000000e+00> : vector<8x8xf32>
    %162 = tpu.matmul %2, %161, %cst_110 {dimension_numbers = #tpu.dot_dimension_numbers<[1], [0], [0], [1], [0, 0, 1, 1], [], []>} : vector<8x32xbf16>, vector<32x8xbf16>, vector<8x8xf32> -> vector<8x8xf32>
    %c3_111 = arith.constant 3 : index
    %c0_112 = arith.constant 0 : index
    %c0_113 = arith.constant 0 : index
    %163 = vector.load %arg6[%c3_111, %c0_112, %c0_113] : memref<4x1x8xf32, #tpu.memory_space<vmem>>, vector<1x1x8xf32>
    %164 = vector.shape_cast %163 : vector<1x1x8xf32> to vector<1x8xf32>
    %165 = vector.broadcast %164 : vector<1x8xf32> to vector<8x8xf32>
    %166 = arith.addf %162, %165 : vector<8x8xf32>
    %c3_114 = arith.constant 3 : index
    %c0_115 = arith.constant 0 : index
    %c0_116 = arith.constant 0 : index
    %167 = vector.load %arg7[%c3_114, %c0_115, %c0_116] : memref<4x32x8xbf16, #tpu.memory_space<vmem>>, vector<1x32x8xbf16>
    %168 = vector.shape_cast %167 : vector<1x32x8xbf16> to vector<32x8xbf16>
    %cst_117 = arith.constant dense<0.000000e+00> : vector<8x8xf32>
    %169 = tpu.matmul %5, %168, %cst_117 {dimension_numbers = #tpu.dot_dimension_numbers<[1], [0], [0], [1], [0, 0, 1, 1], [], []>} : vector<8x32xbf16>, vector<32x8xbf16>, vector<8x8xf32> -> vector<8x8xf32>
    %c3_118 = arith.constant 3 : index
    %c0_119 = arith.constant 0 : index
    %c0_120 = arith.constant 0 : index
    %170 = vector.load %arg8[%c3_118, %c0_119, %c0_120] : memref<4x1x8xf32, #tpu.memory_space<vmem>>, vector<1x1x8xf32>
    %171 = vector.shape_cast %170 : vector<1x1x8xf32> to vector<1x8xf32>
    %172 = vector.broadcast %171 : vector<1x8xf32> to vector<8x8xf32>
    %173 = arith.addf %169, %172 : vector<8x8xf32>
    %c3_121 = arith.constant 3 : index
    %c0_122 = arith.constant 0 : index
    %c0_123 = arith.constant 0 : index
    %174 = vector.load %arg9[%c3_121, %c0_122, %c0_123] : memref<4x32x8xbf16, #tpu.memory_space<vmem>>, vector<1x32x8xbf16>
    %175 = vector.shape_cast %174 : vector<1x32x8xbf16> to vector<32x8xbf16>
    %cst_124 = arith.constant dense<0.000000e+00> : vector<8x8xf32>
    %176 = tpu.matmul %8, %175, %cst_124 {dimension_numbers = #tpu.dot_dimension_numbers<[1], [0], [0], [1], [0, 0, 1, 1], [], []>} : vector<8x32xbf16>, vector<32x8xbf16>, vector<8x8xf32> -> vector<8x8xf32>
    %c3_125 = arith.constant 3 : index
    %c0_126 = arith.constant 0 : index
    %c0_127 = arith.constant 0 : index
    %177 = vector.load %arg10[%c3_125, %c0_126, %c0_127] : memref<4x1x8xf32, #tpu.memory_space<vmem>>, vector<1x1x8xf32>
    %178 = vector.shape_cast %177 : vector<1x1x8xf32> to vector<1x8xf32>
    %179 = vector.broadcast %178 : vector<1x8xf32> to vector<8x8xf32>
    %180 = arith.addf %176, %179 : vector<8x8xf32>
    %181 = vector.shape_cast %166 : vector<8x8xf32> to vector<1x8x8xf32>
    %182 = arith.truncf %181 : vector<1x8x8xf32> to vector<1x8x8xbf16>
    %183 = vector.shape_cast %173 : vector<8x8xf32> to vector<1x8x8xf32>
    %184 = arith.truncf %183 : vector<1x8x8xf32> to vector<1x8x8xbf16>
    %185 = vector.shape_cast %180 : vector<8x8xf32> to vector<1x8x8xf32>
    %186 = arith.truncf %185 : vector<1x8x8xf32> to vector<1x8x8xbf16>
    "tpu.trace_start"() <{level = 10 : i32, message = "bqd,bkd->bqk"}> : () -> ()
    %cst_128 = arith.constant dense<0.000000e+00> : vector<1x8x8xf32>
    %187 = tpu.matmul %182, %184, %cst_128 {dimension_numbers = #tpu.dot_dimension_numbers<[2], [2], [1], [1], [0, 0, 0, 1, 1, 1], [0], [0]>} : vector<1x8x8xbf16>, vector<1x8x8xbf16>, vector<1x8x8xf32> -> vector<1x8x8xf32>
    "tpu.trace_stop"() : () -> ()
    %cst_129 = arith.constant dense<0xFF800000> : vector<1x8xf32>
    %188 = vector.multi_reduction <maximumf>, %187, %cst_129 [2] : vector<1x8x8xf32> to vector<1x8xf32>
    %189 = vector.shape_cast %188 : vector<1x8xf32> to vector<1x8x1xf32>
    %190 = vector.broadcast %189 : vector<1x8x1xf32> to vector<1x8x8xf32>
    %191 = arith.subf %187, %190 : vector<1x8x8xf32>
    %192 = math.exp %191 : vector<1x8x8xf32>
    %cst_130 = arith.constant dense<0.000000e+00> : vector<1x8xf32>
    %193 = vector.multi_reduction <add>, %192, %cst_130 [2] : vector<1x8x8xf32> to vector<1x8xf32>
    %194 = vector.shape_cast %193 : vector<1x8xf32> to vector<1x8x1xf32>
    %cst_131 = arith.constant 1.000000e+00 : f32
    %195 = vector.broadcast %cst_131 : f32 to vector<1x8x1xf32>
    %196 = arith.divf %195, %194 : vector<1x8x1xf32>
    %197 = vector.broadcast %196 : vector<1x8x1xf32> to vector<1x8x8xf32>
    %198 = arith.mulf %192, %197 : vector<1x8x8xf32>
    %c0_132 = arith.constant 0 : index
    %c3_133 = arith.constant 3 : index
    %c0_134 = arith.constant 0 : index
    %c0_135 = arith.constant 0 : index
    %199 = vector.load %arg14[%c0_132, %c3_133, %c0_134, %c0_135] : memref<1x4x8x8xf32, #tpu.memory_space<vmem>>, vector<1x1x8x8xf32>
    %200 = vector.shape_cast %199 : vector<1x1x8x8xf32> to vector<1x8x8xf32>
    %201 = vector.shape_cast %198 : vector<1x8x8xf32> to vector<1x1x8x8xf32>
    tpu.vector_store %arg14[%c0_132, %c3_133, %c0_134, %c0_135], %201 {strides = array<i32>} : memref<1x4x8x8xf32, #tpu.memory_space<vmem>>, vector<1x1x8x8xf32>,
    %202 = arith.truncf %198 : vector<1x8x8xf32> to vector<1x8x8xbf16>
    "tpu.trace_start"() <{level = 10 : i32, message = "bqk,bkd->bqd"}> : () -> ()
    %cst_136 = arith.constant dense<0.000000e+00> : vector<1x8x8xf32>
    %203 = tpu.matmul %202, %186, %cst_136 {dimension_numbers = #tpu.dot_dimension_numbers<[2], [1], [1], [2], [0, 0, 0, 1, 1, 2], [0], [0]>} : vector<1x8x8xbf16>, vector<1x8x8xbf16>, vector<1x8x8xf32> -> vector<1x8x8xf32>
    "tpu.trace_stop"() : () -> ()
    %204 = vector.shape_cast %203 : vector<1x8x8xf32> to vector<8x8xf32>
    %205 = arith.truncf %204 : vector<8x8xf32> to vector<8x8xbf16>
    %c3_137 = arith.constant 3 : index
    %c0_138 = arith.constant 0 : index
    %c0_139 = arith.constant 0 : index
    %206 = vector.load %arg11[%c3_137, %c0_138, %c0_139] : memref<4x8x32xbf16, #tpu.memory_space<vmem>>, vector<1x8x32xbf16>
    %207 = vector.shape_cast %206 : vector<1x8x32xbf16> to vector<8x32xbf16>
    %cst_140 = arith.constant dense<0.000000e+00> : vector<8x32xf32>
    %208 = tpu.matmul %205, %207, %cst_140 {dimension_numbers = #tpu.dot_dimension_numbers<[1], [0], [0], [1], [0, 0, 1, 1], [], []>} : vector<8x8xbf16>, vector<8x32xbf16>, vector<8x32xf32> -> vector<8x32xf32>
    %209 = arith.addf %159, %208 : vector<8x32xf32>
    %c0_141 = arith.constant 0 : index
    %c0_142 = arith.constant 0 : index
    %210 = vector.load %arg12[%c0_141, %c0_142] : memref<1x32xf32, #tpu.memory_space<vmem>>, vector<1x32xf32>
    %211 = vector.broadcast %210 : vector<1x32xf32> to vector<8x32xf32>
    %212 = arith.addf %209, %211 : vector<8x32xf32>
    %213 = vector.shape_cast %212 : vector<8x32xf32> to vector<1x8x32xf32>
    %c0_143 = arith.constant 0 : index
    %c0_144 = arith.constant 0 : index
    %c0_145 = arith.constant 0 : index
    %214 = vector.load %arg13[%c0_143, %c0_144, %c0_145] : memref<1x8x32xf32, #tpu.memory_space<vmem>>, vector<1x8x32xf32>
    tpu.vector_store %arg13[%c0_143, %c0_144, %c0_145], %213 {strides = array<i32>} : memref<1x8x32xf32, #tpu.memory_space<vmem>>, vector<1x8x32xf32>,
    return
  }
  func.func @transform_0(%arg0: i32, %arg1: i32) -> (i32, i32, i32) {
    %c0_i32 = arith.constant 0 : i32
    %c0_i32_0 = arith.constant 0 : i32
    return %arg0, %arg1, %c0_i32 : i32, i32, i32
  }
  func.func @transform_1(%arg0: i32, %arg1: i32) -> (i32, i32, i32) {
    %c0_i32 = arith.constant 0 : i32
    %c0_i32_0 = arith.constant 0 : i32
    %c0_i32_1 = arith.constant 0 : i32
    return %arg0, %c0_i32, %c0_i32_0 : i32, i32, i32
  }
  func.func @transform_2(%arg0: i32, %arg1: i32) -> (i32, i32, i32) {
    %c0_i32 = arith.constant 0 : i32
    %c0_i32_0 = arith.constant 0 : i32
    %c0_i32_1 = arith.constant 0 : i32
    return %arg0, %c0_i32, %c0_i32_0 : i32, i32, i32
  }
  func.func @transform_3(%arg0: i32, %arg1: i32) -> (i32, i32, i32) {
    %c0_i32 = arith.constant 0 : i32
    %c0_i32_0 = arith.constant 0 : i32
    %c0_i32_1 = arith.constant 0 : i32
    %c0_i32_2 = arith.constant 0 : i32
    return %c0_i32, %c0_i32_0, %c0_i32_1 : i32, i32, i32
  }
  func.func @transform_4(%arg0: i32, %arg1: i32) -> (i32, i32, i32) {
    %c0_i32 = arith.constant 0 : i32
    %c0_i32_0 = arith.constant 0 : i32
    %c0_i32_1 = arith.constant 0 : i32
    %c0_i32_2 = arith.constant 0 : i32
    return %c0_i32, %c0_i32_0, %c0_i32_1 : i32, i32, i32
  }
  func.func @transform_5(%arg0: i32, %arg1: i32) -> (i32, i32, i32) {
    %c0_i32 = arith.constant 0 : i32
    %c0_i32_0 = arith.constant 0 : i32
    %c0_i32_1 = arith.constant 0 : i32
    %c0_i32_2 = arith.constant 0 : i32
    return %c0_i32, %c0_i32_0, %c0_i32_1 : i32, i32, i32
  }
  func.func @transform_6(%arg0: i32, %arg1: i32) -> (i32, i32, i32) {
    %c0_i32 = arith.constant 0 : i32
    %c0_i32_0 = arith.constant 0 : i32
    %c0_i32_1 = arith.constant 0 : i32
    %c0_i32_2 = arith.constant 0 : i32
    return %c0_i32, %c0_i32_0, %c0_i32_1 : i32, i32, i32
  }
  func.func @transform_7(%arg0: i32, %arg1: i32) -> (i32, i32, i32) {
    %c0_i32 = arith.constant 0 : i32
    %c0_i32_0 = arith.constant 0 : i32
    %c0_i32_1 = arith.constant 0 : i32
    %c0_i32_2 = arith.constant 0 : i32
    return %c0_i32, %c0_i32_0, %c0_i32_1 : i32, i32, i32
  }
  func.func @transform_8(%arg0: i32, %arg1: i32) -> (i32, i32, i32) {
    %c0_i32 = arith.constant 0 : i32
    %c0_i32_0 = arith.constant 0 : i32
    %c0_i32_1 = arith.constant 0 : i32
    %c0_i32_2 = arith.constant 0 : i32
    return %c0_i32, %c0_i32_0, %c0_i32_1 : i32, i32, i32
  }
  func.func @transform_9(%arg0: i32, %arg1: i32) -> (i32, i32, i32) {
    %c0_i32 = arith.constant 0 : i32
    %c0_i32_0 = arith.constant 0 : i32
    %c0_i32_1 = arith.constant 0 : i32
    %c0_i32_2 = arith.constant 0 : i32
    return %c0_i32, %c0_i32_0, %c0_i32_1 : i32, i32, i32
  }
  func.func @transform_10(%arg0: i32, %arg1: i32) -> (i32, i32) {
    %c0_i32 = arith.constant 0 : i32
    %c0_i32_0 = arith.constant 0 : i32
    %c0_i32_1 = arith.constant 0 : i32
    return %c0_i32, %c0_i32_0 : i32, i32
  }
  func.func @transform_11(%arg0: i32, %arg1: i32) -> (i32, i32, i32) {
    %c0_i32 = arith.constant 0 : i32
    %c0_i32_0 = arith.constant 0 : i32
    return %arg0, %arg1, %c0_i32 : i32, i32, i32
  }
  func.func @transform_12(%arg0: i32, %arg1: i32) -> (i32, i32, i32, i32) {
    %c0_i32 = arith.constant 0 : i32
    %c0_i32_0 = arith.constant 0 : i32
    %c0_i32_1 = arith.constant 0 : i32
    return %arg0, %c0_i32, %arg1, %c0_i32_0 : i32, i32, i32, i32
  }
}

module attributes {stable_mosaic.version = 11 : i64} {
  func.func @mha_kernel(%arg0: i32, %arg1: i32, %arg2: memref<1x8x32xf32, #tpu.memory_space<vmem>>, %arg3: memref<1x8x32xf32, #tpu.memory_space<vmem>>, %arg4: memref<1x8x32xf32, #tpu.memory_space<vmem>>, %arg5: memref<4x32x8xbf16, #tpu.memory_space<vmem>>, %arg6: memref<4x1x8xf32, #tpu.memory_space<vmem>>, %arg7: memref<4x32x8xbf16, #tpu.memory_space<vmem>>, %arg8: memref<4x1x8xf32, #tpu.memory_space<vmem>>, %arg9: memref<4x32x8xbf16, #tpu.memory_space<vmem>>, %arg10: memref<4x1x8xf32, #tpu.memory_space<vmem>>, %arg11: memref<4x8x32xbf16, #tpu.memory_space<vmem>>, %arg12: memref<1x32xf32, #tpu.memory_space<vmem>>, %arg13: memref<1x8x32xf32, #tpu.memory_space<vmem>>, %arg14: memref<1x4x8x8xf32, #tpu.memory_space<vmem>>) attributes {dimension_semantics = [#tpu.dimension_semantics<parallel>, #tpu.dimension_semantics<parallel>], iteration_bounds = array<i64: 2, 1>, scalar_prefetch = 0 : i64, scratch_operands = 0 : i64, tpu.core_type = #tpu.core_type<tc>, window_params = [{transform_indices = @transform_0, window_bounds = array<i64: 1, 8, 32>}, {transform_indices = @transform_1, window_bounds = array<i64: 1, 8, 32>}, {transform_indices = @transform_2, window_bounds = array<i64: 1, 8, 32>}, {pipeline_mode = #tpu.pipeline_mode<synchronous>, transform_indices = @transform_3, window_bounds = array<i64: 4, 32, 8>}, {pipeline_mode = #tpu.pipeline_mode<synchronous>, transform_indices = @transform_4, window_bounds = array<i64: 4, 1, 8>}, {pipeline_mode = #tpu.pipeline_mode<synchronous>, transform_indices = @transform_5, window_bounds = array<i64: 4, 32, 8>}, {pipeline_mode = #tpu.pipeline_mode<synchronous>, transform_indices = @transform_6, window_bounds = array<i64: 4, 1, 8>}, {pipeline_mode = #tpu.pipeline_mode<synchronous>, transform_indices = @transform_7, window_bounds = array<i64: 4, 32, 8>}, {pipeline_mode = #tpu.pipeline_mode<synchronous>, transform_indices = @transform_8, window_bounds = array<i64: 4, 1, 8>}, {pipeline_mode = #tpu.pipeline_mode<synchronous>, transform_indices = @transform_9, window_bounds = array<i64: 4, 8, 32>}, {pipeline_mode = #tpu.pipeline_mode<synchronous>, transform_indices = @transform_10, window_bounds = array<i64: 1, 32>}, {transform_indices = @transform_11, window_bounds = array<i64: 1, 8, 32>}, {transform_indices = @transform_12, window_bounds = array<i64: 1, 4, 8, 8>}]} {
    %c0 = arith.constant 0 : index
    %c0_0 = arith.constant 0 : index
    %c0_1 = arith.constant 0 : index
    %0 = vector.load %arg2[%c0, %c0_0, %c0_1] : memref<1x8x32xf32, #tpu.memory_space<vmem>>, vector<1x8x32xf32>
    %1 = vector.shape_cast %0 : vector<1x8x32xf32> to vector<8x32xf32>
    %2 = arith.truncf %1 : vector<8x32xf32> to vector<8x32xbf16>
    %c0_2 = arith.constant 0 : index
    %c0_3 = arith.constant 0 : index
    %c0_4 = arith.constant 0 : index
    %3 = vector.load %arg3[%c0_2, %c0_3, %c0_4] : memref<1x8x32xf32, #tpu.memory_space<vmem>>, vector<1x8x32xf32>
    %4 = vector.shape_cast %3 : vector<1x8x32xf32> to vector<8x32xf32>
    %5 = arith.truncf %4 : vector<8x32xf32> to vector<8x32xbf16>
    %c0_5 = arith.constant 0 : index
    %c0_6 = arith.constant 0 : index
    %c0_7 = arith.constant 0 : index
    %6 = vector.load %arg4[%c0_5, %c0_6, %c0_7] : memref<1x8x32xf32, #tpu.memory_space<vmem>>, vector<1x8x32xf32>
    %7 = vector.shape_cast %6 : vector<1x8x32xf32> to vector<8x32xf32>
    %8 = arith.truncf %7 : vector<8x32xf32> to vector<8x32xbf16>
    %cst = arith.constant 0.000000e+00 : f32
    %9 = vector.broadcast %cst : f32 to vector<8x32xf32>
    %c0_8 = arith.constant 0 : index
    %c0_9 = arith.constant 0 : index
    %c0_10 = arith.constant 0 : index
    %10 = vector.load %arg5[%c0_8, %c0_9, %c0_10] : memref<4x32x8xbf16, #tpu.memory_space<vmem>>, vector<1x32x8xbf16>
    %11 = vector.shape_cast %10 : vector<1x32x8xbf16> to vector<32x8xbf16>
    %cst_11 = arith.constant dense<0.000000e+00> : vector<8x8xf32>
    %12 = tpu.matmul %2, %11, %cst_11 {dimension_numbers = #tpu.dot_dimension_numbers<[1], [0], [0], [1], [0, 0, 1, 1], [], []>} : vector<8x32xbf16>, vector<32x8xbf16>, vector<8x8xf32> -> vector<8x8xf32>
    %c0_12 = arith.constant 0 : index
    %c0_13 = arith.constant 0 : index
    %c0_14 = arith.constant 0 : index
    %13 = vector.load %arg6[%c0_12, %c0_13, %c0_14] : memref<4x1x8xf32, #tpu.memory_space<vmem>>, vector<1x1x8xf32>
    %14 = vector.shape_cast %13 : vector<1x1x8xf32> to vector<1x8xf32>
    %15 = vector.broadcast %14 : vector<1x8xf32> to vector<8x8xf32>
    %16 = arith.addf %12, %15 : vector<8x8xf32>
    %c0_15 = arith.constant 0 : index
    %c0_16 = arith.constant 0 : index
    %c0_17 = arith.constant 0 : index
    %17 = vector.load %arg7[%c0_15, %c0_16, %c0_17] : memref<4x32x8xbf16, #tpu.memory_space<vmem>>, vector<1x32x8xbf16>
    %18 = vector.shape_cast %17 : vector<1x32x8xbf16> to vector<32x8xbf16>
    %cst_18 = arith.constant dense<0.000000e+00> : vector<8x8xf32>
    %19 = tpu.matmul %5, %18, %cst_18 {dimension_numbers = #tpu.dot_dimension_numbers<[1], [0], [0], [1], [0, 0, 1, 1], [], []>} : vector<8x32xbf16>, vector<32x8xbf16>, vector<8x8xf32> -> vector<8x8xf32>
    %c0_19 = arith.constant 0 : index
    %c0_20 = arith.constant 0 : index
    %c0_21 = arith.constant 0 : index
    %20 = vector.load %arg8[%c0_19, %c0_20, %c0_21] : memref<4x1x8xf32, #tpu.memory_space<vmem>>, vector<1x1x8xf32>
    %21 = vector.shape_cast %20 : vector<1x1x8xf32> to vector<1x8xf32>
    %22 = vector.broadcast %21 : vector<1x8xf32> to vector<8x8xf32>
    %23 = arith.addf %19, %22 : vector<8x8xf32>
    %c0_22 = arith.constant 0 : index
    %c0_23 = arith.constant 0 : index
    %c0_24 = arith.constant 0 : index
    %24 = vector.load %arg9[%c0_22, %c0_23, %c0_24] : memref<4x32x8xbf16, #tpu.memory_space<vmem>>, vector<1x32x8xbf16>
    %25 = vector.shape_cast %24 : vector<1x32x8xbf16> to vector<32x8xbf16>
    %cst_25 = arith.constant dense<0.000000e+00> : vector<8x8xf32>
    %26 = tpu.matmul %8, %25, %cst_25 {dimension_numbers = #tpu.dot_dimension_numbers<[1], [0], [0], [1], [0, 0, 1, 1], [], []>} : vector<8x32xbf16>, vector<32x8xbf16>, vector<8x8xf32> -> vector<8x8xf32>
    %c0_26 = arith.constant 0 : index
    %c0_27 = arith.constant 0 : index
    %c0_28 = arith.constant 0 : index
    %27 = vector.load %arg10[%c0_26, %c0_27, %c0_28] : memref<4x1x8xf32, #tpu.memory_space<vmem>>, vector<1x1x8xf32>
    %28 = vector.shape_cast %27 : vector<1x1x8xf32> to vector<1x8xf32>
    %29 = vector.broadcast %28 : vector<1x8xf32> to vector<8x8xf32>
    %30 = arith.addf %26, %29 : vector<8x8xf32>
    %31 = vector.shape_cast %16 : vector<8x8xf32> to vector<1x8x8xf32>
    %32 = arith.truncf %31 : vector<1x8x8xf32> to vector<1x8x8xbf16>
    %33 = vector.shape_cast %23 : vector<8x8xf32> to vector<1x8x8xf32>
    %34 = arith.truncf %33 : vector<1x8x8xf32> to vector<1x8x8xbf16>
    %35 = vector.shape_cast %30 : vector<8x8xf32> to vector<1x8x8xf32>
    %36 = arith.truncf %35 : vector<1x8x8xf32> to vector<1x8x8xbf16>
    "tpu.trace_start"() <{level = 10 : i32, message = "bqd,bkd->bqk"}> : () -> ()
    %cst_29 = arith.constant dense<0.000000e+00> : vector<1x8x8xf32>
    %37 = tpu.matmul %32, %34, %cst_29 {dimension_numbers = #tpu.dot_dimension_numbers<[2], [2], [1], [1], [0, 0, 0, 1, 1, 1], [0], [0]>} : vector<1x8x8xbf16>, vector<1x8x8xbf16>, vector<1x8x8xf32> -> vector<1x8x8xf32>
    "tpu.trace_stop"() : () -> ()
    %cst_30 = arith.constant dense<0xFF800000> : vector<1x8xf32>
    %38 = vector.multi_reduction <maximumf>, %37, %cst_30 [2] : vector<1x8x8xf32> to vector<1x8xf32>
    %39 = vector.shape_cast %38 : vector<1x8xf32> to vector<1x8x1xf32>
    %40 = vector.broadcast %39 : vector<1x8x1xf32> to vector<1x8x8xf32>
    %41 = arith.subf %37, %40 : vector<1x8x8xf32>
    %42 = math.exp %41 : vector<1x8x8xf32>
    %cst_31 = arith.constant dense<0.000000e+00> : vector<1x8xf32>
    %43 = vector.multi_reduction <add>, %42, %cst_31 [2] : vector<1x8x8xf32> to vector<1x8xf32>
    %44 = vector.shape_cast %43 : vector<1x8xf32> to vector<1x8x1xf32>
    %cst_32 = arith.constant 1.000000e+00 : f32
    %45 = vector.broadcast %cst_32 : f32 to vector<1x8x1xf32>
    %46 = arith.divf %45, %44 : vector<1x8x1xf32>
    %47 = vector.broadcast %46 : vector<1x8x1xf32> to vector<1x8x8xf32>
    %48 = arith.mulf %42, %47 : vector<1x8x8xf32>
    %c0_33 = arith.constant 0 : index
    %c0_34 = arith.constant 0 : index
    %c0_35 = arith.constant 0 : index
    %c0_36 = arith.constant 0 : index
    %49 = vector.load %arg14[%c0_33, %c0_34, %c0_35, %c0_36] : memref<1x4x8x8xf32, #tpu.memory_space<vmem>>, vector<1x1x8x8xf32>
    %50 = vector.shape_cast %49 : vector<1x1x8x8xf32> to vector<1x8x8xf32>
    %51 = vector.shape_cast %48 : vector<1x8x8xf32> to vector<1x1x8x8xf32>
    tpu.vector_store %arg14[%c0_33, %c0_34, %c0_35, %c0_36], %51 {strides = array<i32>} : memref<1x4x8x8xf32, #tpu.memory_space<vmem>>, vector<1x1x8x8xf32>,
    %52 = arith.truncf %48 : vector<1x8x8xf32> to vector<1x8x8xbf16>
    "tpu.trace_start"() <{level = 10 : i32, message = "bqk,bkd->bqd"}> : () -> ()
    %cst_37 = arith.constant dense<0.000000e+00> : vector<1x8x8xf32>
    %53 = tpu.matmul %52, %36, %cst_37 {dimension_numbers = #tpu.dot_dimension_numbers<[2], [1], [1], [2], [0, 0, 0, 1, 1, 2], [0], [0]>} : vector<1x8x8xbf16>, vector<1x8x8xbf16>, vector<1x8x8xf32> -> vector<1x8x8xf32>
    "tpu.trace_stop"() : () -> ()
    %54 = vector.shape_cast %53 : vector<1x8x8xf32> to vector<8x8xf32>
    %55 = arith.truncf %54 : vector<8x8xf32> to vector<8x8xbf16>
    %c0_38 = arith.constant 0 : index
    %c0_39 = arith.constant 0 : index
    %c0_40 = arith.constant 0 : index
    %56 = vector.load %arg11[%c0_38, %c0_39, %c0_40] : memref<4x8x32xbf16, #tpu.memory_space<vmem>>, vector<1x8x32xbf16>
    %57 = vector.shape_cast %56 : vector<1x8x32xbf16> to vector<8x32xbf16>
    %cst_41 = arith.constant dense<0.000000e+00> : vector<8x32xf32>
    %58 = tpu.matmul %55, %57, %cst_41 {dimension_numbers = #tpu.dot_dimension_numbers<[1], [0], [0], [1], [0, 0, 1, 1], [], []>} : vector<8x8xbf16>, vector<8x32xbf16>, vector<8x32xf32> -> vector<8x32xf32>
    %59 = arith.addf %9, %58 : vector<8x32xf32>
    %c1 = arith.constant 1 : index
    %c0_42 = arith.constant 0 : index
    %c0_43 = arith.constant 0 : index
    %60 = vector.load %arg5[%c1, %c0_42, %c0_43] : memref<4x32x8xbf16, #tpu.memory_space<vmem>>, vector<1x32x8xbf16>
    %61 = vector.shape_cast %60 : vector<1x32x8xbf16> to vector<32x8xbf16>
    %cst_44 = arith.constant dense<0.000000e+00> : vector<8x8xf32>
    %62 = tpu.matmul %2, %61, %cst_44 {dimension_numbers = #tpu.dot_dimension_numbers<[1], [0], [0], [1], [0, 0, 1, 1], [], []>} : vector<8x32xbf16>, vector<32x8xbf16>, vector<8x8xf32> -> vector<8x8xf32>
    %c1_45 = arith.constant 1 : index
    %c0_46 = arith.constant 0 : index
    %c0_47 = arith.constant 0 : index
    %63 = vector.load %arg6[%c1_45, %c0_46, %c0_47] : memref<4x1x8xf32, #tpu.memory_space<vmem>>, vector<1x1x8xf32>
    %64 = vector.shape_cast %63 : vector<1x1x8xf32> to vector<1x8xf32>
    %65 = vector.broadcast %64 : vector<1x8xf32> to vector<8x8xf32>
    %66 = arith.addf %62, %65 : vector<8x8xf32>
    %c1_48 = arith.constant 1 : index
    %c0_49 = arith.constant 0 : index
    %c0_50 = arith.constant 0 : index
    %67 = vector.load %arg7[%c1_48, %c0_49, %c0_50] : memref<4x32x8xbf16, #tpu.memory_space<vmem>>, vector<1x32x8xbf16>
    %68 = vector.shape_cast %67 : vector<1x32x8xbf16> to vector<32x8xbf16>
    %cst_51 = arith.constant dense<0.000000e+00> : vector<8x8xf32>
    %69 = tpu.matmul %5, %68, %cst_51 {dimension_numbers = #tpu.dot_dimension_numbers<[1], [0], [0], [1], [0, 0, 1, 1], [], []>} : vector<8x32xbf16>, vector<32x8xbf16>, vector<8x8xf32> -> vector<8x8xf32>
    %c1_52 = arith.constant 1 : index
    %c0_53 = arith.constant 0 : index
    %c0_54 = arith.constant 0 : index
    %70 = vector.load %arg8[%c1_52, %c0_53, %c0_54] : memref<4x1x8xf32, #tpu.memory_space<vmem>>, vector<1x1x8xf32>
    %71 = vector.shape_cast %70 : vector<1x1x8xf32> to vector<1x8xf32>
    %72 = vector.broadcast %71 : vector<1x8xf32> to vector<8x8xf32>
    %73 = arith.addf %69, %72 : vector<8x8xf32>
    %c1_55 = arith.constant 1 : index
    %c0_56 = arith.constant 0 : index
    %c0_57 = arith.constant 0 : index
    %74 = vector.load %arg9[%c1_55, %c0_56, %c0_57] : memref<4x32x8xbf16, #tpu.memory_space<vmem>>, vector<1x32x8xbf16>
    %75 = vector.shape_cast %74 : vector<1x32x8xbf16> to vector<32x8xbf16>
    %cst_58 = arith.constant dense<0.000000e+00> : vector<8x8xf32>
    %76 = tpu.matmul %8, %75, %cst_58 {dimension_numbers = #tpu.dot_dimension_numbers<[1], [0], [0], [1], [0, 0, 1, 1], [], []>} : vector<8x32xbf16>, vector<32x8xbf16>, vector<8x8xf32> -> vector<8x8xf32>
    %c1_59 = arith.constant 1 : index
    %c0_60 = arith.constant 0 : index
    %c0_61 = arith.constant 0 : index
    %77 = vector.load %arg10[%c1_59, %c0_60, %c0_61] : memref<4x1x8xf32, #tpu.memory_space<vmem>>, vector<1x1x8xf32>
    %78 = vector.shape_cast %77 : vector<1x1x8xf32> to vector<1x8xf32>
    %79 = vector.broadcast %78 : vector<1x8xf32> to vector<8x8xf32>
    %80 = arith.addf %76, %79 : vector<8x8xf32>
    %81 = vector.shape_cast %66 : vector<8x8xf32> to vector<1x8x8xf32>
    %82 = arith.truncf %81 : vector<1x8x8xf32> to vector<1x8x8xbf16>
    %83 = vector.shape_cast %73 : vector<8x8xf32> to vector<1x8x8xf32>
    %84 = arith.truncf %83 : vector<1x8x8xf32> to vector<1x8x8xbf16>
    %85 = vector.shape_cast %80 : vector<8x8xf32> to vector<1x8x8xf32>
    %86 = arith.truncf %85 : vector<1x8x8xf32> to vector<1x8x8xbf16>
    "tpu.trace_start"() <{level = 10 : i32, message = "bqd,bkd->bqk"}> : () -> ()
    %cst_62 = arith.constant dense<0.000000e+00> : vector<1x8x8xf32>
    %87 = tpu.matmul %82, %84, %cst_62 {dimension_numbers = #tpu.dot_dimension_numbers<[2], [2], [1], [1], [0, 0, 0, 1, 1, 1], [0], [0]>} : vector<1x8x8xbf16>, vector<1x8x8xbf16>, vector<1x8x8xf32> -> vector<1x8x8xf32>
    "tpu.trace_stop"() : () -> ()
    %cst_63 = arith.constant dense<0xFF800000> : vector<1x8xf32>
    %88 = vector.multi_reduction <maximumf>, %87, %cst_63 [2] : vector<1x8x8xf32> to vector<1x8xf32>
    %89 = vector.shape_cast %88 : vector<1x8xf32> to vector<1x8x1xf32>
    %90 = vector.broadcast %89 : vector<1x8x1xf32> to vector<1x8x8xf32>
    %91 = arith.subf %87, %90 : vector<1x8x8xf32>
    %92 = math.exp %91 : vector<1x8x8xf32>
    %cst_64 = arith.constant dense<0.000000e+00> : vector<1x8xf32>
    %93 = vector.multi_reduction <add>, %92, %cst_64 [2] : vector<1x8x8xf32> to vector<1x8xf32>
    %94 = vector.shape_cast %93 : vector<1x8xf32> to vector<1x8x1xf32>
    %cst_65 = arith.constant 1.000000e+00 : f32
    %95 = vector.broadcast %cst_65 : f32 to vector<1x8x1xf32>
    %96 = arith.divf %95, %94 : vector<1x8x1xf32>
    %97 = vector.broadcast %96 : vector<1x8x1xf32> to vector<1x8x8xf32>
    %98 = arith.mulf %92, %97 : vector<1x8x8xf32>
    %c0_66 = arith.constant 0 : index
    %c1_67 = arith.constant 1 : index
    %c0_68 = arith.constant 0 : index
    %c0_69 = arith.constant 0 : index
    %99 = vector.load %arg14[%c0_66, %c1_67, %c0_68, %c0_69] : memref<1x4x8x8xf32, #tpu.memory_space<vmem>>, vector<1x1x8x8xf32>
    %100 = vector.shape_cast %99 : vector<1x1x8x8xf32> to vector<1x8x8xf32>
    %101 = vector.shape_cast %98 : vector<1x8x8xf32> to vector<1x1x8x8xf32>
    tpu.vector_store %arg14[%c0_66, %c1_67, %c0_68, %c0_69], %101 {strides = array<i32>} : memref<1x4x8x8xf32, #tpu.memory_space<vmem>>, vector<1x1x8x8xf32>,
    %102 = arith.truncf %98 : vector<1x8x8xf32> to vector<1x8x8xbf16>
    "tpu.trace_start"() <{level = 10 : i32, message = "bqk,bkd->bqd"}> : () -> ()
    %cst_70 = arith.constant dense<0.000000e+00> : vector<1x8x8xf32>
    %103 = tpu.matmul %102, %86, %cst_70 {dimension_numbers = #tpu.dot_dimension_numbers<[2], [1], [1], [2], [0, 0, 0, 1, 1, 2], [0], [0]>} : vector<1x8x8xbf16>, vector<1x8x8xbf16>, vector<1x8x8xf32> -> vector<1x8x8xf32>
    "tpu.trace_stop"() : () -> ()
    %104 = vector.shape_cast %103 : vector<1x8x8xf32> to vector<8x8xf32>
    %105 = arith.truncf %104 : vector<8x8xf32> to vector<8x8xbf16>
    %c1_71 = arith.constant 1 : index
    %c0_72 = arith.constant 0 : index
    %c0_73 = arith.constant 0 : index
    %106 = vector.load %arg11[%c1_71, %c0_72, %c0_73] : memref<4x8x32xbf16, #tpu.memory_space<vmem>>, vector<1x8x32xbf16>
    %107 = vector.shape_cast %106 : vector<1x8x32xbf16> to vector<8x32xbf16>
    %cst_74 = arith.constant dense<0.000000e+00> : vector<8x32xf32>
    %108 = tpu.matmul %105, %107, %cst_74 {dimension_numbers = #tpu.dot_dimension_numbers<[1], [0], [0], [1], [0, 0, 1, 1], [], []>} : vector<8x8xbf16>, vector<8x32xbf16>, vector<8x32xf32> -> vector<8x32xf32>
    %109 = arith.addf %59, %108 : vector<8x32xf32>
    %c2 = arith.constant 2 : index
    %c0_75 = arith.constant 0 : index
    %c0_76 = arith.constant 0 : index
    %110 = vector.load %arg5[%c2, %c0_75, %c0_76] : memref<4x32x8xbf16, #tpu.memory_space<vmem>>, vector<1x32x8xbf16>
    %111 = vector.shape_cast %110 : vector<1x32x8xbf16> to vector<32x8xbf16>
    %cst_77 = arith.constant dense<0.000000e+00> : vector<8x8xf32>
    %112 = tpu.matmul %2, %111, %cst_77 {dimension_numbers = #tpu.dot_dimension_numbers<[1], [0], [0], [1], [0, 0, 1, 1], [], []>} : vector<8x32xbf16>, vector<32x8xbf16>, vector<8x8xf32> -> vector<8x8xf32>
    %c2_78 = arith.constant 2 : index
    %c0_79 = arith.constant 0 : index
    %c0_80 = arith.constant 0 : index
    %113 = vector.load %arg6[%c2_78, %c0_79, %c0_80] : memref<4x1x8xf32, #tpu.memory_space<vmem>>, vector<1x1x8xf32>
    %114 = vector.shape_cast %113 : vector<1x1x8xf32> to vector<1x8xf32>
    %115 = vector.broadcast %114 : vector<1x8xf32> to vector<8x8xf32>
    %116 = arith.addf %112, %115 : vector<8x8xf32>
    %c2_81 = arith.constant 2 : index
    %c0_82 = arith.constant 0 : index
    %c0_83 = arith.constant 0 : index
    %117 = vector.load %arg7[%c2_81, %c0_82, %c0_83] : memref<4x32x8xbf16, #tpu.memory_space<vmem>>, vector<1x32x8xbf16>
    %118 = vector.shape_cast %117 : vector<1x32x8xbf16> to vector<32x8xbf16>
    %cst_84 = arith.constant dense<0.000000e+00> : vector<8x8xf32>
    %119 = tpu.matmul %5, %118, %cst_84 {dimension_numbers = #tpu.dot_dimension_numbers<[1], [0], [0], [1], [0, 0, 1, 1], [], []>} : vector<8x32xbf16>, vector<32x8xbf16>, vector<8x8xf32> -> vector<8x8xf32>
    %c2_85 = arith.constant 2 : index
    %c0_86 = arith.constant 0 : index
    %c0_87 = arith.constant 0 : index
    %120 = vector.load %arg8[%c2_85, %c0_86, %c0_87] : memref<4x1x8xf32, #tpu.memory_space<vmem>>, vector<1x1x8xf32>
    %121 = vector.shape_cast %120 : vector<1x1x8xf32> to vector<1x8xf32>
    %122 = vector.broadcast %121 : vector<1x8xf32> to vector<8x8xf32>
    %123 = arith.addf %119, %122 : vector<8x8xf32>
    %c2_88 = arith.constant 2 : index
    %c0_89 = arith.constant 0 : index
    %c0_90 = arith.constant 0 : index
    %124 = vector.load %arg9[%c2_88, %c0_89, %c0_90] : memref<4x32x8xbf16, #tpu.memory_space<vmem>>, vector<1x32x8xbf16>
    %125 = vector.shape_cast %124 : vector<1x32x8xbf16> to vector<32x8xbf16>
    %cst_91 = arith.constant dense<0.000000e+00> : vector<8x8xf32>
    %126 = tpu.matmul %8, %125, %cst_91 {dimension_numbers = #tpu.dot_dimension_numbers<[1], [0], [0], [1], [0, 0, 1, 1], [], []>} : vector<8x32xbf16>, vector<32x8xbf16>, vector<8x8xf32> -> vector<8x8xf32>
    %c2_92 = arith.constant 2 : index
    %c0_93 = arith.constant 0 : index
    %c0_94 = arith.constant 0 : index
    %127 = vector.load %arg10[%c2_92, %c0_93, %c0_94] : memref<4x1x8xf32, #tpu.memory_space<vmem>>, vector<1x1x8xf32>
    %128 = vector.shape_cast %127 : vector<1x1x8xf32> to vector<1x8xf32>
    %129 = vector.broadcast %128 : vector<1x8xf32> to vector<8x8xf32>
    %130 = arith.addf %126, %129 : vector<8x8xf32>
    %131 = vector.shape_cast %116 : vector<8x8xf32> to vector<1x8x8xf32>
    %132 = arith.truncf %131 : vector<1x8x8xf32> to vector<1x8x8xbf16>
    %133 = vector.shape_cast %123 : vector<8x8xf32> to vector<1x8x8xf32>
    %134 = arith.truncf %133 : vector<1x8x8xf32> to vector<1x8x8xbf16>
    %135 = vector.shape_cast %130 : vector<8x8xf32> to vector<1x8x8xf32>
    %136 = arith.truncf %135 : vector<1x8x8xf32> to vector<1x8x8xbf16>
    "tpu.trace_start"() <{level = 10 : i32, message = "bqd,bkd->bqk"}> : () -> ()
    %cst_95 = arith.constant dense<0.000000e+00> : vector<1x8x8xf32>
    %137 = tpu.matmul %132, %134, %cst_95 {dimension_numbers = #tpu.dot_dimension_numbers<[2], [2], [1], [1], [0, 0, 0, 1, 1, 1], [0], [0]>} : vector<1x8x8xbf16>, vector<1x8x8xbf16>, vector<1x8x8xf32> -> vector<1x8x8xf32>
    "tpu.trace_stop"() : () -> ()
    %cst_96 = arith.constant dense<0xFF800000> : vector<1x8xf32>
    %138 = vector.multi_reduction <maximumf>, %137, %cst_96 [2] : vector<1x8x8xf32> to vector<1x8xf32>
    %139 = vector.shape_cast %138 : vector<1x8xf32> to vector<1x8x1xf32>
    %140 = vector.broadcast %139 : vector<1x8x1xf32> to vector<1x8x8xf32>
    %141 = arith.subf %137, %140 : vector<1x8x8xf32>
    %142 = math.exp %141 : vector<1x8x8xf32>
    %cst_97 = arith.constant dense<0.000000e+00> : vector<1x8xf32>
    %143 = vector.multi_reduction <add>, %142, %cst_97 [2] : vector<1x8x8xf32> to vector<1x8xf32>
    %144 = vector.shape_cast %143 : vector<1x8xf32> to vector<1x8x1xf32>
    %cst_98 = arith.constant 1.000000e+00 : f32
    %145 = vector.broadcast %cst_98 : f32 to vector<1x8x1xf32>
    %146 = arith.divf %145, %144 : vector<1x8x1xf32>
    %147 = vector.broadcast %146 : vector<1x8x1xf32> to vector<1x8x8xf32>
    %148 = arith.mulf %142, %147 : vector<1x8x8xf32>
    %c0_99 = arith.constant 0 : index
    %c2_100 = arith.constant 2 : index
    %c0_101 = arith.constant 0 : index
    %c0_102 = arith.constant 0 : index
    %149 = vector.load %arg14[%c0_99, %c2_100, %c0_101, %c0_102] : memref<1x4x8x8xf32, #tpu.memory_space<vmem>>, vector<1x1x8x8xf32>
    %150 = vector.shape_cast %149 : vector<1x1x8x8xf32> to vector<1x8x8xf32>
    %151 = vector.shape_cast %148 : vector<1x8x8xf32> to vector<1x1x8x8xf32>
    tpu.vector_store %arg14[%c0_99, %c2_100, %c0_101, %c0_102], %151 {strides = array<i32>} : memref<1x4x8x8xf32, #tpu.memory_space<vmem>>, vector<1x1x8x8xf32>,
    %152 = arith.truncf %148 : vector<1x8x8xf32> to vector<1x8x8xbf16>
    "tpu.trace_start"() <{level = 10 : i32, message = "bqk,bkd->bqd"}> : () -> ()
    %cst_103 = arith.constant dense<0.000000e+00> : vector<1x8x8xf32>
    %153 = tpu.matmul %152, %136, %cst_103 {dimension_numbers = #tpu.dot_dimension_numbers<[2], [1], [1], [2], [0, 0, 0, 1, 1, 2], [0], [0]>} : vector<1x8x8xbf16>, vector<1x8x8xbf16>, vector<1x8x8xf32> -> vector<1x8x8xf32>
    "tpu.trace_stop"() : () -> ()
    %154 = vector.shape_cast %153 : vector<1x8x8xf32> to vector<8x8xf32>
    %155 = arith.truncf %154 : vector<8x8xf32> to vector<8x8xbf16>
    %c2_104 = arith.constant 2 : index
    %c0_105 = arith.constant 0 : index
    %c0_106 = arith.constant 0 : index
    %156 = vector.load %arg11[%c2_104, %c0_105, %c0_106] : memref<4x8x32xbf16, #tpu.memory_space<vmem>>, vector<1x8x32xbf16>
    %157 = vector.shape_cast %156 : vector<1x8x32xbf16> to vector<8x32xbf16>
    %cst_107 = arith.constant dense<0.000000e+00> : vector<8x32xf32>
    %158 = tpu.matmul %155, %157, %cst_107 {dimension_numbers = #tpu.dot_dimension_numbers<[1], [0], [0], [1], [0, 0, 1, 1], [], []>} : vector<8x8xbf16>, vector<8x32xbf16>, vector<8x32xf32> -> vector<8x32xf32>
    %159 = arith.addf %109, %158 : vector<8x32xf32>
    %c3 = arith.constant 3 : index
    %c0_108 = arith.constant 0 : index
    %c0_109 = arith.constant 0 : index
    %160 = vector.load %arg5[%c3, %c0_108, %c0_109] : memref<4x32x8xbf16, #tpu.memory_space<vmem>>, vector<1x32x8xbf16>
    %161 = vector.shape_cast %160 : vector<1x32x8xbf16> to vector<32x8xbf16>
    %cst_110 = arith.constant dense<0.000000e+00> : vector<8x8xf32>
    %162 = tpu.matmul %2, %161, %cst_110 {dimension_numbers = #tpu.dot_dimension_numbers<[1], [0], [0], [1], [0, 0, 1, 1], [], []>} : vector<8x32xbf16>, vector<32x8xbf16>, vector<8x8xf32> -> vector<8x8xf32>
    %c3_111 = arith.constant 3 : index
    %c0_112 = arith.constant 0 : index
    %c0_113 = arith.constant 0 : index
    %163 = vector.load %arg6[%c3_111, %c0_112, %c0_113] : memref<4x1x8xf32, #tpu.memory_space<vmem>>, vector<1x1x8xf32>
    %164 = vector.shape_cast %163 : vector<1x1x8xf32> to vector<1x8xf32>
    %165 = vector.broadcast %164 : vector<1x8xf32> to vector<8x8xf32>
    %166 = arith.addf %162, %165 : vector<8x8xf32>
    %c3_114 = arith.constant 3 : index
    %c0_115 = arith.constant 0 : index
    %c0_116 = arith.constant 0 : index
    %167 = vector.load %arg7[%c3_114, %c0_115, %c0_116] : memref<4x32x8xbf16, #tpu.memory_space<vmem>>, vector<1x32x8xbf16>
    %168 = vector.shape_cast %167 : vector<1x32x8xbf16> to vector<32x8xbf16>
    %cst_117 = arith.constant dense<0.000000e+00> : vector<8x8xf32>
    %169 = tpu.matmul %5, %168, %cst_117 {dimension_numbers = #tpu.dot_dimension_numbers<[1], [0], [0], [1], [0, 0, 1, 1], [], []>} : vector<8x32xbf16>, vector<32x8xbf16>, vector<8x8xf32> -> vector<8x8xf32>
    %c3_118 = arith.constant 3 : index
    %c0_119 = arith.constant 0 : index
    %c0_120 = arith.constant 0 : index
    %170 = vector.load %arg8[%c3_118, %c0_119, %c0_120] : memref<4x1x8xf32, #tpu.memory_space<vmem>>, vector<1x1x8xf32>
    %171 = vector.shape_cast %170 : vector<1x1x8xf32> to vector<1x8xf32>
    %172 = vector.broadcast %171 : vector<1x8xf32> to vector<8x8xf32>
    %173 = arith.addf %169, %172 : vector<8x8xf32>
    %c3_121 = arith.constant 3 : index
    %c0_122 = arith.constant 0 : index
    %c0_123 = arith.constant 0 : index
    %174 = vector.load %arg9[%c3_121, %c0_122, %c0_123] : memref<4x32x8xbf16, #tpu.memory_space<vmem>>, vector<1x32x8xbf16>
    %175 = vector.shape_cast %174 : vector<1x32x8xbf16> to vector<32x8xbf16>
    %cst_124 = arith.constant dense<0.000000e+00> : vector<8x8xf32>
    %176 = tpu.matmul %8, %175, %cst_124 {dimension_numbers = #tpu.dot_dimension_numbers<[1], [0], [0], [1], [0, 0, 1, 1], [], []>} : vector<8x32xbf16>, vector<32x8xbf16>, vector<8x8xf32> -> vector<8x8xf32>
    %c3_125 = arith.constant 3 : index
    %c0_126 = arith.constant 0 : index
    %c0_127 = arith.constant 0 : index
    %177 = vector.load %arg10[%c3_125, %c0_126, %c0_127] : memref<4x1x8xf32, #tpu.memory_space<vmem>>, vector<1x1x8xf32>
    %178 = vector.shape_cast %177 : vector<1x1x8xf32> to vector<1x8xf32>
    %179 = vector.broadcast %178 : vector<1x8xf32> to vector<8x8xf32>
    %180 = arith.addf %176, %179 : vector<8x8xf32>
    %181 = vector.shape_cast %166 : vector<8x8xf32> to vector<1x8x8xf32>
    %182 = arith.truncf %181 : vector<1x8x8xf32> to vector<1x8x8xbf16>
    %183 = vector.shape_cast %173 : vector<8x8xf32> to vector<1x8x8xf32>
    %184 = arith.truncf %183 : vector<1x8x8xf32> to vector<1x8x8xbf16>
    %185 = vector.shape_cast %180 : vector<8x8xf32> to vector<1x8x8xf32>
    %186 = arith.truncf %185 : vector<1x8x8xf32> to vector<1x8x8xbf16>
    "tpu.trace_start"() <{level = 10 : i32, message = "bqd,bkd->bqk"}> : () -> ()
    %cst_128 = arith.constant dense<0.000000e+00> : vector<1x8x8xf32>
    %187 = tpu.matmul %182, %184, %cst_128 {dimension_numbers = #tpu.dot_dimension_numbers<[2], [2], [1], [1], [0, 0, 0, 1, 1, 1], [0], [0]>} : vector<1x8x8xbf16>, vector<1x8x8xbf16>, vector<1x8x8xf32> -> vector<1x8x8xf32>
    "tpu.trace_stop"() : () -> ()
    %cst_129 = arith.constant dense<0xFF800000> : vector<1x8xf32>
    %188 = vector.multi_reduction <maximumf>, %187, %cst_129 [2] : vector<1x8x8xf32> to vector<1x8xf32>
    %189 = vector.shape_cast %188 : vector<1x8xf32> to vector<1x8x1xf32>
    %190 = vector.broadcast %189 : vector<1x8x1xf32> to vector<1x8x8xf32>
    %191 = arith.subf %187, %190 : vector<1x8x8xf32>
    %192 = math.exp %191 : vector<1x8x8xf32>
    %cst_130 = arith.constant dense<0.000000e+00> : vector<1x8xf32>
    %193 = vector.multi_reduction <add>, %192, %cst_130 [2] : vector<1x8x8xf32> to vector<1x8xf32>
    %194 = vector.shape_cast %193 : vector<1x8xf32> to vector<1x8x1xf32>
    %cst_131 = arith.constant 1.000000e+00 : f32
    %195 = vector.broadcast %cst_131 : f32 to vector<1x8x1xf32>
    %196 = arith.divf %195, %194 : vector<1x8x1xf32>
    %197 = vector.broadcast %196 : vector<1x8x1xf32> to vector<1x8x8xf32>
    %198 = arith.mulf %192, %197 : vector<1x8x8xf32>
    %c0_132 = arith.constant 0 : index
    %c3_133 = arith.constant 3 : index
    %c0_134 = arith.constant 0 : index
    %c0_135 = arith.constant 0 : index
    %199 = vector.load %arg14[%c0_132, %c3_133, %c0_134, %c0_135] : memref<1x4x8x8xf32, #tpu.memory_space<vmem>>, vector<1x1x8x8xf32>
    %200 = vector.shape_cast %199 : vector<1x1x8x8xf32> to vector<1x8x8xf32>
    %201 = vector.shape_cast %198 : vector<1x8x8xf32> to vector<1x1x8x8xf32>
    tpu.vector_store %arg14[%c0_132, %c3_133, %c0_134, %c0_135], %201 {strides = array<i32>} : memref<1x4x8x8xf32, #tpu.memory_space<vmem>>, vector<1x1x8x8xf32>,
    %202 = arith.truncf %198 : vector<1x8x8xf32> to vector<1x8x8xbf16>
    "tpu.trace_start"() <{level = 10 : i32, message = "bqk,bkd->bqd"}> : () -> ()
    %cst_136 = arith.constant dense<0.000000e+00> : vector<1x8x8xf32>
    %203 = tpu.matmul %202, %186, %cst_136 {dimension_numbers = #tpu.dot_dimension_numbers<[2], [1], [1], [2], [0, 0, 0, 1, 1, 2], [0], [0]>} : vector<1x8x8xbf16>, vector<1x8x8xbf16>, vector<1x8x8xf32> -> vector<1x8x8xf32>
    "tpu.trace_stop"() : () -> ()
    %204 = vector.shape_cast %203 : vector<1x8x8xf32> to vector<8x8xf32>
    %205 = arith.truncf %204 : vector<8x8xf32> to vector<8x8xbf16>
    %c3_137 = arith.constant 3 : index
    %c0_138 = arith.constant 0 : index
    %c0_139 = arith.constant 0 : index
    %206 = vector.load %arg11[%c3_137, %c0_138, %c0_139] : memref<4x8x32xbf16, #tpu.memory_space<vmem>>, vector<1x8x32xbf16>
    %207 = vector.shape_cast %206 : vector<1x8x32xbf16> to vector<8x32xbf16>
    %cst_140 = arith.constant dense<0.000000e+00> : vector<8x32xf32>
    %208 = tpu.matmul %205, %207, %cst_140 {dimension_numbers = #tpu.dot_dimension_numbers<[1], [0], [0], [1], [0, 0, 1, 1], [], []>} : vector<8x8xbf16>, vector<8x32xbf16>, vector<8x32xf32> -> vector<8x32xf32>
    %209 = arith.addf %159, %208 : vector<8x32xf32>
    %c0_141 = arith.constant 0 : index
    %c0_142 = arith.constant 0 : index
    %210 = vector.load %arg12[%c0_141, %c0_142] : memref<1x32xf32, #tpu.memory_space<vmem>>, vector<1x32xf32>
    %211 = vector.broadcast %210 : vector<1x32xf32> to vector<8x32xf32>
    %212 = arith.addf %209, %211 : vector<8x32xf32>
    %213 = vector.shape_cast %212 : vector<8x32xf32> to vector<1x8x32xf32>
    %c0_143 = arith.constant 0 : index
    %c0_144 = arith.constant 0 : index
    %c0_145 = arith.constant 0 : index
    %214 = vector.load %arg13[%c0_143, %c0_144, %c0_145] : memref<1x8x32xf32, #tpu.memory_space<vmem>>, vector<1x8x32xf32>
    tpu.vector_store %arg13[%c0_143, %c0_144, %c0_145], %213 {strides = array<i32>} : memref<1x8x32xf32, #tpu.memory_space<vmem>>, vector<1x8x32xf32>,
    return
  }
  func.func @transform_0(%arg0: i32, %arg1: i32) -> (i32, i32, i32) {
    %c0_i32 = arith.constant 0 : i32
    %c0_i32_0 = arith.constant 0 : i32
    return %arg0, %arg1, %c0_i32 : i32, i32, i32
  }
  func.func @transform_1(%arg0: i32, %arg1: i32) -> (i32, i32, i32) {
    %c0_i32 = arith.constant 0 : i32
    %c0_i32_0 = arith.constant 0 : i32
    %c0_i32_1 = arith.constant 0 : i32
    return %arg0, %c0_i32, %c0_i32_0 : i32, i32, i32
  }
  func.func @transform_2(%arg0: i32, %arg1: i32) -> (i32, i32, i32) {
    %c0_i32 = arith.constant 0 : i32
    %c0_i32_0 = arith.constant 0 : i32
    %c0_i32_1 = arith.constant 0 : i32
    return %arg0, %c0_i32, %c0_i32_0 : i32, i32, i32
  }
  func.func @transform_3(%arg0: i32, %arg1: i32) -> (i32, i32, i32) {
    %c0_i32 = arith.constant 0 : i32
    %c0_i32_0 = arith.constant 0 : i32
    %c0_i32_1 = arith.constant 0 : i32
    %c0_i32_2 = arith.constant 0 : i32
    return %c0_i32, %c0_i32_0, %c0_i32_1 : i32, i32, i32
  }
  func.func @transform_4(%arg0: i32, %arg1: i32) -> (i32, i32, i32) {
    %c0_i32 = arith.constant 0 : i32
    %c0_i32_0 = arith.constant 0 : i32
    %c0_i32_1 = arith.constant 0 : i32
    %c0_i32_2 = arith.constant 0 : i32
    return %c0_i32, %c0_i32_0, %c0_i32_1 : i32, i32, i32
  }
  func.func @transform_5(%arg0: i32, %arg1: i32) -> (i32, i32, i32) {
    %c0_i32 = arith.constant 0 : i32
    %c0_i32_0 = arith.constant 0 : i32
    %c0_i32_1 = arith.constant 0 : i32
    %c0_i32_2 = arith.constant 0 : i32
    return %c0_i32, %c0_i32_0, %c0_i32_1 : i32, i32, i32
  }
  func.func @transform_6(%arg0: i32, %arg1: i32) -> (i32, i32, i32) {
    %c0_i32 = arith.constant 0 : i32
    %c0_i32_0 = arith.constant 0 : i32
    %c0_i32_1 = arith.constant 0 : i32
    %c0_i32_2 = arith.constant 0 : i32
    return %c0_i32, %c0_i32_0, %c0_i32_1 : i32, i32, i32
  }
  func.func @transform_7(%arg0: i32, %arg1: i32) -> (i32, i32, i32) {
    %c0_i32 = arith.constant 0 : i32
    %c0_i32_0 = arith.constant 0 : i32
    %c0_i32_1 = arith.constant 0 : i32
    %c0_i32_2 = arith.constant 0 : i32
    return %c0_i32, %c0_i32_0, %c0_i32_1 : i32, i32, i32
  }
  func.func @transform_8(%arg0: i32, %arg1: i32) -> (i32, i32, i32) {
    %c0_i32 = arith.constant 0 : i32
    %c0_i32_0 = arith.constant 0 : i32
    %c0_i32_1 = arith.constant 0 : i32
    %c0_i32_2 = arith.constant 0 : i32
    return %c0_i32, %c0_i32_0, %c0_i32_1 : i32, i32, i32
  }
  func.func @transform_9(%arg0: i32, %arg1: i32) -> (i32, i32, i32) {
    %c0_i32 = arith.constant 0 : i32
    %c0_i32_0 = arith.constant 0 : i32
    %c0_i32_1 = arith.constant 0 : i32
    %c0_i32_2 = arith.constant 0 : i32
    return %c0_i32, %c0_i32_0, %c0_i32_1 : i32, i32, i32
  }
  func.func @transform_10(%arg0: i32, %arg1: i32) -> (i32, i32) {
    %c0_i32 = arith.constant 0 : i32
    %c0_i32_0 = arith.constant 0 : i32
    %c0_i32_1 = arith.constant 0 : i32
    return %c0_i32, %c0_i32_0 : i32, i32
  }
  func.func @transform_11(%arg0: i32, %arg1: i32) -> (i32, i32, i32) {
    %c0_i32 = arith.constant 0 : i32
    %c0_i32_0 = arith.constant 0 : i32
    return %arg0, %arg1, %c0_i32 : i32, i32, i32
  }
  func.func @transform_12(%arg0: i32, %arg1: i32) -> (i32, i32, i32, i32) {
    %c0_i32 = arith.constant 0 : i32
    %c0_i32_0 = arith.constant 0 : i32
    %c0_i32_1 = arith.constant 0 : i32
    return %arg0, %c0_i32, %arg1, %c0_i32_0 : i32, i32, i32, i32
  }
}

</mosaic_0001>

<bundles_post_ra>
// kernel: tpu_custom_call.1
= control target key start
LH: loop header
LB: loop body
LE: loop exit
PB: predicated region body
PF: predicated region fallthrough
CT: control target
= control target key end

     0   :  { %s3181_s0 = inlined_call_operand.vmem [shape: f32[2,8,32], index: 0, kind: input, shape index: {}]   ;;  %s3182_s1 = inlined_call_operand.vmem [shape: f32[2,8,32], index: 1, kind: input, shape index: {}]   ;;  %s3183_s2 = inlined_call_operand.vmem [shape: f32[2,8,32], index: 2, kind: input, shape index: {}]   ;;  %s3184_s3 = inlined_call_operand.vmem [shape: bf16[4,32,8], index: 3, kind: input, shape index: {}]   ;;  %s3185_s4 = inlined_call_operand.vmem [shape: f32[4,1,8], index: 4, kind: input, shape index: {}]   ;;  %s3186_s5 = inlined_call_operand.vmem [shape: bf16[4,32,8], index: 5, kind: input, shape index: {}]   ;;  %s3187_s6 = inlined_call_operand.vmem [shape: f32[4,1,8], index: 6, kind: input, shape index: {}]   ;;  %s3188_s7 = inlined_call_operand.vmem [shape: bf16[4,32,8], index: 7, kind: input, shape index: {}]   ;;  %s3189_s8 = inlined_call_operand.vmem [shape: f32[4,1,8], index: 8, kind: input, shape index: {}]   ;;  %s3190_s9 = inlined_call_operand.vmem [shape: bf16[4,8,32], index: 9, kind: input, shape index: {}]   ;;  %s3191_s10 = inlined_call_operand.vmem [shape: f32[1,32], index: 10, kind: input, shape index: {}]   ;;  %s3192_s11 = inlined_call_operand.hbm [shape: f32[2,8,32], index: 11, kind: output, shape index: {0}]   ;;  %s3193_s12 = inlined_call_operand.hbm [shape: f32[2,4,8,8], index: 12, kind: output, shape index: {1}]  }
   0x1   :  { %3196 = sst [smem:[#allocation10_spill]] %s3181_s0 }
   0x2   :  { %3197 = sst [smem:[#allocation11_spill]] %s3182_s1 }
   0x3   :  { %3198 = sst [smem:[#allocation12_spill]] %s3183_s2 }
   0x4   :  { %3199 = sst [smem:[#allocation13_spill]] %s3184_s3 }
   0x5   :  { %18 = vsyncpa [#allocation3], 0 }
   0x6   :  { %20 = vsyncpa [#allocation3 + $0x1], 0 }
   0x7   :  { %21 = vsyncpa [#allocation5], 0 }
   0x8   :  { %23 = vsyncpa [#allocation5 + $0x1], 0  ;;  %s2730_s21 = smov 0   ;;  %s2732_s22 = smov 0  }
   0x9   :  { %s2734_s23 = smov 0   ;;  %s2736_s24 = smov 0  }
   0xa   :  { %s2738_s25 = smov 0   ;;  %s2740_s26 = smov 0  }
   0xb LB: > { %3200 = sst [smem:[#allocation8_spill]] %s2653_s25  ;;  %s2085_s27 = sadd.s32 4294967295, %s2657_s26   ;;  %s2657_s26 = sphi %s2740_s26, %s29_s26   ;;  %s2653_s25 = sphi %s2738_s25, %s3210_s25   ;;  %s2649_s24 = sphi %s2736_s24, %s3209_s24   ;;  %s2645_s23 = sphi %s2734_s23, %s3213_s23   ;;  %s2641_s22 = sphi %s2732_s22, %s3212_s22   ;;  %s2637_s21 = sphi %s2730_s21, %s3211_s21  }
   0xc   : > { %s2086_s28 = sadd.s32 4294967294, %s2657_s26   ;;  %s41_s29 = sadd.s32 1, %s2653_s25 }
   0xd   : > { %s298_s30 = sadd.s32 1, %s2645_s23  ;;  %p43_p0 = scmp.ge.s32.totalorder %s41_s29, 2 }
   0xe   : > { %p308_p1 = scmp.ne.s32.totalorder %s2645_s23, %s2641_s22  ;;  %p309_p2 = scmp.eq.s32.totalorder %s2085_s27, 1 }
   0xf   : > { %p314_p3 = scmp.ne.s32.totalorder %s2641_s22, %s2637_s21  ;;  %s3215_s29 = smov (%p43_p0, %s41_s29), 0 }
  0x10   : > { %3201 = sst [smem:[#allocation9_spill]] %s3215_s29  ;;  %p2770_p4 = por %p309_p2, %p308_p1 }
  0x11   : > { %p315_p5 = scmp.eq.s32.totalorder %s2086_s28, 1  ;;  %s293_s14 = ssub.s32 %s2653_s25, %s3215_s29 }
  0x12   : > { %p2089_p6 = scmp.ge.s32.totalorder %s2657_s26, 1  ;;  %p296_p7 = scmp.eq.s32.totalorder %s293_s14, 0 }
  0x13   : > { %p2777_p8 = por %p315_p5, %p314_p3  ;;  %p409_p9 = scmp.lt.s32.totalorder %s2657_s26, 3 }
  0x14   : > { %s2783_s16 = scalar_select %p296_p7, %s2645_s23, %s298_s30  }
  0x15   : > { %p410_p10 = pnand %p2089_p6, %p409_p9 }
  0x16   : > { %v2507_v0 = vld [vmem:[%s3186_s5] sm:$0xff] (!%p410_p10)   ;;  %v2659_v1 = vmov (!%p410_p10), 0.0   ;;  %v2508_v2 = vld [vmem:[%s3186_s5 + $0x8] sm:$0xff] (!%p410_p10)   ;;  %s3204_s3 = sld [smem:[#allocation13_spill]] (!%p410_p10)  ;;  %vm2660_vm0 = vmmov (!%p410_p10), 0   ;;  %p466_p11 = scmp.lt.s32.totalorder (!%p410_p10), %s2649_s24, 1 }
  0x17   : > { %413 = sbr.rel (%p410_p10) target bundleno = 3933 (0xf5d), region = 64  ;;  %2283 = vmatprep.subr.bf16.mxu1 (!%p410_p10), %v2659_v1  ;;  %2275 = vmatprep.subr.bf16.mxu0 (!%p410_p10), %v2659_v1  ;;  %s3205_s1 = sld [smem:[#allocation11_spill]] (!%p410_p10)  ;;  %vm511_vm1 = vcmask (!%p410_p10), 261120   ;;  %v2099_v9 = vld [vmem:[%s3187_s6] ss:$0 sm:$0xff] (!%p410_p10)  ;;  %vm690_vm2 = vcmask (!%p410_p10), 64512  }
  0x18   : > { %2284 = vmatpush3.bf16.msra.mxu1 (!%p410_p10), %v2507_v0  ;;  %2287 = vmatprep.mubr.msk.bf16.mxu1 (!%p410_p10), %vm2660_vm0, %v2659_v1  ;;  %s3206_s0 = sld [smem:[#allocation10_spill]] (!%p410_p10)  ;;  %v2095_v16 = vld [vmem:[%s3185_s4] ss:$0 sm:$0xff] (!%p410_p10)  ;;  %s3207_s2 = sld [smem:[#allocation12_spill]] (!%p410_p10)  ;;  %v2512_v25 = vld [vmem:[%s3188_s7 + $0x8] sm:$0xff] (!%p410_p10)   ;;  %vm754_vm3 = vcmask (!%p410_p10), 1043456  }
  0x19   : > { %2285 = vmatprep.subr.bf16.mxu1 (!%p410_p10), %v2659_v1  ;;  %2279 = vmatprep.mubr.msk.bf16.mxu0 (!%p410_p10), %vm2660_vm0, %v2659_v1  ;;  %v2511_v24 = vld [vmem:[%s3188_s7] sm:$0xff] (!%p410_p10)   ;;  %v2513_v51 = vld [vmem:[%s3186_s5 + $0x10] sm:$0xff] (!%p410_p10)   ;;  %v2514_v53 = vld [vmem:[%s3186_s5 + $0x18] sm:$0xff] (!%p410_p10)   ;;  %s2214_s14 = sshll.u32 (!%p410_p10), %s2649_s24, 9 }
  0x1a   : > { %v2103_v41 = vld [vmem:[%s3189_s8] ss:$0 sm:$0xff] (!%p410_p10)  ;;  %v2123_v62 = vld [vmem:[%s3187_s6 + $0x1] ss:$0 sm:$0xff] (!%p410_p10)  ;;  %s3097_s20 = scalar_lea.hbm (!%p410_p10), %s3193_s12, %s2214_s14 }
  0x1c   : > { %v2509_v3 = vld [vmem:[%s3204_s3] sm:$0xff] (!%p410_p10)   ;;  %v2510_v4 = vld [vmem:[%s3204_s3 + $0x8] sm:$0xff] (!%p410_p10)   ;;  %2286 = vmatpush3.bf16.msra.mxu1 (!%p410_p10), %v2508_v2  ;;  %v2515_v46 = vld [vmem:[%s3204_s3 + $0x10] sm:$0xff] (!%p410_p10)  }
  0x1d   : > { %2276 = vmatpush3.bf16.msra.mxu0 (!%p410_p10), %v2509_v3  ;;  %2299 = vmatprep.subr.bf16.mxu1 (!%p410_p10), %v2659_v1  ;;  %v2516_v47 = vld [vmem:[%s3204_s3 + $0x18] sm:$0xff] (!%p410_p10)  }
  0x1e   : > { %s467_s30 = scalar_select %p466_p11, %s2649_s24, 1  ;;  %2277 = vmatprep.subr.bf16.mxu0 %v2659_v1 }
  0x20   : > { %s2807_s18 = sshll.u32 %s467_s30, 3 }
  0x21   : > { %s476_s27 = scalar_lea.vmem %s3205_s1, %s2807_s18  ;;  %s472_s25 = scalar_lea.vmem %s3206_s0, %s2807_s18  ;;  %2278 = vmatpush3.bf16.msra.mxu0 %v2510_v4  ;;  %v2114_v4 = vld [vmem:[%s3185_s4 + $0x1] ss:$0 sm:$0xff] }
  0x22   : > { %v484_v5 = vld [vmem:[%s476_s27] sm:$0xff]  ;;  %2291 = vmatprep.subr.bf16.mxu0 %v2659_v1  ;;  %s480_s28 = scalar_lea.vmem %s3207_s2, %s2807_s18  ;;  %s2880_s27 = sand.u32 1, %s2641_s22  }
  0x23   : > { %v482_v6 = vld [vmem:[%s472_s25] sm:$0xff]  ;;  %v2818_v7 = vpack.c.bf16 %v484_v5, %v484_v5  ;;  %s2661_s25 = smov [#allocation4]  }
  0x24   : > { %v2820_v8 = vpack.c.bf16 %v482_v6, %v482_v6  ;;  %v486_v26 = vld [vmem:[%s480_s28] sm:$0xff]  ;;  %s2091_s28 = sshll.u32 %s2880_s27, 5  ;;  %s2551_s0 = sshll.u32 %s2661_s25, 4  ;;  %s2552_s0 = int_to_ptr.vmem [resolvable:$false] %s2551_s0 }
  0x25   : > { %2288 = vmatmul.mubr.msk.bf16.vlgmr.msra.gmra.mrb[0].mxu1 %vm511_vm1, %v2818_v7  ;;  %v2853_v27 = vpack.c.bf16 %v486_v26, %v486_v26  ;;  %s2886_s18 = scalar_lea.vmem [#allocation4], %s2091_s28 }
  0x26   : > { %2280 = vmatmul.mubr.msk.bf16.vlgmr.msra.gmra.mrb[0].mxu0 %vm511_vm1, %v2820_v8  ;;  %2301 = vmatprep.mubr.msk.bf16.mxu1 %vm2660_vm0, %v2659_v1  ;;  %s1953_s30 = sshll.u32 %s2886_s18, 4  ;;  %s3092_s30 = int_to_ptr.vmem [resolvable:$true] %s1953_s30 }
  0x27   : > { %2295 = vmatprep.mubr.msk.bf16.mxu0 %vm2660_vm0, %v2659_v1  ;;  %2292 = vmatpush3.bf16.msra.mxu0 %v2511_v24  ;;  %s2547_s29 = scalar_lea.vmem %s3092_s30, 512  ;;  %p2554_p1 = scmp.lt.s32.totalorder %s3092_s30, %s2552_s0 }
  0x28   : > { %2293 = vmatprep.subr.bf16.mxu0 %v2659_v1  ;;  %p2548_p12 = scmp.ne.s32.totalorder %s3092_s30, %s2547_s29 }
  0x2a   : > { %p2549_p13 = pnand %p2548_p12, %p2770_p4 }
  0x2b   : > { %2294 = vmatpush3.bf16.msra.mxu0 %v2512_v25 }
  0x2c   : > { %2305 = vmatprep.subr.bf16.mxu0 %v2659_v1  ;;  %p2550_p0 = pneg %p2549_p13 }
  0x2e   : > { %2296 = vmatmul.mubr.msk.bf16.vlgmr.msra.gmra.mrb[4].mxu0 %vm511_vm1, %v2853_v27 }
  0x2f   : > { %2307 = vmatprep.mubr.msk.bf16.mxu0 %vm2660_vm0, %v2659_v1 }
  0xf8   : > { %v615_v10 = vpop.f32.mrb[0].mxu1 }
  0xf9   : > { %v549_v11 = vpop.f32.mrb[0].mxu0  ;;  %v616_v12 = vadd.f32 %v2099_v9, %v615_v10  ;;  %v2289_v13 = vpop.f32.mrb[1].mxu1 }
  0xfa   : > { %v2281_v14 = vpop.f32.mrb[1].mxu0  ;;  %v618_v15 = vpop.f32.mrb[2].mxu1  ;;  %v550_v22 = vadd.f32 %v2095_v16, %v549_v11  ;;  %v2518_v13 = vld [vmem:[%s3188_s7 + $0x18] sm:$0xff]  }
  0xfb   : > { %v552_v17 = vpop.f32.mrb[2].mxu0  ;;  %v688_v18 = vpack.c.bf16 %v616_v12, %v616_v12  ;;  %v2290_v19 = vpop.f32.mrb[3].mxu1  ;;  %v2517_v12 = vld [vmem:[%s3188_s7 + $0x10] sm:$0xff]  }
  0xfc   : > { %v2282_v20 = vpop.f32.mrb[3].mxu0  ;;  %v687_v23 = vpack.c.bf16 %v550_v22, %v550_v22  ;;  %v2132_v19 = vld [vmem:[%s3189_s8 + $0x1] ss:$0 sm:$0xff] }
  0xfd   : > { %v695_v21 = vsel %vm690_vm2, %v688_v18, 0 }
  0xfe   : > { %2300 = vmatpush3.bf16.xpose.msra.mxu1 %v695_v21 }
  0xff   : > { %2311 = vmatprep.subr.bf16.mxu1 %v2659_v1 }
 0x101   : > { %v681_v38 = vpop.f32.mrb[4].mxu0 }
 0x102   : > { %v2297_v39 = vpop.f32.mrb[5].mxu0  ;;  %v682_v43 = vadd.f32 %v2103_v41, %v681_v38  ;;  %v2519_v41 = vld [vmem:[%s3186_s5 + $0x20] sm:$0xff]  }
 0x103   : > { %v684_v40 = vpop.f32.mrb[6].mxu0 }
 0x104   : > { %v2298_v42 = vpop.f32.mrb[7].mxu0  ;;  %v689_v44 = vpack.c.bf16 %v682_v43, %v682_v43  ;;  %v2520_v43 = vld [vmem:[%s3186_s5 + $0x28] sm:$0xff]  }
 0x105   : > { %2302 = vmatmul.mubr.msk.bf16.vlgmr.msra.gmra.mrb[4].mxu1 %vm690_vm2, %v687_v23 }
 0x106   : > { %2315 = vmatprep.mubr.msk.bf16.mxu1 %vm2660_vm0, %v2659_v1  ;;  %v756_v45 = vsel %vm754_vm3, %v689_v44, 0  ;;  %2312 = vmatpush3.bf16.msra.mxu1 %v2515_v46 }
 0x107   : > { %2306 = vmatpush3.bf16.msra.mxu0 %v756_v45  ;;  %2313 = vmatprep.subr.bf16.mxu1 %v2659_v1  ;;  %v2521_v45 = vld [vmem:[%s3204_s3 + $0x20] sm:$0xff]  }
 0x108   : > { %2319 = vmatprep.subr.bf16.mxu0 %v2659_v1 }
 0x10a   : > { %2314 = vmatpush3.bf16.msra.mxu1 %v2516_v47 }
 0x10b   : > { %2327 = vmatprep.subr.bf16.mxu1 %v2659_v1 }
 0x10d   : > { %2316 = vmatmul.mubr.msk.bf16.vlgmr.msra.gmra.mrb[8].mxu1 %vm511_vm1, %v2820_v8 }
 0x10e   : > { %2331 = vmatprep.mubr.msk.bf16.mxu1 %vm2660_vm0, %v2659_v1  ;;  %2328 = vmatpush3.bf16.msra.mxu1 %v2517_v12 }
 0x10f   : > { %2329 = vmatprep.subr.bf16.mxu1 %v2659_v1 }
 0x112   : > { %2330 = vmatpush3.bf16.msra.mxu1 %v2518_v13 }
 0x113   : > { %2341 = vmatprep.subr.bf16.mxu1 %v2659_v1 }
 0x115   : > { %2332 = vmatmul.mubr.msk.bf16.vlgmr.msra.gmra.mrb[12].mxu1 %vm511_vm1, %v2853_v27 }
 0x116   : > { %2343 = vmatprep.mubr.msk.bf16.mxu1 %vm2660_vm0, %v2659_v1 }
 0x1d8   : > { %v731_v28 = vpop.f32.mrb[4].mxu1 }
 0x1d9   : > { %v2303_v29 = vpop.f32.mrb[5].mxu1  ;;  %v737_v30 = vsel %vm690_vm2, %v731_v28, -inf }
 0x1da   : > { %738 = vmax.xlane.f32.xlu0 %v737_v30  ;;  %v734_v31 = vpop.f32.mrb[6].mxu1 }
 0x1db   : > { %v2304_v32 = vpop.f32.mrb[7].mxu1 }
 0x1e0   : > { %v859_v54 = vpop.f32.mrb[8].mxu1 }
 0x1e1   : > { %v2317_v55 = vpop.f32.mrb[9].mxu1  ;;  %v860_v10 = vadd.f32 %v2114_v4, %v859_v54 }
 0x1e2   : > { %v862_v56 = vpop.f32.mrb[10].mxu1  ;;  %v2156_v55 = vld [vmem:[%s3187_s6 + $0x2] ss:$0 sm:$0xff] }
 0x1e3   : > { %v2318_v57 = vpop.f32.mrb[11].mxu1  ;;  %v995_v11 = vpack.c.bf16 %v860_v10, %v860_v10 }
 0x1e8   : > { %v989_v20 = vpop.f32.mrb[12].mxu1 }
 0x1e9   : > { %v990_v21 = vadd.f32 %v2132_v19, %v989_v20  ;;  %v2333_v22 = vpop.f32.mrb[13].mxu1 }
 0x1ea   : > { %v992_v23 = vpop.f32.mrb[14].mxu1 }
 0x1eb   : > { %v997_v24 = vpack.c.bf16 %v990_v21, %v990_v21  ;;  %v2334_v25 = vpop.f32.mrb[15].mxu1 }
 0x1ed   : > { %v1063_v26 = vsel %vm754_vm3, %v997_v24, 0 }
 0x1ee   : > { %2342 = vmatpush3.bf16.msra.mxu1 %v1063_v26 }
 0x1ef   : > { %2353 = vmatprep.subr.bf16.mxu1 %v2659_v1 }
 0x267   : > { %v739_v33 = vpop.xlane.xlu0 %738 }
 0x268   : > { %v740_v34 = vsub.f32 %v731_v28, %v739_v33  ;;  %v2139_v33 = vld [vmem:[%s3190_s9 + $0x4] sm:$0xf] }
 0x26a   : > { %v741_v35 = vmul.f32 1.442695, %v740_v34  ;;  %v1112_v34 = vsel %vm754_vm3, %v2139_v33, 0 }
 0x26c   : > { %2531 = vpow2.f32 %v741_v35 }
 0x276   : > { %v2532_v36 = vpop.eup %2531 }
 0x277   : > { %v743_v37 = vsel %vm690_vm2, %v2532_v36, 0.0 }
 0x278   : > { %744 = vadd.xlane.f32.xlu0 %v743_v37  ;;  %v799_v37 = vld [vmem:[%s3190_s9] sm:$0xf] }
 0x279   : > { %v1158_v40 = vsel %vm754_vm3, %v799_v37, 0 }
 0x305   : > { %v745_v48 = vpop.xlane.xlu0 %744 }
 0x306   : > { %2533 = vrcp.f32 %v745_v48 }
 0x310   : > { %v2534_v49 = vpop.eup %2533 }
 0x311   : > { %v748_v50 = vmul.f32 %v2534_v49, %v2532_v36 }
 0x313   : > { %v750_v52 = vpack.c.bf16 %v748_v50, %v748_v50  ;;  %749 = vst.msk [vmem:[%s2886_s18] sm:$0xff] %vm690_vm2, %v748_v50  ;;  %v2522_v50 = vld [vmem:[%s3204_s3 + $0x28] sm:$0xff]  }
 0x315   : > { %2308 = vmatmul.mubr.msk.bf16.vlgmr.msra.gmra.mrb[8].mxu0 %vm690_vm2, %v750_v52 }
 0x316   : > { %2320 = vmatpush3.bf16.msra.mxu0 %v2513_v51  ;;  %2323 = vmatprep.mubr.msk.bf16.mxu0 %vm2660_vm0, %v2659_v1 }
 0x317   : > { %2321 = vmatprep.subr.bf16.mxu0 %v2659_v1 }
 0x31a   : > { %2322 = vmatpush3.bf16.msra.mxu0 %v2514_v53 }
 0x31b   : > { %2335 = vmatprep.subr.bf16.mxu0 %v2659_v1 }
 0x31d   : > { %2324 = vmatmul.mubr.msk.bf16.vlgmr.msra.gmra.mrb[12].mxu0 %vm511_vm1, %v2818_v7 }
 0x31e   : > { %2337 = vmatprep.mubr.msk.bf16.mxu0 %vm2660_vm0, %v2659_v1 }
 0x3e8   : > { %v2902_v58 = vpop.f32.mrb[8].mxu0 }
 0x3e9   : > { %v2309_v59 = vpop.f32.mrb[9].mxu0  ;;  %v798_v42 = vpack.c.bf16 %v2902_v58, %v2902_v58 }
 0x3ea   : > { %v795_v60 = vpop.f32.mrb[10].mxu0 }
 0x3eb   : > { %v2310_v61 = vpop.f32.mrb[11].mxu0 }
 0x3f0   : > { %v924_v63 = vpop.f32.mrb[12].mxu0 }
 0x3f1   : > { %v925_v0 = vadd.f32 %v2123_v62, %v924_v63  ;;  %v2325_v2 = vpop.f32.mrb[13].mxu0 }
 0x3f2   : > { %v927_v3 = vpop.f32.mrb[14].mxu0 }
 0x3f3   : > { %v996_v5 = vpack.c.bf16 %v925_v0, %v925_v0  ;;  %v2326_v6 = vpop.f32.mrb[15].mxu0 }
 0x3f5   : > { %v1002_v9 = vsel %vm690_vm2, %v996_v5, 0  ;;  %v2147_v5 = vld [vmem:[%s3185_s4 + $0x2] ss:$0 sm:$0xff] }
 0x3f6   : > { %2336 = vmatpush3.bf16.xpose.msra.mxu0 %v1002_v9 }
 0x3f7   : > { %2347 = vmatprep.subr.bf16.mxu0 %v2659_v1 }
 0x3fd   : > { %2338 = vmatmul.mubr.msk.bf16.vlgmr.msra.gmra.mrb[16].mxu0 %vm690_vm2, %v995_v11 }
 0x3fe   : > { %2349 = vmatprep.mubr.msk.bf16.mxu0 %vm2660_vm0, %v2659_v1  ;;  %2348 = vmatpush3.bf16.msra.mxu0 %v1112_v34 }
 0x3ff   : > { %2359 = vmatprep.subr.bf16.mxu0 %v2659_v1 }
 0x4d0   : > { %v1038_v14 = vpop.f32.mrb[16].mxu0 }
 0x4d1   : > { %v2339_v15 = vpop.f32.mrb[17].mxu0  ;;  %v1044_v16 = vsel %vm690_vm2, %v1038_v14, -inf }
 0x4d2   : > { %1045 = vmax.xlane.f32.xlu1 %v1044_v16  ;;  %v1041_v17 = vpop.f32.mrb[18].mxu0  ;;  %v2524_v15 = vld [vmem:[%s3188_s7 + $0x28] sm:$0xff]  }
 0x4d3   : > { %v2340_v18 = vpop.f32.mrb[19].mxu0 }
 0x55f   : > { %v1046_v28 = vpop.xlane.xlu1 %1045 }
 0x560   : > { %v1047_v29 = vsub.f32 %v1038_v14, %v1046_v28  ;;  %v2523_v14 = vld [vmem:[%s3188_s7 + $0x20] sm:$0xff]  }
 0x562   : > { %v1048_v30 = vmul.f32 1.442695, %v1047_v29 }
 0x564   : > { %2535 = vpow2.f32 %v1048_v30  ;;  %v2165_v30 = vld [vmem:[%s3189_s8 + $0x2] ss:$0 sm:$0xff] }
 0x56e   : > { %v2536_v31 = vpop.eup %2535 }
 0x56f   : > { %v1050_v32 = vsel %vm690_vm2, %v2536_v31, 0.0 }
 0x570   : > { %1051 = vadd.xlane.f32.xlu1 %v1050_v32 }
 0x5fd   : > { %v1052_v35 = vpop.xlane.xlu1 %1051 }
 0x5fe   : > { %2537 = vrcp.f32 %v1052_v35  ;;  %v2172_v35 = vld [vmem:[%s3190_s9 + $0x8] sm:$0xf] }
 0x608   : > { %v2538_v36 = vpop.eup %2537 }
 0x609   : > { %v1055_v38 = vmul.f32 %v2538_v36, %v2536_v31  ;;  %v1512_v36 = vsel %vm754_vm3, %v2172_v35, 0 }
 0x60b   : > { %v1058_v39 = vpack.c.bf16 %v1055_v38, %v1055_v38  ;;  %2137 = vst.msk [vmem:[%s2886_s18 + $0x8] sm:$0xff] %vm690_vm2, %v1055_v38 }
 0x60d   : > { %2344 = vmatmul.mubr.msk.bf16.vlgmr.msra.gmra.mrb[16].mxu1 %vm690_vm2, %v1058_v39 }
 0x60e   : > { %2354 = vmatpush3.bf16.msra.mxu1 %v1158_v40  ;;  %2355 = vmatprep.mubr.msk.bf16.mxu1 %vm2660_vm0, %v2659_v1 }
 0x60f   : > { %2367 = vmatprep.subr.bf16.mxu1 %v2659_v1 }
 0x615   : > { %2356 = vmatmul.mubr.msk.bf16.vlgmr.msra.gmra.mrb[20].mxu1 %vm690_vm2, %v798_v42  ;;  %v2528_v42 = vld [vmem:[%s3204_s3 + $0x38] sm:$0xff]  }
 0x616   : > { %2368 = vmatpush3.bf16.msra.mxu1 %v2519_v41  ;;  %2371 = vmatprep.mubr.msk.bf16.mxu1 %vm2660_vm0, %v2659_v1  ;;  %v2527_v41 = vld [vmem:[%s3204_s3 + $0x30] sm:$0xff]  }
 0x617   : > { %2369 = vmatprep.subr.bf16.mxu1 %v2659_v1 }
 0x61a   : > { %2370 = vmatpush3.bf16.msra.mxu1 %v2520_v43 }
 0x61b   : > { %2383 = vmatprep.subr.bf16.mxu1 %v2659_v1 }
 0x61d   : > { %2372 = vmatmul.mubr.msk.bf16.vlgmr.msra.gmra.mrb[24].mxu1 %vm511_vm1, %v2818_v7 }
 0x61e   : > { %2385 = vmatprep.mubr.msk.bf16.mxu1 %vm2660_vm0, %v2659_v1 }
 0x6e0   : > { %v1099_v44 = vpop.f32.mrb[16].mxu1 }
 0x6e1   : > { %v1105_v46 = vpack.c.bf16 %v1099_v44, %v1099_v44  ;;  %v2345_v47 = vpop.f32.mrb[17].mxu1  ;;  %v2525_v44 = vld [vmem:[%s3186_s5 + $0x30] sm:$0xff]  }
 0x6e2   : > { %v1102_v48 = vpop.f32.mrb[18].mxu1 }
 0x6e3   : > { %v2346_v49 = vpop.f32.mrb[19].mxu1  ;;  %2350 = vmatmul.mubr.msk.bf16.vlgmr.msra.gmra.mrb[20].mxu0 %vm690_vm2, %v1105_v46 }
 0x6e4   : > { %2360 = vmatpush3.bf16.msra.mxu0 %v2521_v45  ;;  %2363 = vmatprep.mubr.msk.bf16.mxu0 %vm2660_vm0, %v2659_v1  ;;  %v2526_v49 = vld [vmem:[%s3186_s5 + $0x38] sm:$0xff]  }
 0x6e5   : > { %2361 = vmatprep.subr.bf16.mxu0 %v2659_v1 }
 0x6e8   : > { %v1194_v51 = vpop.f32.mrb[20].mxu1  ;;  %2362 = vmatpush3.bf16.msra.mxu0 %v2522_v50 }
 0x6e9   : > { %v2357_v52 = vpop.f32.mrb[21].mxu1  ;;  %2375 = vmatprep.subr.bf16.mxu0 %v2659_v1 }
 0x6ea   : > { %v1197_v53 = vpop.f32.mrb[22].mxu1 }
 0x6eb   : > { %v2358_v54 = vpop.f32.mrb[23].mxu1  ;;  %2364 = vmatmul.mubr.msk.bf16.vlgmr.msra.gmra.mrb[24].mxu0 %vm511_vm1, %v2820_v8 }
 0x6ec   : > { %2379 = vmatprep.mubr.msk.bf16.mxu0 %vm2660_vm0, %v2659_v1  ;;  %2376 = vmatpush3.bf16.msra.mxu0 %v2523_v14 }
 0x6ed   : > { %2377 = vmatprep.subr.bf16.mxu0 %v2659_v1 }
 0x6f0   : > { %v1324_v56 = vpop.f32.mrb[24].mxu1  ;;  %2378 = vmatpush3.bf16.msra.mxu0 %v2524_v15 }
 0x6f1   : > { %v1325_v57 = vadd.f32 %v2156_v55, %v1324_v56  ;;  %v2373_v58 = vpop.f32.mrb[25].mxu1  ;;  %2389 = vmatprep.subr.bf16.mxu0 %v2659_v1 }
 0x6f2   : > { %v1327_v59 = vpop.f32.mrb[26].mxu1  ;;  %v2188_v58 = vld [vmem:[%s3187_s6 + $0x3] ss:$0 sm:$0xff] }
 0x6f3   : > { %v1396_v60 = vpack.c.bf16 %v1325_v57, %v1325_v57  ;;  %v2374_v61 = vpop.f32.mrb[27].mxu1  ;;  %2380 = vmatmul.mubr.msk.bf16.vlgmr.msra.gmra.mrb[28].mxu0 %vm511_vm1, %v2853_v27 }
 0x6f4   : > { %2391 = vmatprep.mubr.msk.bf16.mxu0 %vm2660_vm0, %v2659_v1 }
 0x6f5   : > { %v1402_v62 = vsel %vm690_vm2, %v1396_v60, 0 }
 0x6f6   : > { %2384 = vmatpush3.bf16.xpose.msra.mxu1 %v1402_v62  ;;  %v2179_v62 = vld [vmem:[%s3185_s4 + $0x3] ss:$0 sm:$0xff] }
 0x6f7   : > { %2395 = vmatprep.subr.bf16.mxu1 %v2659_v1 }
 0x7b6   : > { %v1148_v63 = vpop.f32.mrb[20].mxu0 }
 0x7b7   : > { %v2986_v0 = vadd.f32 %v1194_v51, %v1148_v63  ;;  %v2351_v2 = vpop.f32.mrb[21].mxu0 }
 0x7b8   : > { %v1151_v3 = vpop.f32.mrb[22].mxu0 }
 0x7b9   : > { %v2352_v4 = vpop.f32.mrb[23].mxu0 }
 0x7be   : > { %v1259_v6 = vpop.f32.mrb[24].mxu0 }
 0x7bf   : > { %v1260_v9 = vadd.f32 %v2147_v5, %v1259_v6  ;;  %v2365_v10 = vpop.f32.mrb[25].mxu0  ;;  %v2529_v5 = vld [vmem:[%s3188_s7 + $0x30] sm:$0xff]   ;;  %v2530_v6 = vld [vmem:[%s3188_s7 + $0x38] sm:$0xff]  }
 0x7c0   : > { %v1262_v11 = vpop.f32.mrb[26].mxu0 }
 0x7c1   : > { %v1395_v12 = vpack.c.bf16 %v1260_v9, %v1260_v9  ;;  %v2366_v13 = vpop.f32.mrb[27].mxu0 }
 0x7c3   : > { %2386 = vmatmul.mubr.msk.bf16.vlgmr.msra.gmra.mrb[28].mxu1 %vm690_vm2, %v1395_v12 }
 0x7c4   : > { %2397 = vmatprep.mubr.msk.bf16.mxu1 %vm2660_vm0, %v2659_v1  ;;  %2396 = vmatpush3.bf16.msra.mxu1 %v1512_v36 }
 0x7c5   : > { %2409 = vmatprep.subr.bf16.mxu1 %v2659_v1 }
 0x7c6   : > { %v1389_v26 = vpop.f32.mrb[28].mxu0 }
 0x7c7   : > { %v2381_v28 = vpop.f32.mrb[29].mxu0  ;;  %v1390_v32 = vadd.f32 %v2165_v30, %v1389_v26 }
 0x7c8   : > { %v1392_v29 = vpop.f32.mrb[30].mxu0 }
 0x7c9   : > { %v2382_v31 = vpop.f32.mrb[31].mxu0  ;;  %v1397_v33 = vpack.c.bf16 %v1390_v32, %v1390_v32 }
 0x7cb   : > { %v1463_v34 = vsel %vm754_vm3, %v1397_v33, 0 }
 0x7cc   : > { %2390 = vmatpush3.bf16.msra.mxu0 %v1463_v34 }
 0x7cd   : > { %2401 = vmatprep.subr.bf16.mxu0 %v2659_v1 }
 0x896   : > { %v1438_v16 = vpop.f32.mrb[28].mxu1 }
 0x897   : > { %v2387_v17 = vpop.f32.mrb[29].mxu1  ;;  %v1444_v18 = vsel %vm690_vm2, %v1438_v16, -inf }
 0x898   : > { %1445 = vmax.xlane.f32.xlu0 %v1444_v18  ;;  %v1441_v19 = vpop.f32.mrb[30].mxu1 }
 0x899   : > { %v2388_v20 = vpop.f32.mrb[31].mxu1 }
 0x925   : > { %v1446_v21 = vpop.xlane.xlu0 %1445 }
 0x926   : > { %v1447_v22 = vsub.f32 %v1438_v16, %v1446_v21 }
 0x928   : > { %v1448_v23 = vmul.f32 1.442695, %v1447_v22 }
 0x92a   : > { %2539 = vpow2.f32 %v1448_v23 }
 0x934   : > { %v2540_v24 = vpop.eup %2539 }
 0x935   : > { %v1450_v25 = vsel %vm690_vm2, %v2540_v24, 0.0 }
 0x936   : > { %1451 = vadd.xlane.f32.xlu1 %v1450_v25  ;;  %v2204_v25 = vld [vmem:[%s3190_s9 + $0xc] sm:$0xf] }
 0x937   : > { %v1867_v26 = vsel %vm754_vm3, %v2204_v25, 0 }
 0x9c3   : > { %v1452_v37 = vpop.xlane.xlu1 %1451 }
 0x9c4   : > { %2541 = vrcp.f32 %v1452_v37 }
 0x9ce   : > { %v2542_v38 = vpop.eup %2541 }
 0x9cf   : > { %v1455_v39 = vmul.f32 %v2542_v38, %v2540_v24 }
 0x9d1   : > { %v1458_v40 = vpack.c.bf16 %v1455_v39, %v1455_v39  ;;  %2170 = vst.msk [vmem:[%s2886_s18 + $0x10] sm:$0xff] %vm690_vm2, %v1455_v39 }
 0x9d3   : > { %2392 = vmatmul.mubr.msk.bf16.vlgmr.msra.gmra.mrb[32].mxu0 %vm690_vm2, %v1458_v40 }
 0x9d4   : > { %2405 = vmatprep.mubr.msk.bf16.mxu0 %vm2660_vm0, %v2659_v1  ;;  %2402 = vmatpush3.bf16.msra.mxu0 %v2527_v41 }
 0x9d5   : > { %2403 = vmatprep.subr.bf16.mxu0 %v2659_v1 }
 0x9d8   : > { %2404 = vmatpush3.bf16.msra.mxu0 %v2528_v42 }
 0x9d9   : > { %2417 = vmatprep.subr.bf16.mxu0 %v2659_v1 }
 0x9db   : > { %2406 = vmatmul.mubr.msk.bf16.vlgmr.msra.gmra.mrb[36].mxu0 %vm511_vm1, %v2820_v8 }
 0x9dc   : > { %2421 = vmatprep.mubr.msk.bf16.mxu0 %vm2660_vm0, %v2659_v1  ;;  %2418 = vmatpush3.bf16.msra.mxu0 %v2529_v5 }
 0x9dd   : > { %2419 = vmatprep.subr.bf16.mxu0 %v2659_v1 }
 0x9e0   : > { %2420 = vmatpush3.bf16.msra.mxu0 %v2530_v6 }
 0x9e1   : > { %2431 = vmatprep.subr.bf16.mxu0 %v2659_v1 }
 0x9e3   : > { %2422 = vmatmul.mubr.msk.bf16.vlgmr.msra.gmra.mrb[40].mxu0 %vm511_vm1, %v2853_v27 }
 0x9e4   : > { %2433 = vmatprep.mubr.msk.bf16.mxu0 %vm2660_vm0, %v2659_v1 }
 0xaa6   : > { %v1499_v43 = vpop.f32.mrb[32].mxu0 }
 0xaa7   : > { %v1505_v45 = vpack.c.bf16 %v1499_v43, %v1499_v43  ;;  %v2393_v46 = vpop.f32.mrb[33].mxu0 }
 0xaa8   : > { %v1502_v47 = vpop.f32.mrb[34].mxu0 }
 0xaa9   : > { %v2394_v48 = vpop.f32.mrb[35].mxu0  ;;  %2398 = vmatmul.mubr.msk.bf16.vlgmr.msra.gmra.mrb[32].mxu1 %vm690_vm2, %v1505_v45 }
 0xaaa   : > { %2410 = vmatpush3.bf16.msra.mxu1 %v2525_v44  ;;  %2413 = vmatprep.mubr.msk.bf16.mxu1 %vm2660_vm0, %v2659_v1 }
 0xaab   : > { %2411 = vmatprep.subr.bf16.mxu1 %v2659_v1 }
 0xaae   : > { %2412 = vmatpush3.bf16.msra.mxu1 %v2526_v49  ;;  %v1614_v8 = vpop.f32.mrb[36].mxu0 }
 0xaaf   : > { %2425 = vmatprep.subr.bf16.mxu1 %v2659_v1  ;;  %v2407_v50 = vpop.f32.mrb[37].mxu0  ;;  %v1615_v3 = vadd.f32 %v2179_v62, %v1614_v8 }
 0xab0   : > { %v1617_v51 = vpop.f32.mrb[38].mxu0 }
 0xab1   : > { %2414 = vmatmul.mubr.msk.bf16.vlgmr.msra.gmra.mrb[36].mxu1 %vm511_vm1, %v2818_v7  ;;  %v2408_v52 = vpop.f32.mrb[39].mxu0  ;;  %v1750_v4 = vpack.c.bf16 %v1615_v3, %v1615_v3 }
 0xab2   : > { %2427 = vmatprep.mubr.msk.bf16.mxu1 %vm2660_vm0, %v2659_v1 }
 0xab6   : > { %v1744_v19 = vpop.f32.mrb[40].mxu0 }
 0xab7   : > { %v2423_v27 = vpop.f32.mrb[41].mxu0 }
 0xab8   : > { %v1747_v20 = vpop.f32.mrb[42].mxu0 }
 0xab9   : > { %v2424_v21 = vpop.f32.mrb[43].mxu0 }
 0xb7c   : > { %v1548_v53 = vpop.f32.mrb[32].mxu1 }
 0xb7d   : > { %v3051_v54 = vadd.f32 %v1548_v53, %v2986_v0  ;;  %v2399_v55 = vpop.f32.mrb[33].mxu1 }
 0xb7e   : > { %v1551_v56 = vpop.f32.mrb[34].mxu1 }
 0xb7f   : > { %v2400_v57 = vpop.f32.mrb[35].mxu1 }
 0xb84   : > { %v1679_v59 = vpop.f32.mrb[36].mxu1 }
 0xb85   : > { %v1680_v7 = vadd.f32 %v2188_v58, %v1679_v59  ;;  %v2415_v60 = vpop.f32.mrb[37].mxu1 }
 0xb86   : > { %v1682_v61 = vpop.f32.mrb[38].mxu1 }
 0xb87   : > { %v1751_v63 = vpack.c.bf16 %v1680_v7, %v1680_v7  ;;  %v2416_v2 = vpop.f32.mrb[39].mxu1 }
 0xb89   : > { %v1757_v0 = vsel %vm690_vm2, %v1751_v63, 0 }
 0xb8a   : > { %2426 = vmatpush3.bf16.xpose.msra.mxu1 %v1757_v0 }
 0xb8b   : > { %2437 = vmatprep.subr.bf16.mxu1 %v2659_v1 }
 0xb91   : > { %2428 = vmatmul.mubr.msk.bf16.vlgmr.msra.gmra.mrb[40].mxu1 %vm690_vm2, %v1750_v4 }
 0xb92   : > { %2439 = vmatprep.mubr.msk.bf16.mxu1 %vm2660_vm0, %v2659_v1  ;;  %v2197_v1 = vld [vmem:[%s3189_s8 + $0x3] ss:$0 sm:$0xff]  ;;  %2438 = vmatpush3.bf16.msra.mxu1 %v1867_v26 }
 0xb93   : > { %v1745_v22 = vadd.f32 %v2197_v1, %v1744_v19 }
 0xb95   : > { %v1752_v23 = vpack.c.bf16 %v1745_v22, %v1745_v22 }
 0xb97   : > { %v1818_v24 = vsel %vm754_vm3, %v1752_v23, 0 }
 0xb98   : > { %2432 = vmatpush3.bf16.msra.mxu0 %v1818_v24 }
 0xc64   : > { %v1793_v9 = vpop.f32.mrb[40].mxu1 }
 0xc65   : > { %v2429_v10 = vpop.f32.mrb[41].mxu1  ;;  %v1799_v11 = vsel %vm690_vm2, %v1793_v9, -inf }
 0xc66   : > { %1800 = vmax.xlane.f32.xlu0 %v1799_v11  ;;  %v1796_v12 = vpop.f32.mrb[42].mxu1 }
 0xc67   : > { %v2430_v13 = vpop.f32.mrb[43].mxu1 }
 0xcf3   : > { %v1801_v14 = vpop.xlane.xlu0 %1800 }
 0xcf4   : > { %v1802_v15 = vsub.f32 %v1793_v9, %v1801_v14 }
 0xcf6   : > { %v1803_v16 = vmul.f32 1.442695, %v1802_v15 }
 0xcf8   : > { %2543 = vpow2.f32 %v1803_v16 }
 0xd02   : > { %v2544_v17 = vpop.eup %2543 }
 0xd03   : > { %v1805_v18 = vsel %vm690_vm2, %v2544_v17, 0.0 }
 0xd04   : > { %1806 = vadd.xlane.f32.xlu1 %v1805_v18 }
 0xd91   : > { %v1807_v28 = vpop.xlane.xlu1 %1806 }
 0xd92   : > { %2545 = vrcp.f32 %v1807_v28 }
 0xd9c   : > { %v2546_v29 = vpop.eup %2545 }
 0xd9d   : > { %v1810_v30 = vmul.f32 %v2546_v29, %v2544_v17 }
 0xd9f   : > { %v1813_v31 = vpack.c.bf16 %v1810_v30, %v1810_v30  ;;  %2202 = vst.msk [vmem:[%s2886_s18 + $0x18] sm:$0xff] %vm690_vm2, %v1810_v30  ;;  %s2553_s18 = scalar_lea.vmem %s2552_s0, 1024 }
 0xda0   : > { %p2555_p2 = scmp.lt.s32.totalorder %s2553_s18, %s2547_s29 }
 0xda1   : > { %2434 = vmatmul.mubr.msk.bf16.vlgmr.msra.gmra.mrb[44].mxu0 %vm690_vm2, %v1813_v31 }
 0xda2   : > { %p2556_p3 = por %p2555_p2, %p2554_p1 }
 0xda4   : > { %p2557_p5 = pnand %p2556_p3, %p2550_p0 }
 0xe74   : > { %v1854_v32 = vpop.f32.mrb[44].mxu0 }
 0xe75   : > { %v1860_v33 = vpack.c.bf16 %v1854_v32, %v1854_v32  ;;  %v2435_v34 = vpop.f32.mrb[45].mxu0 }
 0xe76   : > { %v1857_v35 = vpop.f32.mrb[46].mxu0 }
 0xe77   : > { %v2436_v36 = vpop.f32.mrb[47].mxu0  ;;  %2440 = vmatmul.mubr.msk.bf16.vlgmr.msra.gmra.mrb[44].mxu1 %vm690_vm2, %v1860_v33 }
 0xe78   : > { %2560 = shalt.err (!%p2557_p5)
}
 0xe79   : > { %s2561_s14 = scalar_lea.hbm %s3097_s20, 512  ;;  %s2565_s25 = scalar_lea.hbm %s3193_s12, 1024 }
 0xe7a   : > { %p2562_p6 = scmp.ne.s32.totalorder %s3097_s20, %s2561_s14  ;;  %p2566_p10 = scmp.lt.u32.totalorder %s3097_s20, %s3193_s12 }
 0xe7b   : > { %p2567_p11 = scmp.lt.u32.totalorder %s2565_s25, %s2561_s14  ;;  %p2569_p13 = scmp.lt.u32.totalorder %s2561_s14, %s3097_s20 }
 0xe7c   : > { %p2563_p7 = pnand %p2562_p6, %p2770_p4 }
 0xe7d   : > { %p2568_p12 = por %p2567_p11, %p2566_p10 }
 0xe7e   : > { %p2564_p9 = pneg %p2563_p7 }
 0xe7f   : > { %p2570_p0 = por %p2569_p13, %p2568_p12 }
 0xe81   : > { %p2571_p1 = pnand %p2570_p0, %p2564_p9 }
 0xe83   : > { %2574 = shalt.err (!%p2571_p1)
}
 0xe84   : > { %s2662_s29 = smov 128   ;;  %s2663_s18 = smov 8   ;;  %v2206_v38 = vld [vmem:[%s3191_s10] ss:$0 sm:$0xff] }
 0xe85   : > { %s3208_s17 = scalar_lea.sflag [#allocation5], %s2880_s27  ;;  %s2090_s28 = sshll.u32 %s2880_s27, 3 }
 0xe86   : > { %2444 = dma.vmem_to_hbm [thread:$0]  (%p2770_p4), %s3092_s30, 512, %s3097_s20, %s3208_s17, %s2662_s29, %s2662_s29, %s2663_s18  }
 0xe87   : > { %s2209_s14 = sshll.u32 %s2649_s24, 7  ;;  %s458_s0 = scalar_lea.vmem [#allocation2], %s2090_s28 }
 0xe88   : > { %s1939_s1 = sshll.u32 %s458_s0, 4  ;;  %s3132_s30 = scalar_lea.hbm %s3192_s11, %s2209_s14  ;;  %s3134_s1 = int_to_ptr.vmem [resolvable:$true] %s1939_s1 }
 0xe89   : > { %s1920_s24 = scalar_lea.sflag [#allocation3], %s2880_s27  ;;  %s2575_s20 = scalar_lea.vmem %s3134_s1, 128 }
 0xe8a   : > { %p2576_p2 = scmp.ne.s32.totalorder %s3134_s1, %s2575_s20  ;;  %s2664_s29 = smov [#allocation2]  }
 0xe8b   : > { %s2579_s18 = sshll.u32 %s2664_s29, 4  ;;  %s2580_s18 = int_to_ptr.vmem [resolvable:$false] %s2579_s18 }
 0xe8c   : > { %p2577_p3 = pnand %p2576_p2, %p2770_p4  ;;  %s2581_s17 = scalar_lea.vmem %s2580_s18, 256 }
 0xe8d   : > { %p2582_p6 = scmp.lt.s32.totalorder %s3134_s1, %s2580_s18  ;;  %p2583_p7 = scmp.lt.s32.totalorder %s2581_s17, %s2575_s20 }
 0xe8e   : > { %p2578_p5 = pneg %p2577_p3 }
 0xe8f   : > { %p2584_p9 = por %p2583_p7, %p2582_p6 }
 0xe91   : > { %p2585_p10 = pnand %p2584_p9, %p2578_p5 }
 0xf4a   : > { %v1903_v37 = vpop.f32.mrb[44].mxu1 }
 0xf4b   : > { %v1909_v39 = vadd.f32 %v1903_v37, %v3051_v54  ;;  %v2441_v40 = vpop.f32.mrb[45].mxu1 }
 0xf4c   : > { %v1906_v41 = vpop.f32.mrb[46].mxu1 }
 0xf4d   : > { %v1917_v42 = vadd.f32 %v2206_v38, %v1909_v39  ;;  %v2442_v43 = vpop.f32.mrb[47].mxu1 }
 0xf4f   : > { %1918 = vst.msk [vmem:[%s458_s0] sm:$0xff] %vm511_vm1, %v1917_v42 }
 0xf50   : > { %2588 = shalt.err (!%p2585_p10)
}
 0xf51   : > { %s2589_s2 = scalar_lea.hbm %s3132_s30, 128  ;;  %s2593_s28 = scalar_lea.hbm %s3192_s11, 256 }
 0xf52   : > { %p2590_p11 = scmp.ne.s32.totalorder %s3132_s30, %s2589_s2  ;;  %p2594_p0 = scmp.lt.u32.totalorder %s3132_s30, %s3192_s11 }
 0xf53   : > { %p2595_p1 = scmp.lt.u32.totalorder %s2593_s28, %s2589_s2  ;;  %p2597_p3 = scmp.lt.u32.totalorder %s2589_s2, %s3132_s30 }
 0xf54   : > { %p2591_p12 = pnand %p2590_p11, %p2770_p4 }
 0xf55   : > { %p2596_p2 = por %p2595_p1, %p2594_p0 }
 0xf56   : > { %p2592_p13 = pneg %p2591_p12 }
 0xf57   : > { %p2598_p5 = por %p2597_p3, %p2596_p2 }
 0xf59   : > { %p2599_p6 = pnand %p2598_p5, %p2592_p13 }
 0xf5b   : > { %2602 = shalt.err (!%p2599_p6)
}
 0xf5c   : > { %2443 = dma.vmem_to_hbm [thread:$0]  (%p2770_p4), %s3134_s1, 128, %s3132_s30, %s1920_s24  }
 0xf5d PF: > { %p2454_p7 = scmp.ge.s32.totalorder %s2657_s26, 2  ;;  %s1968_s14 = sand.u32 1, %s2637_s21  }
 0xf5e   : > { %s1969_s0 = scalar_lea.sflag [#allocation3], %s1968_s14 }
 0xf5f   : > { %p2448_p9 = pnand %p2454_p7, %p2777_p8 }
 0xf61   : > { %2628 = dma.done.wait (!%p2448_p9), %s1969_s0, 128  }
 0xf62   : > { %2630 = vsyncadd (!%p2448_p9), %s1969_s0, 4294967168  ;;  %s1978_s20 = scalar_lea.sflag [#allocation5], %s1968_s14 }
 0xf63   : > { %2632 = dma.done.wait (!%p2448_p9), %s1978_s20, 512  }
 0xf64   : > { %2634 = vsyncadd (!%p2448_p9), %s1978_s20, 4294966784  ;;  %s29_s26 = sadd.s32 1, %s2657_s26   ;;  %s3209_s24 = sld [smem:[#allocation8_spill]] }
 0xf65   : > { %p26_p10 = scmp.ge.s32.totalorder %s29_s26, 4   ;;  %s3210_s25 = sld [smem:[#allocation9_spill]] }
 0xf66   : > { %s3211_s21 = smov %s2641_s22  ;;  %s3212_s22 = smov %s2645_s23 }
 0xf67   : > { %s3213_s23 = smov %s2783_s16  ;;  %28 = sbr.rel (!%p26_p10) target bundleno = 11 (0xb), region = 146 }
 0xf6e   :  { %1983 = vsyncpa [#allocation3], 1 }
 0xf6f   :  { %1985 = vsyncpa [#allocation3 + $0x1], 1 }
 0xf70   :  { %1986 = vsyncpa [#allocation5], 1 }
 0xf71   :  { %1988 = vsyncpa [#allocation5 + $0x1], 1 }

// kernel: tpu_custom_call.1
= control target key start
LH: loop header
LB: loop body
LE: loop exit
PB: predicated region body
PF: predicated region fallthrough
CT: control target
= control target key end

     0   :  { %s3181_s0 = inlined_call_operand.vmem [shape: f32[2,8,32], index: 0, kind: input, shape index: {}]   ;;  %s3182_s1 = inlined_call_operand.vmem [shape: f32[2,8,32], index: 1, kind: input, shape index: {}]   ;;  %s3183_s2 = inlined_call_operand.vmem [shape: f32[2,8,32], index: 2, kind: input, shape index: {}]   ;;  %s3184_s3 = inlined_call_operand.vmem [shape: bf16[4,32,8], index: 3, kind: input, shape index: {}]   ;;  %s3185_s4 = inlined_call_operand.vmem [shape: f32[4,1,8], index: 4, kind: input, shape index: {}]   ;;  %s3186_s5 = inlined_call_operand.vmem [shape: bf16[4,32,8], index: 5, kind: input, shape index: {}]   ;;  %s3187_s6 = inlined_call_operand.vmem [shape: f32[4,1,8], index: 6, kind: input, shape index: {}]   ;;  %s3188_s7 = inlined_call_operand.vmem [shape: bf16[4,32,8], index: 7, kind: input, shape index: {}]   ;;  %s3189_s8 = inlined_call_operand.vmem [shape: f32[4,1,8], index: 8, kind: input, shape index: {}]   ;;  %s3190_s9 = inlined_call_operand.vmem [shape: bf16[4,8,32], index: 9, kind: input, shape index: {}]   ;;  %s3191_s10 = inlined_call_operand.vmem [shape: f32[1,32], index: 10, kind: input, shape index: {}]   ;;  %s3192_s11 = inlined_call_operand.hbm [shape: f32[2,8,32], index: 11, kind: output, shape index: {0}]   ;;  %s3193_s12 = inlined_call_operand.hbm [shape: f32[2,4,8,8], index: 12, kind: output, shape index: {1}]  }
   0x1   :  { %3196 = sst [smem:[#allocation10_spill]] %s3181_s0 }
   0x2   :  { %3197 = sst [smem:[#allocation11_spill]] %s3182_s1 }
   0x3   :  { %3198 = sst [smem:[#allocation12_spill]] %s3183_s2 }
   0x4   :  { %3199 = sst [smem:[#allocation13_spill]] %s3184_s3 }
   0x5   :  { %18 = vsyncpa [#allocation3], 0 }
   0x6   :  { %20 = vsyncpa [#allocation3 + $0x1], 0 }
   0x7   :  { %21 = vsyncpa [#allocation5], 0 }
   0x8   :  { %23 = vsyncpa [#allocation5 + $0x1], 0  ;;  %s2730_s21 = smov 0   ;;  %s2732_s22 = smov 0  }
   0x9   :  { %s2734_s23 = smov 0   ;;  %s2736_s24 = smov 0  }
   0xa   :  { %s2738_s25 = smov 0   ;;  %s2740_s26 = smov 0  }
   0xb LB: > { %3200 = sst [smem:[#allocation8_spill]] %s2653_s25  ;;  %s2085_s27 = sadd.s32 4294967295, %s2657_s26   ;;  %s2657_s26 = sphi %s2740_s26, %s29_s26   ;;  %s2653_s25 = sphi %s2738_s25, %s3210_s25   ;;  %s2649_s24 = sphi %s2736_s24, %s3209_s24   ;;  %s2645_s23 = sphi %s2734_s23, %s3213_s23   ;;  %s2641_s22 = sphi %s2732_s22, %s3212_s22   ;;  %s2637_s21 = sphi %s2730_s21, %s3211_s21  }
   0xc   : > { %s2086_s28 = sadd.s32 4294967294, %s2657_s26   ;;  %s41_s29 = sadd.s32 1, %s2653_s25 }
   0xd   : > { %s298_s30 = sadd.s32 1, %s2645_s23  ;;  %p43_p0 = scmp.ge.s32.totalorder %s41_s29, 2 }
   0xe   : > { %p308_p1 = scmp.ne.s32.totalorder %s2645_s23, %s2641_s22  ;;  %p309_p2 = scmp.eq.s32.totalorder %s2085_s27, 1 }
   0xf   : > { %p314_p3 = scmp.ne.s32.totalorder %s2641_s22, %s2637_s21  ;;  %s3215_s29 = smov (%p43_p0, %s41_s29), 0 }
  0x10   : > { %3201 = sst [smem:[#allocation9_spill]] %s3215_s29  ;;  %p2770_p4 = por %p309_p2, %p308_p1 }
  0x11   : > { %p315_p5 = scmp.eq.s32.totalorder %s2086_s28, 1  ;;  %s293_s14 = ssub.s32 %s2653_s25, %s3215_s29 }
  0x12   : > { %p2089_p6 = scmp.ge.s32.totalorder %s2657_s26, 1  ;;  %p296_p7 = scmp.eq.s32.totalorder %s293_s14, 0 }
  0x13   : > { %p2777_p8 = por %p315_p5, %p314_p3  ;;  %p409_p9 = scmp.lt.s32.totalorder %s2657_s26, 3 }
  0x14   : > { %s2783_s16 = scalar_select %p296_p7, %s2645_s23, %s298_s30  }
  0x15   : > { %p410_p10 = pnand %p2089_p6, %p409_p9 }
  0x16   : > { %v2507_v0 = vld [vmem:[%s3186_s5] sm:$0xff] (!%p410_p10)   ;;  %v2659_v1 = vmov (!%p410_p10), 0.0   ;;  %v2508_v2 = vld [vmem:[%s3186_s5 + $0x8] sm:$0xff] (!%p410_p10)   ;;  %s3204_s3 = sld [smem:[#allocation13_spill]] (!%p410_p10)  ;;  %vm2660_vm0 = vmmov (!%p410_p10), 0   ;;  %p466_p11 = scmp.lt.s32.totalorder (!%p410_p10), %s2649_s24, 1 }
  0x17   : > { %413 = sbr.rel (%p410_p10) target bundleno = 3933 (0xf5d), region = 64  ;;  %2283 = vmatprep.subr.bf16.mxu1 (!%p410_p10), %v2659_v1  ;;  %2275 = vmatprep.subr.bf16.mxu0 (!%p410_p10), %v2659_v1  ;;  %s3205_s1 = sld [smem:[#allocation11_spill]] (!%p410_p10)  ;;  %vm511_vm1 = vcmask (!%p410_p10), 261120   ;;  %v2099_v9 = vld [vmem:[%s3187_s6] ss:$0 sm:$0xff] (!%p410_p10)  ;;  %vm690_vm2 = vcmask (!%p410_p10), 64512  }
  0x18   : > { %2284 = vmatpush3.bf16.msra.mxu1 (!%p410_p10), %v2507_v0  ;;  %2287 = vmatprep.mubr.msk.bf16.mxu1 (!%p410_p10), %vm2660_vm0, %v2659_v1  ;;  %s3206_s0 = sld [smem:[#allocation10_spill]] (!%p410_p10)  ;;  %v2095_v16 = vld [vmem:[%s3185_s4] ss:$0 sm:$0xff] (!%p410_p10)  ;;  %s3207_s2 = sld [smem:[#allocation12_spill]] (!%p410_p10)  ;;  %v2512_v25 = vld [vmem:[%s3188_s7 + $0x8] sm:$0xff] (!%p410_p10)   ;;  %vm754_vm3 = vcmask (!%p410_p10), 1043456  }
  0x19   : > { %2285 = vmatprep.subr.bf16.mxu1 (!%p410_p10), %v2659_v1  ;;  %2279 = vmatprep.mubr.msk.bf16.mxu0 (!%p410_p10), %vm2660_vm0, %v2659_v1  ;;  %v2511_v24 = vld [vmem:[%s3188_s7] sm:$0xff] (!%p410_p10)   ;;  %v2513_v51 = vld [vmem:[%s3186_s5 + $0x10] sm:$0xff] (!%p410_p10)   ;;  %v2514_v53 = vld [vmem:[%s3186_s5 + $0x18] sm:$0xff] (!%p410_p10)   ;;  %s2214_s14 = sshll.u32 (!%p410_p10), %s2649_s24, 9 }
  0x1a   : > { %v2103_v41 = vld [vmem:[%s3189_s8] ss:$0 sm:$0xff] (!%p410_p10)  ;;  %v2123_v62 = vld [vmem:[%s3187_s6 + $0x1] ss:$0 sm:$0xff] (!%p410_p10)  ;;  %s3097_s20 = scalar_lea.hbm (!%p410_p10), %s3193_s12, %s2214_s14 }
  0x1c   : > { %v2509_v3 = vld [vmem:[%s3204_s3] sm:$0xff] (!%p410_p10)   ;;  %v2510_v4 = vld [vmem:[%s3204_s3 + $0x8] sm:$0xff] (!%p410_p10)   ;;  %2286 = vmatpush3.bf16.msra.mxu1 (!%p410_p10), %v2508_v2  ;;  %v2515_v46 = vld [vmem:[%s3204_s3 + $0x10] sm:$0xff] (!%p410_p10)  }
  0x1d   : > { %2276 = vmatpush3.bf16.msra.mxu0 (!%p410_p10), %v2509_v3  ;;  %2299 = vmatprep.subr.bf16.mxu1 (!%p410_p10), %v2659_v1  ;;  %v2516_v47 = vld [vmem:[%s3204_s3 + $0x18] sm:$0xff] (!%p410_p10)  }
  0x1e   : > { %s467_s30 = scalar_select %p466_p11, %s2649_s24, 1  ;;  %2277 = vmatprep.subr.bf16.mxu0 %v2659_v1 }
  0x20   : > { %s2807_s18 = sshll.u32 %s467_s30, 3 }
  0x21   : > { %s476_s27 = scalar_lea.vmem %s3205_s1, %s2807_s18  ;;  %s472_s25 = scalar_lea.vmem %s3206_s0, %s2807_s18  ;;  %2278 = vmatpush3.bf16.msra.mxu0 %v2510_v4  ;;  %v2114_v4 = vld [vmem:[%s3185_s4 + $0x1] ss:$0 sm:$0xff] }
  0x22   : > { %v484_v5 = vld [vmem:[%s476_s27] sm:$0xff]  ;;  %2291 = vmatprep.subr.bf16.mxu0 %v2659_v1  ;;  %s480_s28 = scalar_lea.vmem %s3207_s2, %s2807_s18  ;;  %s2880_s27 = sand.u32 1, %s2641_s22  }
  0x23   : > { %v482_v6 = vld [vmem:[%s472_s25] sm:$0xff]  ;;  %v2818_v7 = vpack.c.bf16 %v484_v5, %v484_v5  ;;  %s2661_s25 = smov [#allocation4]  }
  0x24   : > { %v2820_v8 = vpack.c.bf16 %v482_v6, %v482_v6  ;;  %v486_v26 = vld [vmem:[%s480_s28] sm:$0xff]  ;;  %s2091_s28 = sshll.u32 %s2880_s27, 5  ;;  %s2551_s0 = sshll.u32 %s2661_s25, 4  ;;  %s2552_s0 = int_to_ptr.vmem [resolvable:$false] %s2551_s0 }
  0x25   : > { %2288 = vmatmul.mubr.msk.bf16.vlgmr.msra.gmra.mrb[0].mxu1 %vm511_vm1, %v2818_v7  ;;  %v2853_v27 = vpack.c.bf16 %v486_v26, %v486_v26  ;;  %s2886_s18 = scalar_lea.vmem [#allocation4], %s2091_s28 }
  0x26   : > { %2280 = vmatmul.mubr.msk.bf16.vlgmr.msra.gmra.mrb[0].mxu0 %vm511_vm1, %v2820_v8  ;;  %2301 = vmatprep.mubr.msk.bf16.mxu1 %vm2660_vm0, %v2659_v1  ;;  %s1953_s30 = sshll.u32 %s2886_s18, 4  ;;  %s3092_s30 = int_to_ptr.vmem [resolvable:$true] %s1953_s30 }
  0x27   : > { %2295 = vmatprep.mubr.msk.bf16.mxu0 %vm2660_vm0, %v2659_v1  ;;  %2292 = vmatpush3.bf16.msra.mxu0 %v2511_v24  ;;  %s2547_s29 = scalar_lea.vmem %s3092_s30, 512  ;;  %p2554_p1 = scmp.lt.s32.totalorder %s3092_s30, %s2552_s0 }
  0x28   : > { %2293 = vmatprep.subr.bf16.mxu0 %v2659_v1  ;;  %p2548_p12 = scmp.ne.s32.totalorder %s3092_s30, %s2547_s29 }
  0x2a   : > { %p2549_p13 = pnand %p2548_p12, %p2770_p4 }
  0x2b   : > { %2294 = vmatpush3.bf16.msra.mxu0 %v2512_v25 }
  0x2c   : > { %2305 = vmatprep.subr.bf16.mxu0 %v2659_v1  ;;  %p2550_p0 = pneg %p2549_p13 }
  0x2e   : > { %2296 = vmatmul.mubr.msk.bf16.vlgmr.msra.gmra.mrb[4].mxu0 %vm511_vm1, %v2853_v27 }
  0x2f   : > { %2307 = vmatprep.mubr.msk.bf16.mxu0 %vm2660_vm0, %v2659_v1 }
  0xf8   : > { %v615_v10 = vpop.f32.mrb[0].mxu1 }
  0xf9   : > { %v549_v11 = vpop.f32.mrb[0].mxu0  ;;  %v616_v12 = vadd.f32 %v2099_v9, %v615_v10  ;;  %v2289_v13 = vpop.f32.mrb[1].mxu1 }
  0xfa   : > { %v2281_v14 = vpop.f32.mrb[1].mxu0  ;;  %v618_v15 = vpop.f32.mrb[2].mxu1  ;;  %v550_v22 = vadd.f32 %v2095_v16, %v549_v11  ;;  %v2518_v13 = vld [vmem:[%s3188_s7 + $0x18] sm:$0xff]  }
  0xfb   : > { %v552_v17 = vpop.f32.mrb[2].mxu0  ;;  %v688_v18 = vpack.c.bf16 %v616_v12, %v616_v12  ;;  %v2290_v19 = vpop.f32.mrb[3].mxu1  ;;  %v2517_v12 = vld [vmem:[%s3188_s7 + $0x10] sm:$0xff]  }
  0xfc   : > { %v2282_v20 = vpop.f32.mrb[3].mxu0  ;;  %v687_v23 = vpack.c.bf16 %v550_v22, %v550_v22  ;;  %v2132_v19 = vld [vmem:[%s3189_s8 + $0x1] ss:$0 sm:$0xff] }
  0xfd   : > { %v695_v21 = vsel %vm690_vm2, %v688_v18, 0 }
  0xfe   : > { %2300 = vmatpush3.bf16.xpose.msra.mxu1 %v695_v21 }
  0xff   : > { %2311 = vmatprep.subr.bf16.mxu1 %v2659_v1 }
 0x101   : > { %v681_v38 = vpop.f32.mrb[4].mxu0 }
 0x102   : > { %v2297_v39 = vpop.f32.mrb[5].mxu0  ;;  %v682_v43 = vadd.f32 %v2103_v41, %v681_v38  ;;  %v2519_v41 = vld [vmem:[%s3186_s5 + $0x20] sm:$0xff]  }
 0x103   : > { %v684_v40 = vpop.f32.mrb[6].mxu0 }
 0x104   : > { %v2298_v42 = vpop.f32.mrb[7].mxu0  ;;  %v689_v44 = vpack.c.bf16 %v682_v43, %v682_v43  ;;  %v2520_v43 = vld [vmem:[%s3186_s5 + $0x28] sm:$0xff]  }
 0x105   : > { %2302 = vmatmul.mubr.msk.bf16.vlgmr.msra.gmra.mrb[4].mxu1 %vm690_vm2, %v687_v23 }
 0x106   : > { %2315 = vmatprep.mubr.msk.bf16.mxu1 %vm2660_vm0, %v2659_v1  ;;  %v756_v45 = vsel %vm754_vm3, %v689_v44, 0  ;;  %2312 = vmatpush3.bf16.msra.mxu1 %v2515_v46 }
 0x107   : > { %2306 = vmatpush3.bf16.msra.mxu0 %v756_v45  ;;  %2313 = vmatprep.subr.bf16.mxu1 %v2659_v1  ;;  %v2521_v45 = vld [vmem:[%s3204_s3 + $0x20] sm:$0xff]  }
 0x108   : > { %2319 = vmatprep.subr.bf16.mxu0 %v2659_v1 }
 0x10a   : > { %2314 = vmatpush3.bf16.msra.mxu1 %v2516_v47 }
 0x10b   : > { %2327 = vmatprep.subr.bf16.mxu1 %v2659_v1 }
 0x10d   : > { %2316 = vmatmul.mubr.msk.bf16.vlgmr.msra.gmra.mrb[8].mxu1 %vm511_vm1, %v2820_v8 }
 0x10e   : > { %2331 = vmatprep.mubr.msk.bf16.mxu1 %vm2660_vm0, %v2659_v1  ;;  %2328 = vmatpush3.bf16.msra.mxu1 %v2517_v12 }
 0x10f   : > { %2329 = vmatprep.subr.bf16.mxu1 %v2659_v1 }
 0x112   : > { %2330 = vmatpush3.bf16.msra.mxu1 %v2518_v13 }
 0x113   : > { %2341 = vmatprep.subr.bf16.mxu1 %v2659_v1 }
 0x115   : > { %2332 = vmatmul.mubr.msk.bf16.vlgmr.msra.gmra.mrb[12].mxu1 %vm511_vm1, %v2853_v27 }
 0x116   : > { %2343 = vmatprep.mubr.msk.bf16.mxu1 %vm2660_vm0, %v2659_v1 }
 0x1d8   : > { %v731_v28 = vpop.f32.mrb[4].mxu1 }
 0x1d9   : > { %v2303_v29 = vpop.f32.mrb[5].mxu1  ;;  %v737_v30 = vsel %vm690_vm2, %v731_v28, -inf }
 0x1da   : > { %738 = vmax.xlane.f32.xlu0 %v737_v30  ;;  %v734_v31 = vpop.f32.mrb[6].mxu1 }
 0x1db   : > { %v2304_v32 = vpop.f32.mrb[7].mxu1 }
 0x1e0   : > { %v859_v54 = vpop.f32.mrb[8].mxu1 }
 0x1e1   : > { %v2317_v55 = vpop.f32.mrb[9].mxu1  ;;  %v860_v10 = vadd.f32 %v2114_v4, %v859_v54 }
 0x1e2   : > { %v862_v56 = vpop.f32.mrb[10].mxu1  ;;  %v2156_v55 = vld [vmem:[%s3187_s6 + $0x2] ss:$0 sm:$0xff] }
 0x1e3   : > { %v2318_v57 = vpop.f32.mrb[11].mxu1  ;;  %v995_v11 = vpack.c.bf16 %v860_v10, %v860_v10 }
 0x1e8   : > { %v989_v20 = vpop.f32.mrb[12].mxu1 }
 0x1e9   : > { %v990_v21 = vadd.f32 %v2132_v19, %v989_v20  ;;  %v2333_v22 = vpop.f32.mrb[13].mxu1 }
 0x1ea   : > { %v992_v23 = vpop.f32.mrb[14].mxu1 }
 0x1eb   : > { %v997_v24 = vpack.c.bf16 %v990_v21, %v990_v21  ;;  %v2334_v25 = vpop.f32.mrb[15].mxu1 }
 0x1ed   : > { %v1063_v26 = vsel %vm754_vm3, %v997_v24, 0 }
 0x1ee   : > { %2342 = vmatpush3.bf16.msra.mxu1 %v1063_v26 }
 0x1ef   : > { %2353 = vmatprep.subr.bf16.mxu1 %v2659_v1 }
 0x267   : > { %v739_v33 = vpop.xlane.xlu0 %738 }
 0x268   : > { %v740_v34 = vsub.f32 %v731_v28, %v739_v33  ;;  %v2139_v33 = vld [vmem:[%s3190_s9 + $0x4] sm:$0xf] }
 0x26a   : > { %v741_v35 = vmul.f32 1.442695, %v740_v34  ;;  %v1112_v34 = vsel %vm754_vm3, %v2139_v33, 0 }
 0x26c   : > { %2531 = vpow2.f32 %v741_v35 }
 0x276   : > { %v2532_v36 = vpop.eup %2531 }
 0x277   : > { %v743_v37 = vsel %vm690_vm2, %v2532_v36, 0.0 }
 0x278   : > { %744 = vadd.xlane.f32.xlu0 %v743_v37  ;;  %v799_v37 = vld [vmem:[%s3190_s9] sm:$0xf] }
 0x279   : > { %v1158_v40 = vsel %vm754_vm3, %v799_v37, 0 }
 0x305   : > { %v745_v48 = vpop.xlane.xlu0 %744 }
 0x306   : > { %2533 = vrcp.f32 %v745_v48 }
 0x310   : > { %v2534_v49 = vpop.eup %2533 }
 0x311   : > { %v748_v50 = vmul.f32 %v2534_v49, %v2532_v36 }
 0x313   : > { %v750_v52 = vpack.c.bf16 %v748_v50, %v748_v50  ;;  %749 = vst.msk [vmem:[%s2886_s18] sm:$0xff] %vm690_vm2, %v748_v50  ;;  %v2522_v50 = vld [vmem:[%s3204_s3 + $0x28] sm:$0xff]  }
 0x315   : > { %2308 = vmatmul.mubr.msk.bf16.vlgmr.msra.gmra.mrb[8].mxu0 %vm690_vm2, %v750_v52 }
 0x316   : > { %2320 = vmatpush3.bf16.msra.mxu0 %v2513_v51  ;;  %2323 = vmatprep.mubr.msk.bf16.mxu0 %vm2660_vm0, %v2659_v1 }
 0x317   : > { %2321 = vmatprep.subr.bf16.mxu0 %v2659_v1 }
 0x31a   : > { %2322 = vmatpush3.bf16.msra.mxu0 %v2514_v53 }
 0x31b   : > { %2335 = vmatprep.subr.bf16.mxu0 %v2659_v1 }
 0x31d   : > { %2324 = vmatmul.mubr.msk.bf16.vlgmr.msra.gmra.mrb[12].mxu0 %vm511_vm1, %v2818_v7 }
 0x31e   : > { %2337 = vmatprep.mubr.msk.bf16.mxu0 %vm2660_vm0, %v2659_v1 }
 0x3e8   : > { %v2902_v58 = vpop.f32.mrb[8].mxu0 }
 0x3e9   : > { %v2309_v59 = vpop.f32.mrb[9].mxu0  ;;  %v798_v42 = vpack.c.bf16 %v2902_v58, %v2902_v58 }
 0x3ea   : > { %v795_v60 = vpop.f32.mrb[10].mxu0 }
 0x3eb   : > { %v2310_v61 = vpop.f32.mrb[11].mxu0 }
 0x3f0   : > { %v924_v63 = vpop.f32.mrb[12].mxu0 }
 0x3f1   : > { %v925_v0 = vadd.f32 %v2123_v62, %v924_v63  ;;  %v2325_v2 = vpop.f32.mrb[13].mxu0 }
 0x3f2   : > { %v927_v3 = vpop.f32.mrb[14].mxu0 }
 0x3f3   : > { %v996_v5 = vpack.c.bf16 %v925_v0, %v925_v0  ;;  %v2326_v6 = vpop.f32.mrb[15].mxu0 }
 0x3f5   : > { %v1002_v9 = vsel %vm690_vm2, %v996_v5, 0  ;;  %v2147_v5 = vld [vmem:[%s3185_s4 + $0x2] ss:$0 sm:$0xff] }
 0x3f6   : > { %2336 = vmatpush3.bf16.xpose.msra.mxu0 %v1002_v9 }
 0x3f7   : > { %2347 = vmatprep.subr.bf16.mxu0 %v2659_v1 }
 0x3fd   : > { %2338 = vmatmul.mubr.msk.bf16.vlgmr.msra.gmra.mrb[16].mxu0 %vm690_vm2, %v995_v11 }
 0x3fe   : > { %2349 = vmatprep.mubr.msk.bf16.mxu0 %vm2660_vm0, %v2659_v1  ;;  %2348 = vmatpush3.bf16.msra.mxu0 %v1112_v34 }
 0x3ff   : > { %2359 = vmatprep.subr.bf16.mxu0 %v2659_v1 }
 0x4d0   : > { %v1038_v14 = vpop.f32.mrb[16].mxu0 }
 0x4d1   : > { %v2339_v15 = vpop.f32.mrb[17].mxu0  ;;  %v1044_v16 = vsel %vm690_vm2, %v1038_v14, -inf }
 0x4d2   : > { %1045 = vmax.xlane.f32.xlu1 %v1044_v16  ;;  %v1041_v17 = vpop.f32.mrb[18].mxu0  ;;  %v2524_v15 = vld [vmem:[%s3188_s7 + $0x28] sm:$0xff]  }
 0x4d3   : > { %v2340_v18 = vpop.f32.mrb[19].mxu0 }
 0x55f   : > { %v1046_v28 = vpop.xlane.xlu1 %1045 }
 0x560   : > { %v1047_v29 = vsub.f32 %v1038_v14, %v1046_v28  ;;  %v2523_v14 = vld [vmem:[%s3188_s7 + $0x20] sm:$0xff]  }
 0x562   : > { %v1048_v30 = vmul.f32 1.442695, %v1047_v29 }
 0x564   : > { %2535 = vpow2.f32 %v1048_v30  ;;  %v2165_v30 = vld [vmem:[%s3189_s8 + $0x2] ss:$0 sm:$0xff] }
 0x56e   : > { %v2536_v31 = vpop.eup %2535 }
 0x56f   : > { %v1050_v32 = vsel %vm690_vm2, %v2536_v31, 0.0 }
 0x570   : > { %1051 = vadd.xlane.f32.xlu1 %v1050_v32 }
 0x5fd   : > { %v1052_v35 = vpop.xlane.xlu1 %1051 }
 0x5fe   : > { %2537 = vrcp.f32 %v1052_v35  ;;  %v2172_v35 = vld [vmem:[%s3190_s9 + $0x8] sm:$0xf] }
 0x608   : > { %v2538_v36 = vpop.eup %2537 }
 0x609   : > { %v1055_v38 = vmul.f32 %v2538_v36, %v2536_v31  ;;  %v1512_v36 = vsel %vm754_vm3, %v2172_v35, 0 }
 0x60b   : > { %v1058_v39 = vpack.c.bf16 %v1055_v38, %v1055_v38  ;;  %2137 = vst.msk [vmem:[%s2886_s18 + $0x8] sm:$0xff] %vm690_vm2, %v1055_v38 }
 0x60d   : > { %2344 = vmatmul.mubr.msk.bf16.vlgmr.msra.gmra.mrb[16].mxu1 %vm690_vm2, %v1058_v39 }
 0x60e   : > { %2354 = vmatpush3.bf16.msra.mxu1 %v1158_v40  ;;  %2355 = vmatprep.mubr.msk.bf16.mxu1 %vm2660_vm0, %v2659_v1 }
 0x60f   : > { %2367 = vmatprep.subr.bf16.mxu1 %v2659_v1 }
 0x615   : > { %2356 = vmatmul.mubr.msk.bf16.vlgmr.msra.gmra.mrb[20].mxu1 %vm690_vm2, %v798_v42  ;;  %v2528_v42 = vld [vmem:[%s3204_s3 + $0x38] sm:$0xff]  }
 0x616   : > { %2368 = vmatpush3.bf16.msra.mxu1 %v2519_v41  ;;  %2371 = vmatprep.mubr.msk.bf16.mxu1 %vm2660_vm0, %v2659_v1  ;;  %v2527_v41 = vld [vmem:[%s3204_s3 + $0x30] sm:$0xff]  }
 0x617   : > { %2369 = vmatprep.subr.bf16.mxu1 %v2659_v1 }
 0x61a   : > { %2370 = vmatpush3.bf16.msra.mxu1 %v2520_v43 }
 0x61b   : > { %2383 = vmatprep.subr.bf16.mxu1 %v2659_v1 }
 0x61d   : > { %2372 = vmatmul.mubr.msk.bf16.vlgmr.msra.gmra.mrb[24].mxu1 %vm511_vm1, %v2818_v7 }
 0x61e   : > { %2385 = vmatprep.mubr.msk.bf16.mxu1 %vm2660_vm0, %v2659_v1 }
 0x6e0   : > { %v1099_v44 = vpop.f32.mrb[16].mxu1 }
 0x6e1   : > { %v1105_v46 = vpack.c.bf16 %v1099_v44, %v1099_v44  ;;  %v2345_v47 = vpop.f32.mrb[17].mxu1  ;;  %v2525_v44 = vld [vmem:[%s3186_s5 + $0x30] sm:$0xff]  }
 0x6e2   : > { %v1102_v48 = vpop.f32.mrb[18].mxu1 }
 0x6e3   : > { %v2346_v49 = vpop.f32.mrb[19].mxu1  ;;  %2350 = vmatmul.mubr.msk.bf16.vlgmr.msra.gmra.mrb[20].mxu0 %vm690_vm2, %v1105_v46 }
 0x6e4   : > { %2360 = vmatpush3.bf16.msra.mxu0 %v2521_v45  ;;  %2363 = vmatprep.mubr.msk.bf16.mxu0 %vm2660_vm0, %v2659_v1  ;;  %v2526_v49 = vld [vmem:[%s3186_s5 + $0x38] sm:$0xff]  }
 0x6e5   : > { %2361 = vmatprep.subr.bf16.mxu0 %v2659_v1 }
 0x6e8   : > { %v1194_v51 = vpop.f32.mrb[20].mxu1  ;;  %2362 = vmatpush3.bf16.msra.mxu0 %v2522_v50 }
 0x6e9   : > { %v2357_v52 = vpop.f32.mrb[21].mxu1  ;;  %2375 = vmatprep.subr.bf16.mxu0 %v2659_v1 }
 0x6ea   : > { %v1197_v53 = vpop.f32.mrb[22].mxu1 }
 0x6eb   : > { %v2358_v54 = vpop.f32.mrb[23].mxu1  ;;  %2364 = vmatmul.mubr.msk.bf16.vlgmr.msra.gmra.mrb[24].mxu0 %vm511_vm1, %v2820_v8 }
 0x6ec   : > { %2379 = vmatprep.mubr.msk.bf16.mxu0 %vm2660_vm0, %v2659_v1  ;;  %2376 = vmatpush3.bf16.msra.mxu0 %v2523_v14 }
 0x6ed   : > { %2377 = vmatprep.subr.bf16.mxu0 %v2659_v1 }
 0x6f0   : > { %v1324_v56 = vpop.f32.mrb[24].mxu1  ;;  %2378 = vmatpush3.bf16.msra.mxu0 %v2524_v15 }
 0x6f1   : > { %v1325_v57 = vadd.f32 %v2156_v55, %v1324_v56  ;;  %v2373_v58 = vpop.f32.mrb[25].mxu1  ;;  %2389 = vmatprep.subr.bf16.mxu0 %v2659_v1 }
 0x6f2   : > { %v1327_v59 = vpop.f32.mrb[26].mxu1  ;;  %v2188_v58 = vld [vmem:[%s3187_s6 + $0x3] ss:$0 sm:$0xff] }
 0x6f3   : > { %v1396_v60 = vpack.c.bf16 %v1325_v57, %v1325_v57  ;;  %v2374_v61 = vpop.f32.mrb[27].mxu1  ;;  %2380 = vmatmul.mubr.msk.bf16.vlgmr.msra.gmra.mrb[28].mxu0 %vm511_vm1, %v2853_v27 }
 0x6f4   : > { %2391 = vmatprep.mubr.msk.bf16.mxu0 %vm2660_vm0, %v2659_v1 }
 0x6f5   : > { %v1402_v62 = vsel %vm690_vm2, %v1396_v60, 0 }
 0x6f6   : > { %2384 = vmatpush3.bf16.xpose.msra.mxu1 %v1402_v62  ;;  %v2179_v62 = vld [vmem:[%s3185_s4 + $0x3] ss:$0 sm:$0xff] }
 0x6f7   : > { %2395 = vmatprep.subr.bf16.mxu1 %v2659_v1 }
 0x7b6   : > { %v1148_v63 = vpop.f32.mrb[20].mxu0 }
 0x7b7   : > { %v2986_v0 = vadd.f32 %v1194_v51, %v1148_v63  ;;  %v2351_v2 = vpop.f32.mrb[21].mxu0 }
 0x7b8   : > { %v1151_v3 = vpop.f32.mrb[22].mxu0 }
 0x7b9   : > { %v2352_v4 = vpop.f32.mrb[23].mxu0 }
 0x7be   : > { %v1259_v6 = vpop.f32.mrb[24].mxu0 }
 0x7bf   : > { %v1260_v9 = vadd.f32 %v2147_v5, %v1259_v6  ;;  %v2365_v10 = vpop.f32.mrb[25].mxu0  ;;  %v2529_v5 = vld [vmem:[%s3188_s7 + $0x30] sm:$0xff]   ;;  %v2530_v6 = vld [vmem:[%s3188_s7 + $0x38] sm:$0xff]  }
 0x7c0   : > { %v1262_v11 = vpop.f32.mrb[26].mxu0 }
 0x7c1   : > { %v1395_v12 = vpack.c.bf16 %v1260_v9, %v1260_v9  ;;  %v2366_v13 = vpop.f32.mrb[27].mxu0 }
 0x7c3   : > { %2386 = vmatmul.mubr.msk.bf16.vlgmr.msra.gmra.mrb[28].mxu1 %vm690_vm2, %v1395_v12 }
 0x7c4   : > { %2397 = vmatprep.mubr.msk.bf16.mxu1 %vm2660_vm0, %v2659_v1  ;;  %2396 = vmatpush3.bf16.msra.mxu1 %v1512_v36 }
 0x7c5   : > { %2409 = vmatprep.subr.bf16.mxu1 %v2659_v1 }
 0x7c6   : > { %v1389_v26 = vpop.f32.mrb[28].mxu0 }
 0x7c7   : > { %v2381_v28 = vpop.f32.mrb[29].mxu0  ;;  %v1390_v32 = vadd.f32 %v2165_v30, %v1389_v26 }
 0x7c8   : > { %v1392_v29 = vpop.f32.mrb[30].mxu0 }
 0x7c9   : > { %v2382_v31 = vpop.f32.mrb[31].mxu0  ;;  %v1397_v33 = vpack.c.bf16 %v1390_v32, %v1390_v32 }
 0x7cb   : > { %v1463_v34 = vsel %vm754_vm3, %v1397_v33, 0 }
 0x7cc   : > { %2390 = vmatpush3.bf16.msra.mxu0 %v1463_v34 }
 0x7cd   : > { %2401 = vmatprep.subr.bf16.mxu0 %v2659_v1 }
 0x896   : > { %v1438_v16 = vpop.f32.mrb[28].mxu1 }
 0x897   : > { %v2387_v17 = vpop.f32.mrb[29].mxu1  ;;  %v1444_v18 = vsel %vm690_vm2, %v1438_v16, -inf }
 0x898   : > { %1445 = vmax.xlane.f32.xlu0 %v1444_v18  ;;  %v1441_v19 = vpop.f32.mrb[30].mxu1 }
 0x899   : > { %v2388_v20 = vpop.f32.mrb[31].mxu1 }
 0x925   : > { %v1446_v21 = vpop.xlane.xlu0 %1445 }
 0x926   : > { %v1447_v22 = vsub.f32 %v1438_v16, %v1446_v21 }
 0x928   : > { %v1448_v23 = vmul.f32 1.442695, %v1447_v22 }
 0x92a   : > { %2539 = vpow2.f32 %v1448_v23 }
 0x934   : > { %v2540_v24 = vpop.eup %2539 }
 0x935   : > { %v1450_v25 = vsel %vm690_vm2, %v2540_v24, 0.0 }
 0x936   : > { %1451 = vadd.xlane.f32.xlu1 %v1450_v25  ;;  %v2204_v25 = vld [vmem:[%s3190_s9 + $0xc] sm:$0xf] }
 0x937   : > { %v1867_v26 = vsel %vm754_vm3, %v2204_v25, 0 }
 0x9c3   : > { %v1452_v37 = vpop.xlane.xlu1 %1451 }
 0x9c4   : > { %2541 = vrcp.f32 %v1452_v37 }
 0x9ce   : > { %v2542_v38 = vpop.eup %2541 }
 0x9cf   : > { %v1455_v39 = vmul.f32 %v2542_v38, %v2540_v24 }
 0x9d1   : > { %v1458_v40 = vpack.c.bf16 %v1455_v39, %v1455_v39  ;;  %2170 = vst.msk [vmem:[%s2886_s18 + $0x10] sm:$0xff] %vm690_vm2, %v1455_v39 }
 0x9d3   : > { %2392 = vmatmul.mubr.msk.bf16.vlgmr.msra.gmra.mrb[32].mxu0 %vm690_vm2, %v1458_v40 }
 0x9d4   : > { %2405 = vmatprep.mubr.msk.bf16.mxu0 %vm2660_vm0, %v2659_v1  ;;  %2402 = vmatpush3.bf16.msra.mxu0 %v2527_v41 }
 0x9d5   : > { %2403 = vmatprep.subr.bf16.mxu0 %v2659_v1 }
 0x9d8   : > { %2404 = vmatpush3.bf16.msra.mxu0 %v2528_v42 }
 0x9d9   : > { %2417 = vmatprep.subr.bf16.mxu0 %v2659_v1 }
 0x9db   : > { %2406 = vmatmul.mubr.msk.bf16.vlgmr.msra.gmra.mrb[36].mxu0 %vm511_vm1, %v2820_v8 }
 0x9dc   : > { %2421 = vmatprep.mubr.msk.bf16.mxu0 %vm2660_vm0, %v2659_v1  ;;  %2418 = vmatpush3.bf16.msra.mxu0 %v2529_v5 }
 0x9dd   : > { %2419 = vmatprep.subr.bf16.mxu0 %v2659_v1 }
 0x9e0   : > { %2420 = vmatpush3.bf16.msra.mxu0 %v2530_v6 }
 0x9e1   : > { %2431 = vmatprep.subr.bf16.mxu0 %v2659_v1 }
 0x9e3   : > { %2422 = vmatmul.mubr.msk.bf16.vlgmr.msra.gmra.mrb[40].mxu0 %vm511_vm1, %v2853_v27 }
 0x9e4   : > { %2433 = vmatprep.mubr.msk.bf16.mxu0 %vm2660_vm0, %v2659_v1 }
 0xaa6   : > { %v1499_v43 = vpop.f32.mrb[32].mxu0 }
 0xaa7   : > { %v1505_v45 = vpack.c.bf16 %v1499_v43, %v1499_v43  ;;  %v2393_v46 = vpop.f32.mrb[33].mxu0 }
 0xaa8   : > { %v1502_v47 = vpop.f32.mrb[34].mxu0 }
 0xaa9   : > { %v2394_v48 = vpop.f32.mrb[35].mxu0  ;;  %2398 = vmatmul.mubr.msk.bf16.vlgmr.msra.gmra.mrb[32].mxu1 %vm690_vm2, %v1505_v45 }
 0xaaa   : > { %2410 = vmatpush3.bf16.msra.mxu1 %v2525_v44  ;;  %2413 = vmatprep.mubr.msk.bf16.mxu1 %vm2660_vm0, %v2659_v1 }
 0xaab   : > { %2411 = vmatprep.subr.bf16.mxu1 %v2659_v1 }
 0xaae   : > { %2412 = vmatpush3.bf16.msra.mxu1 %v2526_v49  ;;  %v1614_v8 = vpop.f32.mrb[36].mxu0 }
 0xaaf   : > { %2425 = vmatprep.subr.bf16.mxu1 %v2659_v1  ;;  %v2407_v50 = vpop.f32.mrb[37].mxu0  ;;  %v1615_v3 = vadd.f32 %v2179_v62, %v1614_v8 }
 0xab0   : > { %v1617_v51 = vpop.f32.mrb[38].mxu0 }
 0xab1   : > { %2414 = vmatmul.mubr.msk.bf16.vlgmr.msra.gmra.mrb[36].mxu1 %vm511_vm1, %v2818_v7  ;;  %v2408_v52 = vpop.f32.mrb[39].mxu0  ;;  %v1750_v4 = vpack.c.bf16 %v1615_v3, %v1615_v3 }
 0xab2   : > { %2427 = vmatprep.mubr.msk.bf16.mxu1 %vm2660_vm0, %v2659_v1 }
 0xab6   : > { %v1744_v19 = vpop.f32.mrb[40].mxu0 }
 0xab7   : > { %v2423_v27 = vpop.f32.mrb[41].mxu0 }
 0xab8   : > { %v1747_v20 = vpop.f32.mrb[42].mxu0 }
 0xab9   : > { %v2424_v21 = vpop.f32.mrb[43].mxu0 }
 0xb7c   : > { %v1548_v53 = vpop.f32.mrb[32].mxu1 }
 0xb7d   : > { %v3051_v54 = vadd.f32 %v1548_v53, %v2986_v0  ;;  %v2399_v55 = vpop.f32.mrb[33].mxu1 }
 0xb7e   : > { %v1551_v56 = vpop.f32.mrb[34].mxu1 }
 0xb7f   : > { %v2400_v57 = vpop.f32.mrb[35].mxu1 }
 0xb84   : > { %v1679_v59 = vpop.f32.mrb[36].mxu1 }
 0xb85   : > { %v1680_v7 = vadd.f32 %v2188_v58, %v1679_v59  ;;  %v2415_v60 = vpop.f32.mrb[37].mxu1 }
 0xb86   : > { %v1682_v61 = vpop.f32.mrb[38].mxu1 }
 0xb87   : > { %v1751_v63 = vpack.c.bf16 %v1680_v7, %v1680_v7  ;;  %v2416_v2 = vpop.f32.mrb[39].mxu1 }
 0xb89   : > { %v1757_v0 = vsel %vm690_vm2, %v1751_v63, 0 }
 0xb8a   : > { %2426 = vmatpush3.bf16.xpose.msra.mxu1 %v1757_v0 }
 0xb8b   : > { %2437 = vmatprep.subr.bf16.mxu1 %v2659_v1 }
 0xb91   : > { %2428 = vmatmul.mubr.msk.bf16.vlgmr.msra.gmra.mrb[40].mxu1 %vm690_vm2, %v1750_v4 }
 0xb92   : > { %2439 = vmatprep.mubr.msk.bf16.mxu1 %vm2660_vm0, %v2659_v1  ;;  %v2197_v1 = vld [vmem:[%s3189_s8 + $0x3] ss:$0 sm:$0xff]  ;;  %2438 = vmatpush3.bf16.msra.mxu1 %v1867_v26 }
 0xb93   : > { %v1745_v22 = vadd.f32 %v2197_v1, %v1744_v19 }
 0xb95   : > { %v1752_v23 = vpack.c.bf16 %v1745_v22, %v1745_v22 }
 0xb97   : > { %v1818_v24 = vsel %vm754_vm3, %v1752_v23, 0 }
 0xb98   : > { %2432 = vmatpush3.bf16.msra.mxu0 %v1818_v24 }
 0xc64   : > { %v1793_v9 = vpop.f32.mrb[40].mxu1 }
 0xc65   : > { %v2429_v10 = vpop.f32.mrb[41].mxu1  ;;  %v1799_v11 = vsel %vm690_vm2, %v1793_v9, -inf }
 0xc66   : > { %1800 = vmax.xlane.f32.xlu0 %v1799_v11  ;;  %v1796_v12 = vpop.f32.mrb[42].mxu1 }
 0xc67   : > { %v2430_v13 = vpop.f32.mrb[43].mxu1 }
 0xcf3   : > { %v1801_v14 = vpop.xlane.xlu0 %1800 }
 0xcf4   : > { %v1802_v15 = vsub.f32 %v1793_v9, %v1801_v14 }
 0xcf6   : > { %v1803_v16 = vmul.f32 1.442695, %v1802_v15 }
 0xcf8   : > { %2543 = vpow2.f32 %v1803_v16 }
 0xd02   : > { %v2544_v17 = vpop.eup %2543 }
 0xd03   : > { %v1805_v18 = vsel %vm690_vm2, %v2544_v17, 0.0 }
 0xd04   : > { %1806 = vadd.xlane.f32.xlu1 %v1805_v18 }
 0xd91   : > { %v1807_v28 = vpop.xlane.xlu1 %1806 }
 0xd92   : > { %2545 = vrcp.f32 %v1807_v28 }
 0xd9c   : > { %v2546_v29 = vpop.eup %2545 }
 0xd9d   : > { %v1810_v30 = vmul.f32 %v2546_v29, %v2544_v17 }
 0xd9f   : > { %v1813_v31 = vpack.c.bf16 %v1810_v30, %v1810_v30  ;;  %2202 = vst.msk [vmem:[%s2886_s18 + $0x18] sm:$0xff] %vm690_vm2, %v1810_v30  ;;  %s2553_s18 = scalar_lea.vmem %s2552_s0, 1024 }
 0xda0   : > { %p2555_p2 = scmp.lt.s32.totalorder %s2553_s18, %s2547_s29 }
 0xda1   : > { %2434 = vmatmul.mubr.msk.bf16.vlgmr.msra.gmra.mrb[44].mxu0 %vm690_vm2, %v1813_v31 }
 0xda2   : > { %p2556_p3 = por %p2555_p2, %p2554_p1 }
 0xda4   : > { %p2557_p5 = pnand %p2556_p3, %p2550_p0 }
 0xe74   : > { %v1854_v32 = vpop.f32.mrb[44].mxu0 }
 0xe75   : > { %v1860_v33 = vpack.c.bf16 %v1854_v32, %v1854_v32  ;;  %v2435_v34 = vpop.f32.mrb[45].mxu0 }
 0xe76   : > { %v1857_v35 = vpop.f32.mrb[46].mxu0 }
 0xe77   : > { %v2436_v36 = vpop.f32.mrb[47].mxu0  ;;  %2440 = vmatmul.mubr.msk.bf16.vlgmr.msra.gmra.mrb[44].mxu1 %vm690_vm2, %v1860_v33 }
 0xe78   : > { %2560 = shalt.err (!%p2557_p5)
}
 0xe79   : > { %s2561_s14 = scalar_lea.hbm %s3097_s20, 512  ;;  %s2565_s25 = scalar_lea.hbm %s3193_s12, 1024 }
 0xe7a   : > { %p2562_p6 = scmp.ne.s32.totalorder %s3097_s20, %s2561_s14  ;;  %p2566_p10 = scmp.lt.u32.totalorder %s3097_s20, %s3193_s12 }
 0xe7b   : > { %p2567_p11 = scmp.lt.u32.totalorder %s2565_s25, %s2561_s14  ;;  %p2569_p13 = scmp.lt.u32.totalorder %s2561_s14, %s3097_s20 }
 0xe7c   : > { %p2563_p7 = pnand %p2562_p6, %p2770_p4 }
 0xe7d   : > { %p2568_p12 = por %p2567_p11, %p2566_p10 }
 0xe7e   : > { %p2564_p9 = pneg %p2563_p7 }
 0xe7f   : > { %p2570_p0 = por %p2569_p13, %p2568_p12 }
 0xe81   : > { %p2571_p1 = pnand %p2570_p0, %p2564_p9 }
 0xe83   : > { %2574 = shalt.err (!%p2571_p1)
}
 0xe84   : > { %s2662_s29 = smov 128   ;;  %s2663_s18 = smov 8   ;;  %v2206_v38 = vld [vmem:[%s3191_s10] ss:$0 sm:$0xff] }
 0xe85   : > { %s3208_s17 = scalar_lea.sflag [#allocation5], %s2880_s27  ;;  %s2090_s28 = sshll.u32 %s2880_s27, 3 }
 0xe86   : > { %2444 = dma.vmem_to_hbm [thread:$0]  (%p2770_p4), %s3092_s30, 512, %s3097_s20, %s3208_s17, %s2662_s29, %s2662_s29, %s2663_s18  }
 0xe87   : > { %s2209_s14 = sshll.u32 %s2649_s24, 7  ;;  %s458_s0 = scalar_lea.vmem [#allocation2], %s2090_s28 }
 0xe88   : > { %s1939_s1 = sshll.u32 %s458_s0, 4  ;;  %s3132_s30 = scalar_lea.hbm %s3192_s11, %s2209_s14  ;;  %s3134_s1 = int_to_ptr.vmem [resolvable:$true] %s1939_s1 }
 0xe89   : > { %s1920_s24 = scalar_lea.sflag [#allocation3], %s2880_s27  ;;  %s2575_s20 = scalar_lea.vmem %s3134_s1, 128 }
 0xe8a   : > { %p2576_p2 = scmp.ne.s32.totalorder %s3134_s1, %s2575_s20  ;;  %s2664_s29 = smov [#allocation2]  }
 0xe8b   : > { %s2579_s18 = sshll.u32 %s2664_s29, 4  ;;  %s2580_s18 = int_to_ptr.vmem [resolvable:$false] %s2579_s18 }
 0xe8c   : > { %p2577_p3 = pnand %p2576_p2, %p2770_p4  ;;  %s2581_s17 = scalar_lea.vmem %s2580_s18, 256 }
 0xe8d   : > { %p2582_p6 = scmp.lt.s32.totalorder %s3134_s1, %s2580_s18  ;;  %p2583_p7 = scmp.lt.s32.totalorder %s2581_s17, %s2575_s20 }
 0xe8e   : > { %p2578_p5 = pneg %p2577_p3 }
 0xe8f   : > { %p2584_p9 = por %p2583_p7, %p2582_p6 }
 0xe91   : > { %p2585_p10 = pnand %p2584_p9, %p2578_p5 }
 0xf4a   : > { %v1903_v37 = vpop.f32.mrb[44].mxu1 }
 0xf4b   : > { %v1909_v39 = vadd.f32 %v1903_v37, %v3051_v54  ;;  %v2441_v40 = vpop.f32.mrb[45].mxu1 }
 0xf4c   : > { %v1906_v41 = vpop.f32.mrb[46].mxu1 }
 0xf4d   : > { %v1917_v42 = vadd.f32 %v2206_v38, %v1909_v39  ;;  %v2442_v43 = vpop.f32.mrb[47].mxu1 }
 0xf4f   : > { %1918 = vst.msk [vmem:[%s458_s0] sm:$0xff] %vm511_vm1, %v1917_v42 }
 0xf50   : > { %2588 = shalt.err (!%p2585_p10)
}
 0xf51   : > { %s2589_s2 = scalar_lea.hbm %s3132_s30, 128  ;;  %s2593_s28 = scalar_lea.hbm %s3192_s11, 256 }
 0xf52   : > { %p2590_p11 = scmp.ne.s32.totalorder %s3132_s30, %s2589_s2  ;;  %p2594_p0 = scmp.lt.u32.totalorder %s3132_s30, %s3192_s11 }
 0xf53   : > { %p2595_p1 = scmp.lt.u32.totalorder %s2593_s28, %s2589_s2  ;;  %p2597_p3 = scmp.lt.u32.totalorder %s2589_s2, %s3132_s30 }
 0xf54   : > { %p2591_p12 = pnand %p2590_p11, %p2770_p4 }
 0xf55   : > { %p2596_p2 = por %p2595_p1, %p2594_p0 }
 0xf56   : > { %p2592_p13 = pneg %p2591_p12 }
 0xf57   : > { %p2598_p5 = por %p2597_p3, %p2596_p2 }
 0xf59   : > { %p2599_p6 = pnand %p2598_p5, %p2592_p13 }
 0xf5b   : > { %2602 = shalt.err (!%p2599_p6)
}
 0xf5c   : > { %2443 = dma.vmem_to_hbm [thread:$0]  (%p2770_p4), %s3134_s1, 128, %s3132_s30, %s1920_s24  }
 0xf5d PF: > { %p2454_p7 = scmp.ge.s32.totalorder %s2657_s26, 2  ;;  %s1968_s14 = sand.u32 1, %s2637_s21  }
 0xf5e   : > { %s1969_s0 = scalar_lea.sflag [#allocation3], %s1968_s14 }
 0xf5f   : > { %p2448_p9 = pnand %p2454_p7, %p2777_p8 }
 0xf61   : > { %2628 = dma.done.wait (!%p2448_p9), %s1969_s0, 128  }
 0xf62   : > { %2630 = vsyncadd (!%p2448_p9), %s1969_s0, 4294967168  ;;  %s1978_s20 = scalar_lea.sflag [#allocation5], %s1968_s14 }
 0xf63   : > { %2632 = dma.done.wait (!%p2448_p9), %s1978_s20, 512  }
 0xf64   : > { %2634 = vsyncadd (!%p2448_p9), %s1978_s20, 4294966784  ;;  %s29_s26 = sadd.s32 1, %s2657_s26   ;;  %s3209_s24 = sld [smem:[#allocation8_spill]] }
 0xf65   : > { %p26_p10 = scmp.ge.s32.totalorder %s29_s26, 4   ;;  %s3210_s25 = sld [smem:[#allocation9_spill]] }
 0xf66   : > { %s3211_s21 = smov %s2641_s22  ;;  %s3212_s22 = smov %s2645_s23 }
 0xf67   : > { %s3213_s23 = smov %s2783_s16  ;;  %28 = sbr.rel (!%p26_p10) target bundleno = 11 (0xb), region = 146 }
 0xf6e   :  { %1983 = vsyncpa [#allocation3], 1 }
 0xf6f   :  { %1985 = vsyncpa [#allocation3 + $0x1], 1 }
 0xf70   :  { %1986 = vsyncpa [#allocation5], 1 }
 0xf71   :  { %1988 = vsyncpa [#allocation5 + $0x1], 1 }

</bundles_post_ra>
